<compile_context>
chip_gen: v5e
topology: v5e:2x2
jax: 0.10.0
libtpu: 0.0.40
codegen_flags: <defaults>
</compile_context>

<pallas_src>
import numpy as np
import jax
import jax.numpy as jnp
from jax import lax
from jax.experimental import pallas as pl
from jax.experimental.pallas import tpu as pltpu

# ----- module configuration (stand-ins for the PyTorch globals) -----
H_DIM = 32
EMBEDDING_DIM = 16
BOTTLENECK_DIM = 8
MLP_PRE_HIDDEN = 512        # hard-coded 512 in the module's __init__
BATCH_NORM = False          # make_mlp(batch_norm=BATCH_NORM) -> plain Linear+LeakyReLU
DROPOUT = 0.0
LEAKY_SLOPE = 0.01          # nn.LeakyReLU default negative_slope

OUT_PAD = 128               # pad BOTTLENECK_DIM -> 128 lanes for a dense output store
COMPUTE_DTYPE = jnp.bfloat16  # MXU operand dtype (accumulation stays f32)

TILE_I = 16                 # target-pedestrian tile (grid axis)
TILE_J = 16                 # neighbour-pedestrian tile (in-kernel dynamic loop)


def _leaky(x):
    return jnp.where(x > 0, x, LEAKY_SLOPE * x)


# ---------------------------------------------------------------------------
# Pallas kernel: one grid step == one (scene, target-i tile).
# ---------------------------------------------------------------------------
def _ssp_tile_kernel(lens_ref,                       # SMEM (num_scenes,) int32
                     pos_i_ref,                      # (TILE_I, 2E) f32  pos part of this i-tile
                     base_ref,                       # (N_PAD, 2E) f32   neighbour embeddings
                     hy_ref,                         # (N_PAD, 512) f32  h[j]@Wp1h + fused bias
                     wf_ref,                         # (2E, 512) bf16    W2e @ Wp1e (fused)
                     wp2_ref,                        # (512, OUT_PAD) bf16
                     bp2_ref,                        # (1, OUT_PAD) f32
                     out_ref,                        # (TILE_I, OUT_PAD) f32
                     acc_ref):                       # VMEM scratch (TILE_I, OUT_PAD) f32
    s = pl.program_id(0)
    it = pl.program_id(1)
    n = lens_ref[s]                       # true number of pedestrians in this scene
    i0 = it * TILE_I                      # first target row of this tile

    @pl.when(i0 < n)
    def _():
        pos_i = pos_i_ref[...]            # (TI, 2E)
        wf = wf_ref[...]
        wp2 = wp2_ref[...]
        bp2 = bp2_ref[...]
        acc_ref[...] = jnp.full_like(acc_ref, -jnp.inf)

        # Only iterate neighbour tiles that contain real pedestrians.
        @pl.loop(0, pl.cdiv(n, TILE_J))
        def _(jt):
            j0 = pl.multiple_of(jt * TILE_J, TILE_J)
            base_j = base_ref[pl.ds(j0, TILE_J), :]              # (TJ, 2E)
            hy_j = hy_ref[pl.ds(j0, TILE_J), :]                  # (TJ, 512)

            # pos_embedding layer 1 (K=3 linear hoisted to wrapper) + LeakyReLU on the VPU:
            #   e1[i, j] = leaky([x_j - x_i, y_j - y_i, s_j] @ W1e + b1e)
            #            = leaky(base[j] - pos_part[i])
            e1 = _leaky(base_j[None, :, :] - pos_i[:, None, :])  # (TI, TJ, 2E)
            e1 = e1.reshape(TILE_I * TILE_J, 2 * EMBEDDING_DIM)

            # Fused (pos_embedding layer 2) @ (mlp_pre_pool layer 1, emb half) on the MXU.
            embp = jnp.dot(e1.astype(COMPUTE_DTYPE), wf,
                           preferred_element_type=jnp.float32)   # (TI*TJ, 512)

            # Add the i-independent hidden-state half, LeakyReLU, emit bf16 once.
            y = _leaky(embp.reshape(TILE_I, TILE_J, MLP_PRE_HIDDEN)
                       + hy_j[None, :, :]).astype(COMPUTE_DTYPE)

            # mlp_pre_pool layer 2 (output lanes pre-padded to 128).
            z = _leaky(jnp.dot(y.reshape(TILE_I * TILE_J, MLP_PRE_HIDDEN), wp2,
                               preferred_element_type=jnp.float32) + bp2)
            z = z.reshape(TILE_I, TILE_J, OUT_PAD)

            # Mask padded neighbours inside this j-tile, running max over j-tiles.
            j_idx = j0 + lax.broadcasted_iota(jnp.int32, (1, TILE_J, 1), 1)
            z = jnp.where(j_idx < n, z, -jnp.inf)
            acc_ref[...] = jnp.maximum(acc_ref[...], jnp.max(z, axis=1))

        out_ref[...] = acc_ref[...]                              # lane-dense (TI, 128) store

    @pl.when(i0 >= n)
    def _():
        # Padded target tile: write zeros (cheap, deterministic); wrapper never gathers it.
        out_ref[...] = jnp.zeros_like(out_ref)


# ---------------------------------------------------------------------------
# Parameter preparation: quantize + algebraic fusion of w2e @ wp1e.
# ---------------------------------------------------------------------------
def _prepare_fused_params(params):
    w1e = params["w1e"].astype(jnp.float32)
    b1e = params["b1e"].astype(jnp.float32)
    wp1h = params["wp1h"].astype(COMPUTE_DTYPE)
    # No activation between pos_embedding layer 2 and mlp_pre_pool layer 1 -> fuse exactly.
    w_fused = jnp.dot(params["w2e"].astype(jnp.float32),
                      params["wp1e"].astype(jnp.float32)).astype(COMPUTE_DTYPE)   # (2E, 512)
    b_fused = (jnp.dot(params["b2e"].astype(jnp.float32),
                       params["wp1e"].astype(jnp.float32))
               + params["bp1"].astype(jnp.float32))                               # (1, 512)
    wp2_pad = jnp.zeros((MLP_PRE_HIDDEN, OUT_PAD), COMPUTE_DTYPE)
    wp2_pad = wp2_pad.at[:, :BOTTLENECK_DIM].set(params["wp2"].astype(COMPUTE_DTYPE))
    bp2_pad = jnp.zeros((1, OUT_PAD), jnp.float32)
    bp2_pad = bp2_pad.at[:, :BOTTLENECK_DIM].set(params["bp2"].astype(jnp.float32))
    return dict(w1e=w1e, b1e=b1e, wp1h=wp1h, w_fused=w_fused, b_fused=b_fused,
                wp2_pad=wp2_pad, bp2_pad=bp2_pad)


# ---------------------------------------------------------------------------
# Forward wrapper
# ---------------------------------------------------------------------------
def social_speed_pooling_forward(h_states, seq_start_end, train_or_test, speed_to_add,
                                 last_pos, speed, params):
    # TODO(synk): the train_or_test == 1 branch calls speed_control(), which depends on
    # undefined dataset globals (ETH/HOTEL/ADD_SPEED_* ...); only the inference path
    # (train_or_test == 0) is implemented here.
    del train_or_test, speed_to_add

    fp = _prepare_fused_params(params)

    h2d = h_states.reshape(-1, H_DIM).astype(jnp.float32)
    feat = jnp.concatenate([last_pos, speed], axis=1).astype(jnp.float32)    # (P, 3) [x,y,s]
    P = feat.shape[0]

    # --- tiny per-pedestrian precompute hoisted to XLA (K=3 layer and h@Wp1h GEMM) ---
    w1e, b1e = fp["w1e"], fp["b1e"]
    pos_part = feat[:, 0:1] * w1e[0:1, :] + feat[:, 1:2] * w1e[1:2, :]       # (P, 2E)
    base = pos_part + feat[:, 2:3] * w1e[2:3, :] + b1e                       # (P, 2E)
    hy = jnp.dot(h2d.astype(COMPUTE_DTYPE), fp["wp1h"],
                 preferred_element_type=jnp.float32) + fp["b_fused"]         # (P, 512)

    # --- static scene bookkeeping (host side) ---
    starts = np.asarray([int(s) for s, _ in seq_start_end], np.int32)
    ends = np.asarray([int(e) for _, e in seq_start_end], np.int32)
    lens = ends - starts
    num_scenes = int(len(lens))
    n_pad = int(max(TILE_I, -(-int(lens.max()) // TILE_I) * TILE_I))         # multiple of 16
    n_i_tiles = n_pad // TILE_I

    row = np.arange(n_pad, dtype=np.int32)[None, :]
    gather_idx = starts[:, None] + row
    gather_idx = np.where(row < lens[:, None], gather_idx, P)                # P -> zero pad row
    gather_idx = jnp.asarray(gather_idx, jnp.int32)
    unpad_idx = jnp.asarray(np.concatenate(
        [i * n_pad + np.arange(l, dtype=np.int32) for i, l in enumerate(lens)]), jnp.int32)
    lens_arr = jnp.asarray(lens, jnp.int32)

    def pack(x):                                                             # (P, D) -> (S, n_pad, D)
        xe = jnp.concatenate([x, jnp.zeros((1, x.shape[1]), x.dtype)], axis=0)
        return xe[gather_idx]

    pos_part_b = pack(pos_part)
    base_b = pack(base)
    hy_b = pack(hy)

    E2 = 2 * EMBEDDING_DIM
    grid_spec = pltpu.PrefetchScalarGridSpec(
        num_scalar_prefetch=1,                     # scene lengths land in SMEM
        grid=(num_scenes, n_i_tiles),
        in_specs=[
            pl.BlockSpec((None, TILE_I, E2), lambda s, it, L: (s, it, 0)),
            pl.BlockSpec((None, n_pad, E2), lambda s, it, L: (s, 0, 0)),
            pl.BlockSpec((None, n_pad, MLP_PRE_HIDDEN), lambda s, it, L: (s, 0, 0)),
            pl.BlockSpec((E2, MLP_PRE_HIDDEN), lambda s, it, L: (0, 0)),
            pl.BlockSpec((MLP_PRE_HIDDEN, OUT_PAD), lambda s, it, L: (0, 0)),
            pl.BlockSpec((1, OUT_PAD), lambda s, it, L: (0, 0)),
        ],
        out_specs=pl.BlockSpec((None, TILE_I, OUT_PAD), lambda s, it, L: (s, it, 0)),
        scratch_shapes=[pltpu.VMEM((TILE_I, OUT_PAD), jnp.float32)],
    )

    out_padded = pl.pallas_call(
        _ssp_tile_kernel,
        grid_spec=grid_spec,
        out_shape=jax.ShapeDtypeStruct((num_scenes, n_pad, OUT_PAD), jnp.float32),
        compiler_params=pltpu.CompilerParams(
            dimension_semantics=("parallel", "parallel")),   # scenes and i-tiles independent
    )(lens_arr, pos_part_b, base_b, hy_b, fp["w_fused"], fp["wp2_pad"], fp["bp2_pad"])

    # Un-pad with one gather: keep valid target rows and the real 8 output lanes.
    out = out_padded.reshape(num_scenes * n_pad, OUT_PAD)[unpad_idx, :BOTTLENECK_DIM]
    return out


# ----- deterministic parameter init (PyTorch nn.Linear default: U(+-1/sqrt(fan_in))) -----
def init_params(key):
    ks = jax.random.split(key, 4)

    def lin(k, fan_in, fan_out):
        kw, kb = jax.random.split(k)
        bound = 1.0 / (fan_in ** 0.5)
        w = jax.random.uniform(kw, (fan_in, fan_out), jnp.float32, -bound, bound)
        b = jax.random.uniform(kb, (1, fan_out), jnp.float32, -bound, bound)
        return w, b

    w1e, b1e = lin(ks[0], 3, 2 * EMBEDDING_DIM)
    w2e, b2e = lin(ks[1], 2 * EMBEDDING_DIM, EMBEDDING_DIM)
    wp1, bp1 = lin(ks[2], H_DIM + EMBEDDING_DIM, MLP_PRE_HIDDEN)
    wp2, bp2 = lin(ks[3], MLP_PRE_HIDDEN, BOTTLENECK_DIM)
    return dict(w1e=w1e, b1e=b1e, w2e=w2e, b2e=b2e,
                wp1h=wp1[:H_DIM], wp1e=wp1[H_DIM:], bp1=bp1,
                wp2=wp2, bp2=bp2)


# ----- pure-JAX reference: mirrors the PyTorch tile/repeat/concat/max formulation,
#       using the same bf16 quantization & exact W2e@Wp1e fusion as the kernel so the
#       assert isolates kernel correctness from quantization error. -----
def reference_forward(h_states, seq_start_end, last_pos, speed, params):
    fp = _prepare_fused_params(params)
    h2d = h_states.reshape(-1, H_DIM).astype(jnp.float32)
    feat = jnp.concatenate([last_pos, speed], axis=1).astype(jnp.float32)
    outs = []
    for (start, end) in seq_start_end:
        start, end = int(start), int(end)
        n = end - start
        h = h2d[start:end]
        f = feat[start:end]
        fj = jnp.tile(f, (n, 1))                    # curr_end_pos_1 (neighbour j)
        fi = jnp.repeat(f, n, axis=0)               # curr_end_pos_2 (target i)
        soc = jnp.concatenate([fj[:, :2] - fi[:, :2], fj[:, 2:3]], axis=1)
        e1 = _leaky(jnp.dot(soc, fp["w1e"],
                            precision=lax.Precision.HIGHEST) + fp["b1e"])
        hj = jnp.tile(h, (n, 1))                    # repeat_hstate (neighbour j)
        hy = jnp.dot(hj.astype(COMPUTE_DTYPE), fp["wp1h"],
                     preferred_element_type=jnp.float32) + fp["b_fused"]
        embp = jnp.dot(e1.astype(COMPUTE_DTYPE), fp["w_fused"],
                       preferred_element_type=jnp.float32)
        y = _leaky(embp + hy).astype(COMPUTE_DTYPE)
        z = _leaky(jnp.dot(y, fp["wp2_pad"], preferred_element_type=jnp.float32)
                   + fp["bp2_pad"])[:, :BOTTLENECK_DIM]
        outs.append(z.reshape(n, n, -1).max(axis=1))
    return jnp.concatenate(outs, axis=0)


if __name__ == "__main__":
    key = jax.random.PRNGKey(0)
    kp, kh, kpos, kspd = jax.random.split(key, 4)
    params = init_params(kp)

    # Two scenes: 3 pedestrians and 5 pedestrians -> P = 8 total.
    seq_start_end = [(0, 3), (3, 8)]
    P = 8
    h_states = jax.random.normal(kh, (P, H_DIM), jnp.float32)
    last_pos = jax.random.normal(kpos, (P, 2), jnp.float32)
    speed = jax.nn.sigmoid(jax.random.normal(kspd, (P, 1), jnp.float32))

    out = social_speed_pooling_forward(h_states, seq_start_end,
                                       train_or_test=0, speed_to_add=0.0,
                                       last_pos=last_pos, speed=speed,
                                       params=params)
    out = jax.block_until_ready(out)

    ref = reference_forward(h_states, seq_start_end, last_pos, speed, params)
    assert out.shape == (P, BOTTLENECK_DIM), out.shape
    max_err = float(jnp.max(jnp.abs(out - ref)))
    assert jnp.allclose(out, ref, rtol=1e-2, atol=1e-2), max_err
    print("KERNEL_OK")
</pallas_src>

<mosaic_0001>
module attributes {stable_mosaic.version = 11 : i64} {
  func.func @_ssp_tile_kernel(%arg0: i32, %arg1: i32, %arg2: memref<2xi32, #tpu.memory_space<smem>>, %arg3: memref<1x16x32xf32, #tpu.memory_space<vmem>>, %arg4: memref<1x16x32xf32, #tpu.memory_space<vmem>>, %arg5: memref<1x16x512xf32, #tpu.memory_space<vmem>>, %arg6: memref<32x512xbf16, #tpu.memory_space<vmem>>, %arg7: memref<512x128xbf16, #tpu.memory_space<vmem>>, %arg8: memref<1x128xf32, #tpu.memory_space<vmem>>, %arg9: memref<1x16x128xf32, #tpu.memory_space<vmem>>, %arg10: memref<16x128xf32, #tpu.memory_space<vmem>>) attributes {dimension_semantics = [#tpu.dimension_semantics<parallel>, #tpu.dimension_semantics<parallel>], iteration_bounds = array<i64: 2, 1>, scalar_prefetch = 1 : i64, scratch_operands = 1 : i64, tpu.core_type = #tpu.core_type<tc>, window_params = [{transform_indices = @transform_0, window_bounds = array<i64: 1, 16, 32>}, {transform_indices = @transform_1, window_bounds = array<i64: 1, 16, 32>}, {transform_indices = @transform_2, window_bounds = array<i64: 1, 16, 512>}, {pipeline_mode = #tpu.pipeline_mode<synchronous>, transform_indices = @transform_3, window_bounds = array<i64: 32, 512>}, {pipeline_mode = #tpu.pipeline_mode<synchronous>, transform_indices = @transform_4, window_bounds = array<i64: 512, 128>}, {pipeline_mode = #tpu.pipeline_mode<synchronous>, transform_indices = @transform_5, window_bounds = array<i64: 1, 128>}, {transform_indices = @transform_6, window_bounds = array<i64: 1, 16, 128>}]} {
    %0 = arith.index_cast %arg0 : i32 to index
    %1 = memref.load %arg2[%0] : memref<2xi32, #tpu.memory_space<smem>>
    %c16_i32 = arith.constant 16 : i32
    %2 = arith.muli %arg1, %c16_i32 : i32
    %3 = arith.cmpi slt, %2, %1 : i32
    %4 = arith.extui %3 : i1 to i32
    %c0_i32 = arith.constant 0 : i32
    %5 = arith.cmpi ne, %4, %c0_i32 : i32
    scf.if %5 {
      %c0 = arith.constant 0 : index
      %c0_1 = arith.constant 0 : index
      %c0_2 = arith.constant 0 : index
      %9 = vector.load %arg3[%c0, %c0_1, %c0_2] : memref<1x16x32xf32, #tpu.memory_space<vmem>>, vector<1x16x32xf32>
      %10 = vector.shape_cast %9 : vector<1x16x32xf32> to vector<16x32xf32>
      %c0_3 = arith.constant 0 : index
      %c0_4 = arith.constant 0 : index
      %11 = vector.load %arg6[%c0_3, %c0_4] : memref<32x512xbf16, #tpu.memory_space<vmem>>, vector<32x512xbf16>
      %c0_5 = arith.constant 0 : index
      %c0_6 = arith.constant 0 : index
      %12 = vector.load %arg7[%c0_5, %c0_6] : memref<512x128xbf16, #tpu.memory_space<vmem>>, vector<512x128xbf16>
      %c0_7 = arith.constant 0 : index
      %c0_8 = arith.constant 0 : index
      %13 = vector.load %arg8[%c0_7, %c0_8] : memref<1x128xf32, #tpu.memory_space<vmem>>, vector<1x128xf32>
      %cst = arith.constant 0xFF800000 : f32
      %14 = vector.broadcast %cst : f32 to vector<16x128xf32>
      %c0_9 = arith.constant 0 : index
      %c0_10 = arith.constant 0 : index
      %15 = vector.load %arg10[%c0_9, %c0_10] : memref<16x128xf32, #tpu.memory_space<vmem>>, vector<16x128xf32>
      tpu.vector_store %arg10[%c0_9, %c0_10], %14 {strides = array<i32>} : memref<16x128xf32, #tpu.memory_space<vmem>>, vector<16x128xf32>,
      %c15_i32 = arith.constant 15 : i32
      %16 = arith.addi %1, %c15_i32 : i32
      %c16_i32_11 = arith.constant 16 : i32
      %17 = arith.divsi %16, %c16_i32_11 : i32
      %c0_i32_12 = arith.constant 0 : i32
      %18 = arith.subi %17, %c0_i32_12 : i32
      %c1_i32 = arith.constant 1 : i32
      %c1_i32_13 = arith.constant 1 : i32
      %19 = arith.subi %c1_i32, %c1_i32_13 : i32
      %20 = arith.addi %18, %19 : i32
      %c1_i32_14 = arith.constant 1 : i32
      %21 = arith.divsi %20, %c1_i32_14 : i32
      %c1_i32_15 = arith.constant 1 : i32
      %c0_i32_16 = arith.constant 0 : i32
      %c0_i32_17 = arith.constant 0 : i32
      %22 = arith.subi %21, %c0_i32_17 : i32
      %23 = arith.addi %c0_i32_17, %22 : i32
      %c1_i32_18 = arith.constant 1 : i32
      scf.for %arg11 = %c0_i32_17 to %23 step %c1_i32_18  : i32 {
        %28 = arith.muli %arg11, %c1_i32_15 : i32
        %29 = arith.addi %c0_i32_16, %28 : i32
        %c16_i32_24 = arith.constant 16 : i32
        %30 = arith.muli %29, %c16_i32_24 : i32
        %31 = tpu.assume_multiple %30, 16 : i32
        %c0_25 = arith.constant 0 : index
        %32 = arith.index_cast %31 : i32 to index
        %c0_26 = arith.constant 0 : index
        %33 = vector.load %arg4[%c0_25, %32, %c0_26] : memref<1x16x32xf32, #tpu.memory_space<vmem>>, vector<1x16x32xf32>
        %34 = vector.shape_cast %33 : vector<1x16x32xf32> to vector<16x32xf32>
        %c0_27 = arith.constant 0 : index
        %35 = arith.index_cast %31 : i32 to index
        %c0_28 = arith.constant 0 : index
        %36 = vector.load %arg5[%c0_27, %35, %c0_28] : memref<1x16x512xf32, #tpu.memory_space<vmem>>, vector<1x16x512xf32>
        %37 = vector.shape_cast %36 : vector<1x16x512xf32> to vector<16x512xf32>
        %38 = vector.shape_cast %34 : vector<16x32xf32> to vector<1x16x32xf32>
        %39 = vector.shape_cast %10 : vector<16x32xf32> to vector<16x1x32xf32>
        %40 = vector.broadcast %38 : vector<1x16x32xf32> to vector<16x16x32xf32>
        %41 = vector.broadcast %39 : vector<16x1x32xf32> to vector<16x16x32xf32>
        %42 = arith.subf %40, %41 : vector<16x16x32xf32>
        %cst_29 = arith.constant 0.000000e+00 : f32
        %43 = vector.broadcast %cst_29 : f32 to vector<16x16x32xf32>
        %44 = arith.cmpf ogt, %42, %43 : vector<16x16x32xf32>
        %cst_30 = arith.constant 0.00999999977 : f32
        %45 = vector.broadcast %cst_30 : f32 to vector<16x16x32xf32>
        %46 = arith.mulf %45, %42 : vector<16x16x32xf32>
        %47 = arith.select %44, %42, %46 : vector<16x16x32xi1>, vector<16x16x32xf32>
        %48 = vector.shape_cast %47 : vector<16x16x32xf32> to vector<256x32xf32>
        %49 = arith.truncf %48 : vector<256x32xf32> to vector<256x32xbf16>
        %cst_31 = arith.constant dense<0.000000e+00> : vector<256x512xf32>
        %50 = tpu.matmul %49, %11, %cst_31 {dimension_numbers = #tpu.dot_dimension_numbers<[1], [0], [0], [1], [0, 0, 1, 1], [], []>} : vector<256x32xbf16>, vector<32x512xbf16>, vector<256x512xf32> -> vector<256x512xf32>
        %51 = vector.shape_cast %50 : vector<256x512xf32> to vector<16x16x512xf32>
        %52 = vector.shape_cast %37 : vector<16x512xf32> to vector<1x16x512xf32>
        %53 = vector.broadcast %52 : vector<1x16x512xf32> to vector<16x16x512xf32>
        %54 = arith.addf %51, %53 : vector<16x16x512xf32>
        %cst_32 = arith.constant 0.000000e+00 : f32
        %55 = vector.broadcast %cst_32 : f32 to vector<16x16x512xf32>
        %56 = arith.cmpf ogt, %54, %55 : vector<16x16x512xf32>
        %cst_33 = arith.constant 0.00999999977 : f32
        %57 = vector.broadcast %cst_33 : f32 to vector<16x16x512xf32>
        %58 = arith.mulf %57, %54 : vector<16x16x512xf32>
        %59 = arith.select %56, %54, %58 : vector<16x16x512xi1>, vector<16x16x512xf32>
        %60 = arith.truncf %59 : vector<16x16x512xf32> to vector<16x16x512xbf16>
        %61 = vector.shape_cast %60 : vector<16x16x512xbf16> to vector<256x512xbf16>
        %cst_34 = arith.constant dense<0.000000e+00> : vector<256x128xf32>
        %62 = tpu.matmul %61, %12, %cst_34 {dimension_numbers = #tpu.dot_dimension_numbers<[1], [0], [0], [1], [0, 0, 1, 1], [], []>} : vector<256x512xbf16>, vector<512x128xbf16>, vector<256x128xf32> -> vector<256x128xf32>
        %63 = vector.broadcast %13 : vector<1x128xf32> to vector<256x128xf32>
        %64 = arith.addf %62, %63 : vector<256x128xf32>
        %cst_35 = arith.constant 0.000000e+00 : f32
        %65 = vector.broadcast %cst_35 : f32 to vector<256x128xf32>
        %66 = arith.cmpf ogt, %64, %65 : vector<256x128xf32>
        %cst_36 = arith.constant 0.00999999977 : f32
        %67 = vector.broadcast %cst_36 : f32 to vector<256x128xf32>
        %68 = arith.mulf %67, %64 : vector<256x128xf32>
        %69 = arith.select %66, %64, %68 : vector<256x128xi1>, vector<256x128xf32>
        %70 = vector.shape_cast %69 : vector<256x128xf32> to vector<16x16x128xf32>
        %71 = tpu.iota {dimensions = array<i32: 1>} : vector<1x16x1xi32>
        %72 = vector.broadcast %31 : i32 to vector<1x16x1xi32>
        %73 = arith.addi %72, %71 : vector<1x16x1xi32>
        %74 = vector.broadcast %1 : i32 to vector<1x16x1xi32>
        %75 = arith.cmpi slt, %73, %74 : vector<1x16x1xi32>
        %cst_37 = arith.constant 0xFF800000 : f32
        %76 = vector.shape_cast %75 : vector<1x16x1xi1> to vector<1x16x1xi1>
        %77 = vector.broadcast %76 : vector<1x16x1xi1> to vector<16x16x128xi1>
        %78 = vector.broadcast %cst_37 : f32 to vector<16x16x128xf32>
        %79 = arith.select %77, %70, %78 : vector<16x16x128xi1>, vector<16x16x128xf32>
        %c0_38 = arith.constant 0 : index
        %c0_39 = arith.constant 0 : index
        %80 = vector.load %arg10[%c0_38, %c0_39] : memref<16x128xf32, #tpu.memory_space<vmem>>, vector<16x128xf32>
        %cst_40 = arith.constant dense<0xFF800000> : vector<16x128xf32>
        %81 = vector.multi_reduction <maximumf>, %79, %cst_40 [1] : vector<16x16x128xf32> to vector<16x128xf32>
        %82 = arith.maximumf %80, %81 : vector<16x128xf32>
        %c0_41 = arith.constant 0 : index
        %c0_42 = arith.constant 0 : index
        %83 = vector.load %arg10[%c0_41, %c0_42] : memref<16x128xf32, #tpu.memory_space<vmem>>, vector<16x128xf32>
        tpu.vector_store %arg10[%c0_41, %c0_42], %82 {strides = array<i32>} : memref<16x128xf32, #tpu.memory_space<vmem>>, vector<16x128xf32>,
      }
      %c0_19 = arith.constant 0 : index
      %c0_20 = arith.constant 0 : index
      %24 = vector.load %arg10[%c0_19, %c0_20] : memref<16x128xf32, #tpu.memory_space<vmem>>, vector<16x128xf32>
      %c0_21 = arith.constant 0 : index
      %c0_22 = arith.constant 0 : index
      %c0_23 = arith.constant 0 : index
      %25 = vector.load %arg9[%c0_21, %c0_22, %c0_23] : memref<1x16x128xf32, #tpu.memory_space<vmem>>, vector<1x16x128xf32>
      %26 = vector.shape_cast %25 : vector<1x16x128xf32> to vector<16x128xf32>
      %27 = vector.shape_cast %24 : vector<16x128xf32> to vector<1x16x128xf32>
      tpu.vector_store %arg9[%c0_21, %c0_22, %c0_23], %27 {strides = array<i32>} : memref<1x16x128xf32, #tpu.memory_space<vmem>>, vector<1x16x128xf32>,
    } else {
    }
    %6 = arith.cmpi sge, %2, %1 : i32
    %7 = arith.extui %6 : i1 to i32
    %c0_i32_0 = arith.constant 0 : i32
    %8 = arith.cmpi ne, %7, %c0_i32_0 : i32
    scf.if %8 {
      %cst = arith.constant 0.000000e+00 : f32
      %9 = vector.broadcast %cst : f32 to vector<16x128xf32>
      %c0 = arith.constant 0 : index
      %c0_1 = arith.constant 0 : index
      %c0_2 = arith.constant 0 : index
      %10 = vector.load %arg9[%c0, %c0_1, %c0_2] : memref<1x16x128xf32, #tpu.memory_space<vmem>>, vector<1x16x128xf32>
      %11 = vector.shape_cast %10 : vector<1x16x128xf32> to vector<16x128xf32>
      %12 = vector.shape_cast %9 : vector<16x128xf32> to vector<1x16x128xf32>
      tpu.vector_store %arg9[%c0, %c0_1, %c0_2], %12 {strides = array<i32>} : memref<1x16x128xf32, #tpu.memory_space<vmem>>, vector<1x16x128xf32>,
    } else {
    }
    return
  }
  func.func @transform_0(%arg0: i32, %arg1: i32, %arg2: memref<2xi32, #tpu.memory_space<smem>>) -> (i32, i32, i32) {
    %c0_i32 = arith.constant 0 : i32
    %c0_i32_0 = arith.constant 0 : i32
    return %arg0, %arg1, %c0_i32 : i32, i32, i32
  }
  func.func @transform_1(%arg0: i32, %arg1: i32, %arg2: memref<2xi32, #tpu.memory_space<smem>>) -> (i32, i32, i32) {
    %c0_i32 = arith.constant 0 : i32
    %c0_i32_0 = arith.constant 0 : i32
    %c0_i32_1 = arith.constant 0 : i32
    return %arg0, %c0_i32, %c0_i32_0 : i32, i32, i32
  }
  func.func @transform_2(%arg0: i32, %arg1: i32, %arg2: memref<2xi32, #tpu.memory_space<smem>>) -> (i32, i32, i32) {
    %c0_i32 = arith.constant 0 : i32
    %c0_i32_0 = arith.constant 0 : i32
    %c0_i32_1 = arith.constant 0 : i32
    return %arg0, %c0_i32, %c0_i32_0 : i32, i32, i32
  }
  func.func @transform_3(%arg0: i32, %arg1: i32, %arg2: memref<2xi32, #tpu.memory_space<smem>>) -> (i32, i32) {
    %c0_i32 = arith.constant 0 : i32
    %c0_i32_0 = arith.constant 0 : i32
    %c0_i32_1 = arith.constant 0 : i32
    return %c0_i32, %c0_i32_0 : i32, i32
  }
  func.func @transform_4(%arg0: i32, %arg1: i32, %arg2: memref<2xi32, #tpu.memory_space<smem>>) -> (i32, i32) {
    %c0_i32 = arith.constant 0 : i32
    %c0_i32_0 = arith.constant 0 : i32
    %c0_i32_1 = arith.constant 0 : i32
    return %c0_i32, %c0_i32_0 : i32, i32
  }
  func.func @transform_5(%arg0: i32, %arg1: i32, %arg2: memref<2xi32, #tpu.memory_space<smem>>) -> (i32, i32) {
    %c0_i32 = arith.constant 0 : i32
    %c0_i32_0 = arith.constant 0 : i32
    %c0_i32_1 = arith.constant 0 : i32
    return %c0_i32, %c0_i32_0 : i32, i32
  }
  func.func @transform_6(%arg0: i32, %arg1: i32, %arg2: memref<2xi32, #tpu.memory_space<smem>>) -> (i32, i32, i32) {
    %c0_i32 = arith.constant 0 : i32
    %c0_i32_0 = arith.constant 0 : i32
    return %arg0, %arg1, %c0_i32 : i32, i32, i32
  }
}

</mosaic_0001>

<bundles_post_ra>
// kernel: tpu_custom_call.1
= control target key start
LH: loop header
LB: loop body
LE: loop exit
PB: predicated region body
PF: predicated region fallthrough
CT: control target
= control target key end

     0   :  { %s3790_s27 = smov [#allocation4]   ;;  %s5060_s0 = inlined_call_operand.hbm [shape: s32[2], index: 0, kind: input, shape index: {}]   ;;  %s5061_s1 = inlined_call_operand.hbm [shape: f32[2,16,32], index: 1, kind: input, shape index: {}]   ;;  %s5062_s2 = inlined_call_operand.hbm [shape: f32[2,16,32], index: 2, kind: input, shape index: {}]   ;;  %s5063_s3 = inlined_call_operand.hbm [shape: f32[2,16,512], index: 3, kind: input, shape index: {}]   ;;  %s5064_s4 = inlined_call_operand.hbm [shape: bf16[32,512], index: 4, kind: input, shape index: {}]   ;;  %s5065_s5 = inlined_call_operand.hbm [shape: bf16[512,128], index: 5, kind: input, shape index: {}]   ;;  %s5066_s6 = inlined_call_operand.vmem [shape: f32[1,128], index: 6, kind: input, shape index: {}]   ;;  %s5067_s7 = inlined_call_operand.hbm [shape: f32[2,16,128], index: 7, kind: output, shape index: {}]  }
   0x1   :  { %5079 = sst [smem:[#allocation107_spill]] %s5062_s2  ;;  %s13_s26 = sshll.u32 %s5060_s0, 4  ;;  %s14_s26 = int_to_ptr.hbm [resolvable:$true] %s13_s26 }
   0x2   :  { %5080 = sst [smem:[#allocation108_spill]] %s5064_s4 }
   0x3   :  { %5081 = sst [smem:[#allocation109_spill]] %s5065_s5 }
   0x4   :  { %5082 = sst [smem:[#allocation110_spill]] %s5066_s6 }
   0x5   :  { %5083 = sst [smem:[#allocation111_spill]] %s5067_s7 }
   0x6   :  { %16 = dma.hbm_to_smem %s14_s26, 16, %s3790_s27, [#allocation3] }
   0x7   :  { %3744 = dma.done.wait [#allocation3], 16 }
   0x8   :  { %3745 = vsyncadd [#allocation3], 4294967280 }
   0x9   :  { %19 = sfence }
   0xa   :  { %20 = vsyncpa [#allocation6], 0 }
   0xb   :  { %22 = vsyncpa [#allocation6 + $0x1], 0 }
   0xc   :  { %23 = vsyncpa [#allocation9], 0 }
   0xd   :  { %25 = vsyncpa [#allocation9 + $0x1], 0 }
   0xe   :  { %26 = vsyncpa [#allocation12], 0 }
   0xf   :  { %27 = vsyncpa [#allocation7], 0 }
  0x10   :  { %29 = vsyncpa [#allocation7 + $0x1], 0  ;;  %s3848_s28 = smov 0   ;;  %s3850_s29 = smov 0  }
  0x11   :  { %s3852_s30 = smov 0   ;;  %s3854_s0 = smov 0  }
  0x12   :  { %s3856_s8 = smov 0   ;;  %s3858_s9 = smov 0  }
  0x13 LB: > { %5084 = sst [smem:[#allocation20_spill]] %s3764_s28  ;;  %s3879_s10 = sadd.s32 4294967295, %s3784_s9   ;;  %s3784_s9 = sphi %s3858_s9, %s35_s9   ;;  %s3780_s8 = sphi %s3856_s8, %s5277_s8   ;;  %s3776_s0 = sphi %s3854_s0, %s5276_s0   ;;  %s3772_s30 = sphi %s3852_s30, %s5272_s30   ;;  %s3768_s29 = sphi %s3850_s29, %s5275_s29   ;;  %s3764_s28 = sphi %s3848_s28, %s5274_s28  }
  0x14   : > { %5085 = sst [smem:[#allocation21_spill]] %s3772_s30  ;;  %s3098_s11 = sadd.s32 4294967294, %s3784_s9  }
  0x15   : > { %5086 = sst [smem:[#allocation22_spill]] %s3784_s9  ;;  %p69_p0 = scmp.ne.s32.totalorder %s3768_s29, %s3764_s28 }
  0x16   : > { %p70_p1 = scmp.eq.s32.totalorder %s3879_s10, 0  ;;  %p210_p2 = scmp.eq.s32.totalorder %s3879_s10, 1 }
  0x17   : > { %p216_p3 = scmp.eq.s32.totalorder %s3098_s11, 1  ;;  %p3099_p5 = scmp.ge.s32.totalorder %s3784_s9, 1 }
  0x18   : > { %p3888_p4 = por %p70_p1, %p69_p0  ;;  %p223_p7 = scmp.lt.s32.totalorder %s3784_s9, 3 }
  0x19   : > { %p3893_p6 = por %p216_p3, %p69_p0  ;;  %s5090_s4 = sld [smem:[#allocation108_spill]] }
  0x1a   : > { %p3901_p8 = pnand %p3099_p5, %p223_p7  ;;  %s3791_s18 = smov [#allocation11]  }
  0x1b   : > { %s5088_s13 = scalar_select %p3893_p6, 1, 0 }
  0x1c   : > { %p3418_p9 = pneg %p3901_p8  ;;  %s236_s19 = sshll.u32 %s3791_s18, 4  ;;  %s237_s19 = int_to_ptr.vmem [resolvable:$true] %s236_s19 }
  0x1d   : > { %5089 = sst [smem:[#allocation23_spill]] %s5088_s13  ;;  %s3792_s21 = smov 256  }
  0x1e   : > { %p3909_p10 = pnand %p3418_p9, %p70_p1  ;;  %s3793_s22 = smov 16  }
  0x1f   : > { %s234_s16 = sshll.u32 %s5090_s4, 4  ;;  %s47_s23 = sadd.s32 1, %s3780_s8  ;;  %s235_s16 = int_to_ptr.hbm [resolvable:$true] %s234_s16 }
  0x20   : > { %3421 = dma.hbm_to_vmem [thread:$0]  (!%p3909_p10), %s235_s16, 1024, %s237_s19, [#allocation12], %s3792_s21, %s3792_s21, %s3793_s22  }
  0x21   : > { %p49_p12 = scmp.ge.s32.totalorder %s47_s23, 2  ;;  %s56_s24 = sadd.s32 1, %s3772_s30 }
  0x22   : > { %p63_p13 = scmp.ne.s32.totalorder %s3772_s30, %s3768_s29  ;;  %p64_p0 = scmp.eq.s32.totalorder %s3784_s9, 0 }
  0x23   : > { %s5279_s23 = smov (%p49_p12, %s47_s23), 0  ;;  %p3441_p7 = scmp.lt.s32.totalorder %s3784_s9, 2 }
  0x24   : > { %5093 = sst [smem:[#allocation24_spill]] %s5279_s23  ;;  %p65_p3 = por %p64_p0, %p63_p13 }
  0x25   : > { %p3925_p5 = por %p210_p2, %p63_p13  ;;  %s51_s26 = ssub.s32 %s3780_s8, %s5279_s23 }
  0x26   : > { %p54_p9 = scmp.eq.s32.totalorder %s51_s26, 0  ;;  %s3933_s27 = sand.u32 1, %s3772_s30  }
  0x27   : > { %s5094_s25 = scalar_select %p3925_p5, 1, 0 }
  0x28   : > { %s3103_s11 = sshll.u32 %s3933_s27, 4  ;;  %s3357_s14 = sshll.u32 %s3780_s8, 4 }
  0x29   : > { %5095 = sst [smem:[#allocation25_spill]] %s5094_s25  ;;  %p3940_p11 = pnand %p3441_p7, %p65_p3 }
  0x2a   : > { %s3938_s15 = scalar_select %p54_p9, %s3772_s30, %s56_s24  }
  0x2b   : > { %s291_s18 = sand.u32 1, %s3784_s9   ;;  %s5098_s2 = sld [smem:[#allocation107_spill]] }
  0x2c   : > { %5096 = sst [smem:[#allocation26_spill]] %s3938_s15  ;;  %s295_s26 = scalar_lea.vmem [#allocation8], %s3103_s11 }
  0x2d   : > { %s303_s23 = sshll.u32 %s295_s26, 4  ;;  %s3948_s13 = scalar_lea.sflag [#allocation9], %s291_s18  ;;  %s304_s23 = int_to_ptr.vmem [resolvable:$true] %s303_s23 }
  0x2e   : > { %s3794_s24 = smov 128   ;;  %s3795_s15 = smov 8  }
  0x2f   : > { %s5099_s5 = sld [smem:[#allocation109_spill]]  ;;  %s3796_s21 = smov [#allocation13]  }
  0x30   : > { %s3797_s26 = smov 64   ;;  %s3798_s18 = smov 4  }
  0x31   : > { %s300_s22 = scalar_lea.hbm %s5098_s2, %s3357_s14  ;;  %s278_s7 = scalar_lea.hbm %s5061_s1, %s3357_s14 }
  0x32   : > { %s301_s4 = sshll.u32 %s300_s22, 4  ;;  %s250_s22 = sshll.u32 %s3796_s21, 4  ;;  %s302_s4 = int_to_ptr.hbm [resolvable:$true] %s301_s4  ;;  %s251_s22 = int_to_ptr.vmem [resolvable:$true] %s250_s22 }
  0x33   : > { %3431 = dma.hbm_to_vmem [thread:$0]  (!%p3940_p11), %s302_s4, 256, %s304_s23, %s3948_s13, %s3794_s24, %s3794_s24, %s3795_s15  }
  0x34   : > { %s279_s4 = sshll.u32 %s278_s7, 4  ;;  %s271_s23 = scalar_lea.vmem [#allocation5], %s3103_s11  ;;  %s280_s4 = int_to_ptr.hbm [resolvable:$true] %s279_s4 }
  0x35   : > { %s248_s19 = sshll.u32 %s5099_s5, 4  ;;  %s281_s30 = sshll.u32 %s271_s23, 4  ;;  %s249_s19 = int_to_ptr.hbm [resolvable:$true] %s248_s19  ;;  %s282_s30 = int_to_ptr.vmem [resolvable:$true] %s281_s30 }
  0x36   : > { %3424 = dma.hbm_to_vmem [thread:$0]  (!%p3909_p10), %s249_s19, 4096, %s251_s22, [#allocation12], %s3797_s26, %s3797_s26, %s3798_s18  }
  0x37   : > { %s268_s9 = scalar_lea.sflag [#allocation6], %s3933_s27  ;;  %s3109_s21 = sshll.u32 %s3933_s27, 6 }
  0x38   : > { %3428 = dma.hbm_to_vmem [thread:$0]  (!%p3940_p11), %s280_s4, 256, %s282_s30, %s268_s9, %s3794_s24, %s3794_s24, %s3795_s15  }
  0x39   : > { %s3359_s5 = sshll.u32 %s3780_s8, 6  ;;  %s317_s22 = scalar_lea.vmem [#allocation10], %s3109_s21 }
  0x3a   : > { %s322_s20 = scalar_lea.hbm %s5063_s3, %s3359_s5  ;;  %s325_s2 = sshll.u32 %s317_s22, 4  ;;  %s326_s2 = int_to_ptr.vmem [resolvable:$true] %s325_s2 }
  0x3b   : > { %s323_s19 = sshll.u32 %s322_s20, 4  ;;  %s3799_s7 = smov 512   ;;  %s324_s19 = int_to_ptr.hbm [resolvable:$true] %s323_s19 }
  0x3c   : > { %s3800_s28 = smov 32   ;;  %337 = sbr.rel (%p3901_p8) target bundleno = 885 (0x375), region = 44 }
  0x3d   : > { %3434 = dma.hbm_to_vmem [thread:$0]  (!%p3940_p11), %s324_s19, 1024, %s326_s2, %s3948_s13, %s3799_s7, %s3799_s7, %s3800_s28  }
  0x3e   : > { %s3975_s27 = sand.u32 (!%p3901_p8), 1, %s3768_s29  }
  0x3f   : > { %s3978_s6 = sshll.u32 (!%p3901_p8), %s3975_s27, 4  ;;  %s340_s5 = scalar_lea.sflag (!%p3901_p8), [#allocation6], %s3975_s27 }
  0x40   : > { %s343_s25 = scalar_lea.vmem (!%p3901_p8), [#allocation5], %s3978_s6 }
  0x41   : > { %3747 = dma.done.wait (%p3888_p4), %s340_s5, 256  }
  0x42   : > { %3749 = vsyncadd (%p3888_p4), %s340_s5, 4294967040  ;;  %s349_s13 = sand.u32 1, %s3879_s10   ;;  %s353_s11 = scalar_lea.vmem [#allocation8], %s3978_s6 }
  0x43   : > { %s350_s17 = scalar_lea.sflag [#allocation9], %s349_s13 }
  0x44   : > { %3751 = dma.done.wait (%p3888_p4), %s350_s17, 1280  }
  0x45   : > { %3753 = vsyncadd (%p3888_p4), %s350_s17, 4294966016  ;;  %s3115_s14 = sshll.u32 %s3975_s27, 6 }
  0x46   : > { %s3993_s15 = scalar_lea.vmem [#allocation10], %s3115_s14 }
  0x47   : > { %3755 = dma.done.wait (%p70_p1), [#allocation12], 5120  }
  0x48   : > { %3757 = vsyncadd (%p70_p1), [#allocation12], 4294962176  ;;  %s4000_s16 = sld [smem:[#allocation4 + %s3776_s0]]  ;;  %s4003_s24 = scalar_lea.vmem [#allocation14], %s3978_s6 }
  0x4e   : > { %p3120_p2 = scmp.le.s32.totalorder %s4000_s16, 0 }
  0x50   : > { %421 = sbr.rel (%p3120_p2) target bundleno = 854 (0x356), region = 68 }
  0x55   : > { %v4006_v0 = vld [vmem:[%s343_s25] sm:$0xff]  ;;  %v4008_v1 = vld [vmem:[%s343_s25 + $0x8] sm:$0xff]  ;;  %s4013_s12 = sadd.s32 15, %s4000_s16  ;;  %s5179_s18 = sld [smem:[#allocation110_spill]] }
  0x56   : > { %5100 = vst [vmem:[#allocation27_spill] sm:$0xff] %v4006_v0  ;;  %v4010_v2 = vld [vmem:[#allocation11 + $0x4] sm:$0xf]  ;;  %v4015_v3 = vld [vmem:[#allocation11] sm:$0xf]  ;;  %p500_p1 = scmp.lt.s32.totalorder %s4013_s12, 0 }
  0x57   : > { %5101 = vst [vmem:[#allocation28_spill] sm:$0xff] %v4008_v1  ;;  %v4017_v4 = vld [vmem:[#allocation11 + $0xc] sm:$0xf]  ;;  %v4019_v5 = vld [vmem:[#allocation11 + $0x8] sm:$0xf]  ;;  %s501_s4 = ssub.s32 0, %s4013_s12 }
  0x58   : > { %5102 = vst [vmem:[#allocation29_spill] sm:$0xff] %v4010_v2  ;;  %v4021_v6 = vld [vmem:[#allocation11 + $0x10] sm:$0xf0]  ;;  %v4023_v7 = vld [vmem:[#allocation11 + $0xc] sm:$0xf0]  ;;  %s3121_s23 = smin.u32 %s501_s4, %s4013_s12 }
  0x59   : > { %5103 = vst [vmem:[#allocation30_spill] sm:$0xff] %v4015_v3  ;;  %v4025_v8 = vld [vmem:[#allocation11 + $0x18] sm:$0xf0]  ;;  %v4027_v9 = vld [vmem:[#allocation11 + $0x14] sm:$0xf0]  ;;  %s503_s30 = sshrl.u32 %s3121_s23, 4 }
  0x5a   : > { %5104 = vst [vmem:[#allocation31_spill] sm:$0xff] %v4017_v4  ;;  %v4029_v10 = vld [vmem:[#allocation11 + $0x24] sm:$0xf]  ;;  %v4031_v11 = vld [vmem:[#allocation11 + $0x20] sm:$0xf]  ;;  %s504_s9 = ssub.s32 0, %s503_s30 }
  0x5b   : > { %5105 = vst [vmem:[#allocation32_spill] sm:$0xff] %v4019_v5  ;;  %v4033_v12 = vld [vmem:[#allocation11 + $0x2c] sm:$0xf]  ;;  %v4035_v13 = vld [vmem:[#allocation11 + $0x28] sm:$0xf]  ;;  %s5281_s9 = smov (!%p500_p1, %s504_s9), %s503_s30 }
  0x5c   : > { %5106 = vst [vmem:[#allocation33_spill] sm:$0xff] %v4021_v6  ;;  %v4037_v14 = vld [vmem:[#allocation11 + $0x30] sm:$0xf0]  ;;  %v4039_v15 = vld [vmem:[#allocation11 + $0x2c] sm:$0xf0]  ;;  %p3122_p4 = scmp.le.s32.totalorder %s5281_s9, 0 }
  0x5d   : > { %5107 = vst [vmem:[#allocation34_spill] sm:$0xff] %v4023_v7  ;;  %v4041_v16 = vld [vmem:[#allocation11 + $0x38] sm:$0xf0]  ;;  %v4043_v17 = vld [vmem:[#allocation11 + $0x34] sm:$0xf0]  ;;  %s4184_s21 = smov (!%p3122_p4), 0  }
  0x5e   : > { %5108 = vst [vmem:[#allocation35_spill] sm:$0xff] %v4025_v8  ;;  %v4045_v18 = vld [vmem:[#allocation13] sm:$0xf]  ;;  %v4047_v19 = vld [vmem:[#allocation13] sm:$0xf0] }
  0x5f   : > { %5109 = vst [vmem:[#allocation36_spill] sm:$0xff] %v4027_v9  ;;  %v4049_v20 = vld [vmem:[#allocation13 + $0x8] sm:$0xf]  ;;  %v4051_v21 = vld [vmem:[#allocation13 + $0x8] sm:$0xf0] }
  0x60   : > { %5110 = vst [vmem:[#allocation37_spill] sm:$0xff] %v4029_v10  ;;  %v4053_v22 = vld [vmem:[#allocation13 + $0x10] sm:$0xf]  ;;  %v4055_v23 = vld [vmem:[#allocation13 + $0x10] sm:$0xf0] }
  0x61   : > { %5111 = vst [vmem:[#allocation38_spill] sm:$0xff] %v4031_v11  ;;  %v4057_v24 = vld [vmem:[#allocation13 + $0x18] sm:$0xf]  ;;  %v4059_v25 = vld [vmem:[#allocation13 + $0x18] sm:$0xf0] }
  0x62   : > { %5112 = vst [vmem:[#allocation39_spill] sm:$0xff] %v4033_v12  ;;  %v4061_v26 = vld [vmem:[#allocation13 + $0x20] sm:$0xf]  ;;  %v4063_v27 = vld [vmem:[#allocation13 + $0x20] sm:$0xf0] }
  0x63   : > { %5113 = vst [vmem:[#allocation40_spill] sm:$0xff] %v4035_v13  ;;  %v4065_v28 = vld [vmem:[#allocation13 + $0x28] sm:$0xf]  ;;  %v4067_v29 = vld [vmem:[#allocation13 + $0x28] sm:$0xf0] }
  0x64   : > { %5114 = vst [vmem:[#allocation41_spill] sm:$0xff] %v4037_v14  ;;  %v4069_v30 = vld [vmem:[#allocation13 + $0x30] sm:$0xf]  ;;  %v4071_v31 = vld [vmem:[#allocation13 + $0x30] sm:$0xf0] }
  0x65   : > { %5115 = vst [vmem:[#allocation42_spill] sm:$0xff] %v4039_v15  ;;  %v4073_v32 = vld [vmem:[#allocation13 + $0x38] sm:$0xf]  ;;  %v4075_v33 = vld [vmem:[#allocation13 + $0x38] sm:$0xf0] }
  0x66   : > { %5116 = vst [vmem:[#allocation43_spill] sm:$0xff] %v4041_v16  ;;  %v4077_v34 = vld [vmem:[#allocation13 + $0x40] sm:$0xf]  ;;  %v4079_v35 = vld [vmem:[#allocation13 + $0x40] sm:$0xf0] }
  0x67   : > { %5117 = vst [vmem:[#allocation44_spill] sm:$0xff] %v4043_v17  ;;  %v4081_v36 = vld [vmem:[#allocation13 + $0x48] sm:$0xf]  ;;  %v4083_v37 = vld [vmem:[#allocation13 + $0x48] sm:$0xf0] }
  0x68   : > { %5118 = vst [vmem:[#allocation45_spill] sm:$0xff] %v4045_v18  ;;  %v4085_v38 = vld [vmem:[#allocation13 + $0x50] sm:$0xf]  ;;  %v4087_v39 = vld [vmem:[#allocation13 + $0x50] sm:$0xf0] }
  0x69   : > { %5119 = vst [vmem:[#allocation46_spill] sm:$0xff] %v4047_v19  ;;  %v4089_v40 = vld [vmem:[#allocation13 + $0x58] sm:$0xf]  ;;  %v4091_v41 = vld [vmem:[#allocation13 + $0x58] sm:$0xf0] }
  0x6a   : > { %5120 = vst [vmem:[#allocation47_spill] sm:$0xff] %v4049_v20  ;;  %v4093_v42 = vld [vmem:[#allocation13 + $0x60] sm:$0xf]  ;;  %v4095_v43 = vld [vmem:[#allocation13 + $0x60] sm:$0xf0] }
  0x6b   : > { %5121 = vst [vmem:[#allocation48_spill] sm:$0xff] %v4051_v21  ;;  %v4097_v44 = vld [vmem:[#allocation13 + $0x68] sm:$0xf]  ;;  %v4099_v45 = vld [vmem:[#allocation13 + $0x68] sm:$0xf0] }
  0x6c   : > { %5122 = vst [vmem:[#allocation49_spill] sm:$0xff] %v4053_v22  ;;  %v4101_v46 = vld [vmem:[#allocation13 + $0x70] sm:$0xf]  ;;  %v4103_v47 = vld [vmem:[#allocation13 + $0x70] sm:$0xf0] }
  0x6d   : > { %5123 = vst [vmem:[#allocation50_spill] sm:$0xff] %v4055_v23  ;;  %v4105_v48 = vld [vmem:[#allocation13 + $0x78] sm:$0xf]  ;;  %v4107_v49 = vld [vmem:[#allocation13 + $0x78] sm:$0xf0] }
  0x6e   : > { %5124 = vst [vmem:[#allocation51_spill] sm:$0xff] %v4057_v24  ;;  %v4109_v50 = vld [vmem:[#allocation13 + $0x80] sm:$0xf]  ;;  %v4111_v51 = vld [vmem:[#allocation13 + $0x80] sm:$0xf0] }
  0x6f   : > { %5125 = vst [vmem:[#allocation52_spill] sm:$0xff] %v4059_v25  ;;  %v4113_v52 = vld [vmem:[#allocation13 + $0x88] sm:$0xf]  ;;  %v4115_v53 = vld [vmem:[#allocation13 + $0x88] sm:$0xf0] }
  0x70   : > { %5126 = vst [vmem:[#allocation53_spill] sm:$0xff] %v4061_v26  ;;  %v4117_v54 = vld [vmem:[#allocation13 + $0x90] sm:$0xf]  ;;  %v4119_v55 = vld [vmem:[#allocation13 + $0x90] sm:$0xf0] }
  0x71   : > { %5127 = vst [vmem:[#allocation54_spill] sm:$0xff] %v4063_v27  ;;  %v4121_v56 = vld [vmem:[#allocation13 + $0x98] sm:$0xf]  ;;  %v4123_v57 = vld [vmem:[#allocation13 + $0x98] sm:$0xf0] }
  0x72   : > { %5128 = vst [vmem:[#allocation55_spill] sm:$0xff] %v4065_v28  ;;  %v4125_v58 = vld [vmem:[#allocation13 + $0xa0] sm:$0xf]  ;;  %v4127_v59 = vld [vmem:[#allocation13 + $0xa0] sm:$0xf0] }
  0x73   : > { %5129 = vst [vmem:[#allocation56_spill] sm:$0xff] %v4067_v29  ;;  %v4129_v60 = vld [vmem:[#allocation13 + $0xa8] sm:$0xf]  ;;  %v4131_v61 = vld [vmem:[#allocation13 + $0xa8] sm:$0xf0] }
  0x74   : > { %5130 = vst [vmem:[#allocation57_spill] sm:$0xff] %v4069_v30  ;;  %v4133_v62 = vld [vmem:[#allocation13 + $0xb0] sm:$0xf]  ;;  %v4135_v63 = vld [vmem:[#allocation13 + $0xb0] sm:$0xf0] }
  0x75   : > { %5131 = vst [vmem:[#allocation58_spill] sm:$0xff] %v4071_v31  ;;  %v4141_v19 = vld [vmem:[#allocation13 + $0xc0] sm:$0xf]  ;;  %v4143_v18 = vld [vmem:[#allocation13 + $0xc0] sm:$0xf0] }
  0x76   : > { %5132 = vst [vmem:[#allocation59_spill] sm:$0xff] %v4073_v32  ;;  %v4153_v21 = vld [vmem:[#allocation13 + $0xd8] sm:$0xf]  ;;  %v4155_v20 = vld [vmem:[#allocation13 + $0xd8] sm:$0xf0] }
  0x77   : > { %5133 = vst [vmem:[#allocation60_spill] sm:$0xff] %v4075_v33 }
  0x78   : > { %5134 = vst [vmem:[#allocation61_spill] sm:$0xff] %v4077_v34  ;;  %v4139_v34 = vld [vmem:[#allocation13 + $0xb8] sm:$0xf0] }
  0x79   : > { %5135 = vst [vmem:[#allocation62_spill] sm:$0xff] %v4079_v35  ;;  %v4137_v35 = vld [vmem:[#allocation13 + $0xb8] sm:$0xf] }
  0x7a   : > { %5136 = vst [vmem:[#allocation63_spill] sm:$0xff] %v4081_v36  ;;  %v4151_v36 = vld [vmem:[#allocation13 + $0xd0] sm:$0xf0] }
  0x7b   : > { %5137 = vst [vmem:[#allocation64_spill] sm:$0xff] %v4083_v37  ;;  %v4149_v37 = vld [vmem:[#allocation13 + $0xd0] sm:$0xf] }
  0x7c   : > { %5138 = vst [vmem:[#allocation65_spill] sm:$0xff] %v4085_v38  ;;  %v4171_v38 = vld [vmem:[#allocation13 + $0xf8] sm:$0xf0] }
  0x7d   : > { %5139 = vst [vmem:[#allocation66_spill] sm:$0xff] %v4087_v39  ;;  %v4169_v39 = vld [vmem:[#allocation13 + $0xf8] sm:$0xf] }
  0x7e   : > { %5140 = vst [vmem:[#allocation67_spill] sm:$0xff] %v4089_v40 }
  0x7f   : > { %5141 = vst [vmem:[#allocation68_spill] sm:$0xff] %v4091_v41 }
  0x80   : > { %5142 = vst [vmem:[#allocation69_spill] sm:$0xff] %v4093_v42 }
  0x81   : > { %5143 = vst [vmem:[#allocation70_spill] sm:$0xff] %v4095_v43 }
  0x82   : > { %5144 = vst [vmem:[#allocation71_spill] sm:$0xff] %v4097_v44 }
  0x83   : > { %5145 = vst [vmem:[#allocation72_spill] sm:$0xff] %v4099_v45 }
  0x84   : > { %5146 = vst [vmem:[#allocation73_spill] sm:$0xff] %v4101_v46 }
  0x85   : > { %5147 = vst [vmem:[#allocation74_spill] sm:$0xff] %v4103_v47 }
  0x86   : > { %5148 = vst [vmem:[#allocation75_spill] sm:$0xff] %v4105_v48 }
  0x87   : > { %5149 = vst [vmem:[#allocation76_spill] sm:$0xff] %v4107_v49 }
  0x88   : > { %5150 = vst [vmem:[#allocation77_spill] sm:$0xff] %v4109_v50  ;;  %v4147_v50 = vld [vmem:[#allocation13 + $0xc8] sm:$0xf0] }
  0x89   : > { %5151 = vst [vmem:[#allocation78_spill] sm:$0xff] %v4111_v51  ;;  %v4145_v51 = vld [vmem:[#allocation13 + $0xc8] sm:$0xf] }
  0x8a   : > { %5152 = vst [vmem:[#allocation79_spill] sm:$0xff] %v4113_v52  ;;  %v4167_v52 = vld [vmem:[#allocation13 + $0xf0] sm:$0xf0] }
  0x8b   : > { %5153 = vst [vmem:[#allocation80_spill] sm:$0xff] %v4115_v53  ;;  %v4157_v53 = vld [vmem:[#allocation13 + $0xe0] sm:$0xf] }
  0x8c   : > { %5154 = vst [vmem:[#allocation81_spill] sm:$0xff] %v4117_v54 }
  0x8d   : > { %5155 = vst [vmem:[#allocation82_spill] sm:$0xff] %v4119_v55 }
  0x8e   : > { %5156 = vst [vmem:[#allocation83_spill] sm:$0xff] %v4121_v56 }
  0x8f   : > { %5157 = vst [vmem:[#allocation84_spill] sm:$0xff] %v4123_v57 }
  0x90   : > { %5158 = vst [vmem:[#allocation85_spill] sm:$0xff] %v4125_v58 }
  0x91   : > { %5159 = vst [vmem:[#allocation86_spill] sm:$0xff] %v4127_v59 }
  0x92   : > { %5160 = vst [vmem:[#allocation87_spill] sm:$0xff] %v4129_v60 }
  0x93   : > { %5161 = vst [vmem:[#allocation88_spill] sm:$0xff] %v4137_v35 }
  0x94   : > { %5162 = vst [vmem:[#allocation89_spill] sm:$0xff] %v4139_v34 }
  0x95   : > { %5163 = vst [vmem:[#allocation90_spill] sm:$0xff] %v4141_v19  ;;  %v4159_v19 = vld [vmem:[#allocation13 + $0xe0] sm:$0xf0] }
  0x96   : > { %5164 = vst [vmem:[#allocation91_spill] sm:$0xff] %v4143_v18  ;;  %v4161_v18 = vld [vmem:[#allocation13 + $0xe8] sm:$0xf] }
  0x97   : > { %5165 = vst [vmem:[#allocation92_spill] sm:$0xff] %v4145_v51  ;;  %v4163_v51 = vld [vmem:[#allocation13 + $0xe8] sm:$0xf0] }
  0x98   : > { %5166 = vst [vmem:[#allocation93_spill] sm:$0xff] %v4147_v50  ;;  %v4165_v50 = vld [vmem:[#allocation13 + $0xf0] sm:$0xf] }
  0x99   : > { %5167 = vst [vmem:[#allocation94_spill] sm:$0xff] %v4149_v37  ;;  %v3801_v37 = vmov -inf  }
  0x9a   : > { %5168 = vst [vmem:[#allocation95_spill] sm:$0xff] %v4151_v36  ;;  %v4176_v36 = vld [vmem:[%s5179_s18] sm:$0x1] }
  0x9b   : > { %5169 = vst [vmem:[#allocation96_spill] sm:$0xff] %v4153_v21 }
  0x9c   : > { %5170 = vst [vmem:[#allocation97_spill] sm:$0xff] %v4155_v20 }
  0x9d   : > { %5171 = vst [vmem:[#allocation98_spill] sm:$0xff] %v4157_v53 }
  0x9e   : > { %5172 = vst [vmem:[#allocation99_spill] sm:$0xff] %v4159_v19 }
  0x9f   : > { %5173 = vst [vmem:[#allocation100_spill] sm:$0xff] %v4161_v18 }
  0xa0   : > { %5174 = vst [vmem:[#allocation101_spill] sm:$0xff] %v4163_v51 }
  0xa1   : > { %5175 = vst [vmem:[#allocation102_spill] sm:$0xff] %v4165_v50 }
  0xa2   : > { %5176 = vst [vmem:[#allocation103_spill] sm:$0xff] %v4167_v52 }
  0xa3   : > { %5177 = vst [vmem:[#allocation104_spill] sm:$0xff] %v4169_v39  ;;  %3026 = sbr.rel (%p3122_p4) target bundleno = 846 (0x34e), region = 132 }
  0xa4   : > { %5178 = vst [vmem:[#allocation105_spill] sm:$0xff] %v4171_v38 }
  0xa5   : > { %5180 = vst [vmem:[#allocation106_spill] sm:$0xff] %v4176_v36 }
  0xa6   : > { %497 = vst [vmem:[#allocation2] sm:$0xff] %v3801_v37 }
  0xa7   : > { %498 = vst [vmem:[#allocation2 + $0x8] sm:$0xff] %v3801_v37 }
  0xa8 LB: >> { %v5181_v1 = vld [vmem:[#allocation28_spill] sm:$0xff]  ;;  %v5182_v0 = vld [vmem:[#allocation27_spill] sm:$0xff]  ;;  %v5183_v11 = vld [vmem:[#allocation38_spill] sm:$0xff]  ;;  %s4202_s20 = sshll.u32 %s3788_s21, 4  ;;  %vm761_vm2 = vcmask 261120   ;;  %s509_s21 = sadd.s32 1, %s3788_s21   ;;  %s3788_s21 = sphi %s4184_s21, %s509_s21  }
  0xa9   : >> { %v5184_v15 = vld [vmem:[#allocation42_spill] sm:$0xff]  ;;  %v5185_v14 = vld [vmem:[#allocation41_spill] sm:$0xff]  ;;  %v5187_v13 = vld [vmem:[#allocation40_spill] sm:$0xff]  ;;  %s4212_s19 = scalar_lea.vmem %s353_s11, %s4202_s20 [#allocation8]  ;;  %s516_s22 = sshra.s32 %s4202_s20, 3 }
  0xaa   : >> { %v3145_v37 = vor.u32 %v5184_v15, %v5183_v11  ;;  %v5186_v10 = vld [vmem:[#allocation37_spill] sm:$0xff]  ;;  %v5188_v17 = vld [vmem:[#allocation44_spill] sm:$0xff]  ;;  %v5189_v16 = vld [vmem:[#allocation43_spill] sm:$0xff]  ;;  %v545_v11 = vperm.slane %v5182_v0, 0  ;;  %s3400_s2 = sshll.u32 %s516_s22, 5  ;;  %p508_p8 = scmp.ge.s32.totalorder %s509_s21, %s5281_s9 }
  0xab   : >> { %v3149_v36 = vor.u32 %v5186_v10, %v5185_v14  ;;  %v3153_v23 = vor.u32 %v5188_v17, %v5187_v13  ;;  %v5190_v12 = vld [vmem:[#allocation39_spill] sm:$0xff]  ;;  %v5191_v3 = vld [vmem:[#allocation30_spill] sm:$0xff]  ;;  %v5193_v6 = vld [vmem:[#allocation33_spill] sm:$0xff]  ;;  %s4321_s7 = scalar_lea.vmem %s3993_s15, %s3400_s2 [#allocation10] }
  0xac   : >> { %v3157_v22 = vor.u32 %v5190_v12, %v5189_v16  ;;  %816 = vmatpush.bf16.msra.mxu0 %v3145_v37  ;;  %v5192_v7 = vld [vmem:[#allocation34_spill] sm:$0xff]  ;;  %v5194_v2 = vld [vmem:[#allocation29_spill] sm:$0xff]  ;;  %v5195_v5 = vld [vmem:[#allocation32_spill] sm:$0xff] }
  0xad   : >> { %905 = vmatpush.bf16.msra.mxu1 %v3149_v36  ;;  %v3129_v55 = vor.u32 %v5192_v7, %v5191_v3  ;;  %v3133_v54 = vor.u32 %v5194_v2, %v5193_v6  ;;  %994 = vmatpush.bf16.msra.mxu2 %v3153_v23  ;;  %v5196_v9 = vld [vmem:[#allocation36_spill] sm:$0xff]  ;;  %v5197_v8 = vld [vmem:[#allocation35_spill] sm:$0xff]  ;;  %v4215_v36 = vld [vmem:[%s4212_s19] sm:$0xff]  ;;  %v531_v7 = vrot.slane %v5182_v0, 1 }
  0xae   : >> { %1083 = vmatpush.bf16.msra.mxu3 %v3157_v22  ;;  %v3137_v10 = vor.u32 %v5196_v9, %v5195_v5  ;;  %v5198_v4 = vld [vmem:[#allocation31_spill] sm:$0xff]  ;;  %v4218_v2 = vld [vmem:[%s4212_s19 + $0x8] sm:$0xff]  ;;  %v5199_v35 = vld [vmem:[#allocation88_spill] sm:$0xff] }
  0xaf   : >> { %v3141_v37 = vor.u32 %v5198_v4, %v5197_v8  ;;  %v5200_v34 = vld [vmem:[#allocation89_spill] sm:$0xff]  ;;  %v5201_v32 = vld [vmem:[#allocation59_spill] sm:$0xff]  ;;  %v5202_v33 = vld [vmem:[#allocation60_spill] sm:$0xff]  ;;  %v577_v4 = vsub.f32 %v4215_v36, %v545_v11  ;;  %v578_v5 = vsub.f32 %v4218_v2, %v545_v11  ;;  %v546_v11 = vperm.slane %v531_v7, 0 }
  0xb0   : >> { %v3317_v3 = vor.u32 %v5200_v34, %v5199_v35  ;;  %v3253_v22 = vor.u32 %v5202_v33, %v5201_v32  ;;  %v5203_v39 = vld [vmem:[#allocation104_spill] sm:$0xff]  ;;  %v5204_v38 = vld [vmem:[#allocation105_spill] sm:$0xff]  ;;  %v5205_v48 = vld [vmem:[#allocation75_spill] sm:$0xff]  ;;  %817 = vmatpush.bf16.msra.mxu0 %v3129_v55 }
  0xb1   : >> { %v3349_v23 = vor.u32 %v5204_v38, %v5203_v39  ;;  %v5206_v49 = vld [vmem:[#allocation76_spill] sm:$0xff]  ;;  %906 = vmatpush.bf16.msra.mxu1 %v3133_v54  ;;  %995 = vmatpush.bf16.msra.mxu2 %v3137_v10  ;;  %vm609_vm0 = vcmp.gt.f32.partialorder %v577_v4, 0.0  ;;  %vm610_vm1 = vcmp.gt.f32.partialorder %v578_v5, 0.0  ;;  %v641_v8 = vmul.f32 0.01, %v577_v4  ;;  %v5207_v30 = vld [vmem:[#allocation57_spill] sm:$0xff] }
  0xb2   : >> { %v3285_v6 = vor.u32 %v5206_v49, %v5205_v48  ;;  %1084 = vmatpush.bf16.msra.mxu3 %v3141_v37  ;;  %v642_v9 = vmul.f32 0.01, %v578_v5  ;;  %v579_v10 = vsub.f32 %v4215_v36, %v546_v11  ;;  %v5208_v31 = vld [vmem:[#allocation58_spill] sm:$0xff]  ;;  %v5210_v52 = vld [vmem:[#allocation103_spill] sm:$0xff]  ;;  %v5211_v46 = vld [vmem:[#allocation73_spill] sm:$0xff] }
  0xb3   : >> { %v673_v12 = vsel %vm609_vm0, %v577_v4, %v641_v8  ;;  %v3313_v4 = vor.u32 %v4135_v63, %v4133_v62  ;;  %v5209_v50 = vld [vmem:[#allocation102_spill] sm:$0xff]  ;;  %v5213_v60 = vld [vmem:[#allocation87_spill] sm:$0xff]  ;;  %v5215_v29 = vld [vmem:[#allocation56_spill] sm:$0xff] }
  0xb4   : >> { %2257 = vmatpush.bf16.msrb.mxu0 %v3253_v22  ;;  %v674_v13 = vsel %vm610_vm1, %v578_v5, %v642_v9  ;;  %v3249_v5 = vor.u32 %v5208_v31, %v5207_v30  ;;  %v5212_v47 = vld [vmem:[#allocation74_spill] sm:$0xff]  ;;  %v643_v8 = vmul.f32 0.01, %v579_v10  ;;  %vm611_vm3 = vcmp.gt.f32.partialorder %v579_v10, 0.0  ;;  %v5214_v28 = vld [vmem:[#allocation55_spill] sm:$0xff]  ;;  %v5216_v18 = vld [vmem:[#allocation100_spill] sm:$0xff] }
  0xb5   : >> { %2435 = vmatpush.bf16.msrb.mxu2 %v3317_v3  ;;  %2346 = vmatpush.bf16.msrb.mxu1 %v3285_v6  ;;  %v705_v14 = vpack.c.bf16 %v674_v13, %v673_v12  ;;  %v580_v3 = vsub.f32 %v4218_v2, %v546_v11  ;;  %v3345_v6 = vor.u32 %v5210_v52, %v5209_v50  ;;  %v5217_v51 = vld [vmem:[#allocation101_spill] sm:$0xff]  ;;  %v5218_v44 = vld [vmem:[#allocation71_spill] sm:$0xff]  ;;  %v5219_v45 = vld [vmem:[#allocation72_spill] sm:$0xff] }
  0xb6   : >> { %2524 = vmatpush.bf16.msrb.mxu3 %v3349_v23  ;;  %v3281_v7 = vor.u32 %v5212_v47, %v5211_v46  ;;  %v675_v12 = vsel %vm611_vm3, %v579_v10, %v643_v8  ;;  %v533_v10 = vrot.slane %v5182_v0, 3  ;;  %v5220_v58 = vld [vmem:[#allocation85_spill] sm:$0xff]  ;;  %v5221_v59 = vld [vmem:[#allocation86_spill] sm:$0xff]  ;;  %v5225_v19 = vld [vmem:[#allocation99_spill] sm:$0xff] }
  0xb7   : >> { %3158 = vmatmul.msk.bf16.vlgmr.msra.gmra.mxu0 %vm761_vm2, %v705_v14  ;;  %3174 = vmatmul.msk.bf16.vlgmr.msra.gmra.mxu1 %vm761_vm2, %v705_v14  ;;  %v644_v9 = vmul.f32 0.01, %v580_v3  ;;  %vm612_vm4 = vcmp.gt.f32.partialorder %v580_v3, 0.0  ;;  %v5222_v26 = vld [vmem:[#allocation53_spill] sm:$0xff]  ;;  %v5223_v27 = vld [vmem:[#allocation54_spill] sm:$0xff]  ;;  %v5228_v56 = vld [vmem:[#allocation83_spill] sm:$0xff] }
  0xb8   : >> { %3190 = vmatmul.msk.bf16.vlgmr.msra.gmra.mxu2 %vm761_vm2, %v705_v14  ;;  %3206 = vmatmul.msk.bf16.vlgmr.msra.gmra.mxu3 %vm761_vm2, %v705_v14  ;;  %v532_v14 = vrot.slane %v5182_v0, 2  ;;  %v5224_v53 = vld [vmem:[#allocation98_spill] sm:$0xff]  ;;  %v5226_v42 = vld [vmem:[#allocation69_spill] sm:$0xff]  ;;  %v5229_v57 = vld [vmem:[#allocation84_spill] sm:$0xff] }
  0xb9   : >> { %2436 = vmatpush.bf16.msrb.mxu2 %v3313_v4  ;;  %2258 = vmatpush.bf16.msrb.mxu0 %v3249_v5  ;;  %v676_v13 = vsel %vm612_vm4, %v580_v3, %v644_v9  ;;  %v3309_v9 = vor.u32 %v4131_v61, %v5213_v60  ;;  %v5227_v43 = vld [vmem:[#allocation70_spill] sm:$0xff]  ;;  %v5230_v24 = vld [vmem:[#allocation51_spill] sm:$0xff]  ;;  %v5231_v25 = vld [vmem:[#allocation52_spill] sm:$0xff] }
  0xba   : >> { %2525 = vmatpush.bf16.msrb.mxu3 %v3345_v6  ;;  %2347 = vmatpush.bf16.msrb.mxu1 %v3281_v7  ;;  %v706_v54 = vpack.c.bf16 %v676_v13, %v675_v12  ;;  %v547_v55 = vperm.slane %v532_v14, 0  ;;  %v548_v6 = vperm.slane %v533_v10, 0  ;;  %v3245_v12 = vor.u32 %v5215_v29, %v5214_v28  ;;  %v5232_v21 = vld [vmem:[#allocation96_spill] sm:$0xff]  ;;  %v5233_v20 = vld [vmem:[#allocation97_spill] sm:$0xff]  ;;  %v5234_v40 = vld [vmem:[#allocation67_spill] sm:$0xff] }
  0xbb   : >> { %v3341_v13 = vor.u32 %v5217_v51, %v5216_v18  ;;  %v3277_v14 = vor.u32 %v5219_v45, %v5218_v44  ;;  %v5235_v41 = vld [vmem:[#allocation68_spill] sm:$0xff]  ;;  %v4348_v15 = vld [vmem:[%s4321_s7 + $0x20] sm:$0xff]  ;;  %v4351_v16 = vld [vmem:[%s4321_s7 + $0x28] sm:$0xff] }
  0xbc   : >> { %v581_v37 = vsub.f32 %v4215_v36, %v547_v55  ;;  %v582_v22 = vsub.f32 %v4218_v2, %v547_v55  ;;  %v583_v7 = vsub.f32 %v4215_v36, %v548_v6  ;;  %v584_v8 = vsub.f32 %v4218_v2, %v548_v6  ;;  %v5236_v17 = vld [vmem:[#allocation81_spill] sm:$0xff]  ;;  %v5237_v18 = vld [vmem:[#allocation82_spill] sm:$0xff]  ;;  %v5250_v44 = vld [vmem:[#allocation63_spill] sm:$0xff] }
  0xbd   : >> { %2437 = vmatpush.bf16.msrb.mxu2 %v3309_v9  ;;  %2259 = vmatpush.bf16.msrb.mxu0 %v3245_v12 }
  0xbe   : >> { %v645_v23 = vmul.f32 0.01, %v581_v37  ;;  %v646_v11 = vmul.f32 0.01, %v582_v22  ;;  %vm613_vm5 = vcmp.gt.f32.partialorder %v581_v37, 0.0  ;;  %vm614_vm6 = vcmp.gt.f32.partialorder %v582_v22, 0.0  ;;  %2526 = vmatpush.bf16.msrb.mxu3 %v3341_v13  ;;  %2348 = vmatpush.bf16.msrb.mxu1 %v3277_v14 }
  0xbf   : >> { %v648_v55 = vmul.f32 0.01, %v584_v8  ;;  %vm615_vm7 = vcmp.gt.f32.partialorder %v583_v7, 0.0  ;;  %vm616_vm8 = vcmp.gt.f32.partialorder %v584_v8, 0.0 }
  0xc0   : >> { %v677_v3 = vsel %vm613_vm5, %v581_v37, %v645_v23  ;;  %v678_v4 = vsel %vm614_vm6, %v582_v22, %v646_v11  ;;  %v534_v23 = vrot.slane %v5182_v0, 4 }
  0xc1   : >> { %v707_v5 = vpack.c.bf16 %v678_v4, %v677_v3  ;;  %v680_v22 = vsel %vm616_vm8, %v584_v8, %v648_v55  ;;  %v3305_v55 = vor.u32 %v5221_v59, %v5220_v58 }
  0xc2   : >> { %v549_v10 = vperm.slane %v534_v23, 0  ;;  %v3273_v23 = vor.u32 %v5227_v43, %v5226_v42 }
  0xc3   : >> { %2438 = vmatpush.bf16.msrb.mxu2 %v3305_v55 }
  0xc4   : >> { %v585_v3 = vsub.f32 %v4215_v36, %v549_v10  ;;  %v586_v4 = vsub.f32 %v4218_v2, %v549_v10  ;;  %2349 = vmatpush.bf16.msrb.mxu1 %v3273_v23 }
  0xc6   : >> { %v650_v6 = vmul.f32 0.01, %v586_v4  ;;  %vm617_vm9 = vcmp.gt.f32.partialorder %v585_v3, 0.0  ;;  %vm618_vm10 = vcmp.gt.f32.partialorder %v586_v4, 0.0 }
  0xc7   : >> { %3159 = vmatmul.msk.bf16.gmra.mxu0 %vm761_vm2, %v706_v54  ;;  %3175 = vmatmul.msk.bf16.gmra.mxu1 %vm761_vm2, %v706_v54 }
  0xc8   : >> { %3191 = vmatmul.msk.bf16.gmra.mxu2 %vm761_vm2, %v706_v54  ;;  %3207 = vmatmul.msk.bf16.gmra.mxu3 %vm761_vm2, %v706_v54  ;;  %v647_v54 = vmul.f32 0.01, %v583_v7  ;;  %v682_v9 = vsel %vm618_vm10, %v586_v4, %v650_v6 }
  0xca   : >> { %v679_v37 = vsel %vm615_vm7, %v583_v7, %v647_v54  ;;  %v535_v7 = vrot.slane %v5182_v0, 5 }
  0xcb   : >> { %v708_v11 = vpack.c.bf16 %v680_v22, %v679_v37  ;;  %v3241_v37 = vor.u32 %v5223_v27, %v5222_v26  ;;  %v3337_v22 = vor.u32 %v5225_v19, %v5224_v53  ;;  %v3297_v19 = vor.u32 %v5237_v18, %v5236_v17  ;;  %v3517_v53 = vld [vmem:[%s4212_s19 + $0x8] sm:$0xff] }
  0xcc   : >> { %v550_v13 = vperm.slane %v535_v7, 0 }
  0xcd   : >> { %2260 = vmatpush.bf16.msrb.mxu0 %v3241_v37  ;;  %2527 = vmatpush.bf16.msrb.mxu3 %v3337_v22 }
  0xce   : >> { %v587_v14 = vsub.f32 %v4215_v36, %v550_v13  ;;  %v588_v54 = vsub.f32 %v4218_v2, %v550_v13 }
  0xd0   : >> { %v652_v10 = vmul.f32 0.01, %v588_v54  ;;  %vm619_vm11 = vcmp.gt.f32.partialorder %v587_v14, 0.0  ;;  %vm620_vm12 = vcmp.gt.f32.partialorder %v588_v54, 0.0 }
  0xd2   : >> { %v684_v4 = vsel %vm620_vm12, %v588_v54, %v652_v10 }
  0xd7   : >> { %3160 = vmatmul.msk.bf16.gmra.mxu0 %vm761_vm2, %v707_v5  ;;  %3176 = vmatmul.msk.bf16.gmra.mxu1 %vm761_vm2, %v707_v5 }
  0xd8   : >> { %3192 = vmatmul.msk.bf16.gmra.mxu2 %vm761_vm2, %v707_v5  ;;  %3208 = vmatmul.msk.bf16.gmra.mxu3 %vm761_vm2, %v707_v5  ;;  %v649_v5 = vmul.f32 0.01, %v585_v3 }
  0xda   : >> { %v681_v8 = vsel %vm617_vm9, %v585_v3, %v649_v5  ;;  %v536_v5 = vrot.slane %v5182_v0, 6 }
  0xdb   : >> { %v709_v12 = vpack.c.bf16 %v682_v9, %v681_v8 }
  0xdc   : >> { %v551_v7 = vperm.slane %v536_v5, 0  ;;  %v3237_v5 = vor.u32 %v5231_v25, %v5230_v24 }
  0xde   : >> { %v589_v8 = vsub.f32 %v4215_v36, %v551_v7  ;;  %v590_v9 = vsub.f32 %v4218_v2, %v551_v7  ;;  %2261 = vmatpush.bf16.msrb.mxu0 %v3237_v5  ;;  %v4328_v5 = vld [vmem:[%s4321_s7 + $0x8] sm:$0xff] }
  0xe0   : >> { %v654_v13 = vmul.f32 0.01, %v590_v9  ;;  %vm621_vm13 = vcmp.gt.f32.partialorder %v589_v8, 0.0  ;;  %vm622_vm14 = vcmp.gt.f32.partialorder %v590_v9, 0.0 }
  0xe2   : >> { %v686_v55 = vsel %vm622_vm14, %v590_v9, %v654_v13  ;;  %v553_v13 = vperm.slane %v5181_v1, 0 }
  0xe7   : >> { %3161 = vmatmul.msk.bf16.gmra.mxu0 %vm761_vm2, %v708_v11  ;;  %3177 = vmatmul.msk.bf16.gmra.mxu1 %vm761_vm2, %v708_v11 }
  0xe8   : >> { %3193 = vmatmul.msk.bf16.gmra.mxu2 %vm761_vm2, %v708_v11  ;;  %3209 = vmatmul.msk.bf16.gmra.mxu3 %vm761_vm2, %v708_v11  ;;  %v651_v11 = vmul.f32 0.01, %v587_v14 }
  0xea   : >> { %v683_v3 = vsel %vm619_vm11, %v587_v14, %v651_v11  ;;  %v537_v14 = vrot.slane %v5182_v0, 7 }
  0xeb   : >> { %v710_v6 = vpack.c.bf16 %v684_v4, %v683_v3  ;;  %v3301_v4 = vor.u32 %v5229_v57, %v5228_v56 }
  0xec   : >> { %v552_v22 = vperm.slane %v537_v14, 0  ;;  %v593_v14 = vsub.f32 %v4215_v36, %v553_v13 }
  0xed   : >> { %2439 = vmatpush.bf16.msrb.mxu2 %v3301_v4  ;;  %v4325_v4 = vld [vmem:[%s4321_s7] sm:$0xff] }
  0xee   : >> { %v591_v23 = vsub.f32 %v4215_v36, %v552_v22  ;;  %v592_v11 = vsub.f32 %v4218_v2, %v552_v22  ;;  %vm625_vm1 = vcmp.gt.f32.partialorder %v593_v14, 0.0 }
  0xf0   : >> { %v655_v10 = vmul.f32 0.01, %v591_v23  ;;  %v656_v3 = vmul.f32 0.01, %v592_v11  ;;  %vm623_vm15 = vcmp.gt.f32.partialorder %v591_v23, 0.0  ;;  %vm624_vm0 = vcmp.gt.f32.partialorder %v592_v11, 0.0 }
  0xf1   : >> { %2440 = vmatpush.bf16.msrb.mxu2 %v3297_v19 }
  0xf2   : >> { %v687_v7 = vsel %vm623_vm15, %v591_v23, %v655_v10 }
  0xf7   : >> { %3162 = vmatmul.msk.bf16.gmra.mxu0 %vm761_vm2, %v709_v12  ;;  %3178 = vmatmul.msk.bf16.gmra.mxu1 %vm761_vm2, %v709_v12 }
  0xf8   : >> { %3194 = vmatmul.msk.bf16.gmra.mxu2 %vm761_vm2, %v709_v12  ;;  %3210 = vmatmul.msk.bf16.gmra.mxu3 %vm761_vm2, %v709_v12  ;;  %v653_v12 = vmul.f32 0.01, %v589_v8 }
  0xfa   : >> { %v685_v54 = vsel %vm621_vm13, %v589_v8, %v653_v12  ;;  %v688_v8 = vsel %vm624_vm0, %v592_v11, %v656_v3  ;;  %v3269_v12 = vor.u32 %v5235_v41, %v5234_v40  ;;  %v539_v3 = vrot.slane %v5181_v1, 2 }
  0xfb   : >> { %v711_v37 = vpack.c.bf16 %v686_v55, %v685_v54  ;;  %v712_v9 = vpack.c.bf16 %v688_v8, %v687_v7  ;;  %v594_v54 = vsub.f32 %v4218_v2, %v553_v13  ;;  %v538_v55 = vrot.slane %v5181_v1, 1 }
  0xfc   : >> { %2350 = vmatpush.bf16.msrb.mxu1 %v3269_v12 }
  0xfd   : >> { %v658_v22 = vmul.f32 0.01, %v594_v54  ;;  %vm626_vm3 = vcmp.gt.f32.partialorder %v594_v54, 0.0  ;;  %v554_v23 = vperm.slane %v538_v55, 0 }
  0xff   : >> { %v690_v10 = vsel %vm626_vm3, %v594_v54, %v658_v22  ;;  %v596_v7 = vsub.f32 %v4218_v2, %v554_v23 }
 0x101   : >> { %vm628_vm7 = vcmp.gt.f32.partialorder %v596_v7, 0.0 }
 0x107   : >> { %3163 = vmatmul.msk.bf16.gmra.mxu0 %vm761_vm2, %v710_v6  ;;  %3179 = vmatmul.msk.bf16.gmra.mxu1 %vm761_vm2, %v710_v6 }
 0x108   : >> { %3195 = vmatmul.msk.bf16.gmra.mxu2 %vm761_vm2, %v710_v6  ;;  %3211 = vmatmul.msk.bf16.gmra.mxu3 %vm761_vm2, %v710_v6  ;;  %v3333_v6 = vor.u32 %v5233_v20, %v5232_v21  ;;  %v5239_v20 = vld [vmem:[#allocation50_spill] sm:$0xff] }
 0x10a   : >> { %2528 = vmatpush.bf16.msrb.mxu3 %v3333_v6  ;;  %v595_v6 = vsub.f32 %v4215_v36, %v554_v23 }
 0x10c   : >> { %v659_v54 = vmul.f32 0.01, %v595_v6  ;;  %vm627_vm6 = vcmp.gt.f32.partialorder %v595_v6, 0.0 }
 0x10e   : >> { %v691_v25 = vsel %vm627_vm6, %v595_v6, %v659_v54 }
 0x117   : >> { %3164 = vmatmul.msk.bf16.gmra.mxu0 %vm761_vm2, %v711_v37  ;;  %3180 = vmatmul.msk.bf16.gmra.mxu1 %vm761_vm2, %v711_v37 }
 0x118   : >> { %3196 = vmatmul.msk.bf16.gmra.mxu2 %vm761_vm2, %v711_v37  ;;  %3212 = vmatmul.msk.bf16.gmra.mxu3 %vm761_vm2, %v711_v37  ;;  %v657_v37 = vmul.f32 0.01, %v593_v14 }
 0x11a   : >> { %v689_v11 = vsel %vm625_vm1, %v593_v14, %v657_v37  ;;  %v555_v14 = vperm.slane %v539_v3, 0  ;;  %v660_v37 = vmul.f32 0.01, %v596_v7  ;;  %v4342_v3 = vld [vmem:[%s4321_s7 + $0x18] sm:$0xff] }
 0x11b   : >> { %v713_v8 = vpack.c.bf16 %v690_v10, %v689_v11  ;;  %v4339_v10 = vld [vmem:[%s4321_s7 + $0x10] sm:$0xff] }
 0x11c   : >> { %v692_v26 = vsel %vm628_vm7, %v596_v7, %v660_v37  ;;  %v598_v29 = vsub.f32 %v4218_v2, %v555_v14 }
 0x11d   : >> { %v714_v32 = vpack.c.bf16 %v692_v26, %v691_v25 }
 0x11e   : >> { %vm630_vm13 = vcmp.gt.f32.partialorder %v598_v29, 0.0 }
 0x127   : >> { %3165 = vmatmul.msk.bf16.gmra.mxu0 %vm761_vm2, %v712_v9  ;;  %3181 = vmatmul.msk.bf16.gmra.mxu1 %vm761_vm2, %v712_v9 }
 0x128   : >> { %3197 = vmatmul.msk.bf16.gmra.mxu2 %vm761_vm2, %v712_v9  ;;  %3213 = vmatmul.msk.bf16.gmra.mxu3 %vm761_vm2, %v712_v9 }
 0x134   : >> { %v819_v9 = vpop.f32.mrf.mxu0  ;;  %v908_v12 = vpop.f32.mrf.mxu1 }
 0x135   : >> { %v1166_v13 = vadd.f32 %v819_v9, %v4325_v4  ;;  %v1167_v55 = vadd.f32 %v908_v12, %v4328_v5  ;;  %v597_v9 = vsub.f32 %v4215_v36, %v555_v14 }
 0x137   : >> { %vm1294_vm4 = vcmp.gt.f32.partialorder %v1166_v13, 0.0  ;;  %v1422_v22 = vmul.f32 0.01, %v1166_v13  ;;  %vm1295_vm5 = vcmp.gt.f32.partialorder %v1167_v55, 0.0  ;;  %v1423_v0 = vmul.f32 0.01, %v1167_v55  ;;  %3166 = vmatmul.msk.bf16.gmra.mxu0 %vm761_vm2, %v713_v8  ;;  %3182 = vmatmul.msk.bf16.gmra.mxu1 %vm761_vm2, %v713_v8 }
 0x138   : >> { %3198 = vmatmul.msk.bf16.gmra.mxu2 %vm761_vm2, %v713_v8  ;;  %3214 = vmatmul.msk.bf16.gmra.mxu3 %vm761_vm2, %v713_v8  ;;  %v5238_v8 = vld [vmem:[#allocation49_spill] sm:$0xff]  ;;  %vm629_vm12 = vcmp.gt.f32.partialorder %v597_v9, 0.0 }
 0x139   : >> { %v1550_v23 = vsel %vm1294_vm4, %v1166_v13, %v1422_v22  ;;  %v1551_v11 = vsel %vm1295_vm5, %v1167_v55, %v1423_v0  ;;  %v3233_v21 = vor.u32 %v5239_v20, %v5238_v8  ;;  %v5240_v13 = vld [vmem:[#allocation94_spill] sm:$0xff]  ;;  %v5241_v0 = vld [vmem:[#allocation95_spill] sm:$0xff]  ;;  %v661_v20 = vmul.f32 0.01, %v597_v9 }
 0x13a   : >> { %v4345_v12 = vpack.c.bf16 %v1551_v11, %v1550_v23  ;;  %v3329_v55 = vor.u32 %v5241_v0, %v5240_v13  ;;  %v540_v8 = vrot.slane %v5181_v1, 3  ;;  %v4368_v13 = vld [vmem:[%s4321_s7 + $0x30] sm:$0xff]  ;;  %v4371_v0 = vld [vmem:[%s4321_s7 + $0x38] sm:$0xff] }
 0x13b   : >> { %v997_v22 = vpop.f32.mrf.mxu2  ;;  %v1086_v24 = vpop.f32.mrf.mxu3  ;;  %2262 = vmatpush.bf16.msrb.mxu0 %v3233_v21 }
 0x13c   : >> { %v1168_v23 = vadd.f32 %v997_v22, %v4339_v10  ;;  %v1169_v11 = vadd.f32 %v1086_v24, %v4342_v3  ;;  %v821_v27 = vpop.f32.mrf.mxu0  ;;  %v910_v28 = vpop.f32.mrf.mxu1  ;;  %2529 = vmatpush.bf16.msrb.mxu3 %v3329_v55  ;;  %v5242_v55 = vld [vmem:[#allocation65_spill] sm:$0xff]  ;;  %v5243_v22 = vld [vmem:[#allocation66_spill] sm:$0xff]  ;;  %v1809_v33 = vunpack.c.l.b16 %v4345_v12 }
 0x13d   : >> { %v1170_v17 = vadd.f32 %v821_v27, %v4348_v15  ;;  %v1171_v18 = vadd.f32 %v910_v28, %v4351_v16  ;;  %v556_v27 = vperm.slane %v540_v8, 0  ;;  %v3265_v30 = vor.u32 %v5243_v22, %v5242_v55 }
 0x13e   : >> { %vm1296_vm8 = vcmp.gt.f32.partialorder %v1168_v23, 0.0  ;;  %v1424_v6 = vmul.f32 0.01, %v1168_v23  ;;  %vm1297_vm9 = vcmp.gt.f32.partialorder %v1169_v11, 0.0  ;;  %v1425_v24 = vmul.f32 0.01, %v1169_v11 }
 0x13f   : >> { %vm1298_vm10 = vcmp.gt.f32.partialorder %v1170_v17, 0.0  ;;  %v1426_v7 = vmul.f32 0.01, %v1170_v17  ;;  %vm1299_vm11 = vcmp.gt.f32.partialorder %v1171_v18, 0.0  ;;  %v1427_v14 = vmul.f32 0.01, %v1171_v18  ;;  %2351 = vmatpush.bf16.msrb.mxu1 %v3265_v30 }
 0x140   : >> { %v1552_v19 = vsel %vm1296_vm8, %v1168_v23, %v1424_v6  ;;  %v1553_v21 = vsel %vm1297_vm9, %v1169_v11, %v1425_v24  ;;  %v662_v11 = vmul.f32 0.01, %v598_v29  ;;  %v4376_v8 = vsel %vm629_vm12, %v597_v9, %v661_v20 }
 0x141   : >> { %v4365_v54 = vpack.c.bf16 %v1553_v21, %v1552_v19  ;;  %v1554_v28 = vsel %vm1298_vm10, %v1170_v17, %v1426_v7  ;;  %v1555_v37 = vsel %vm1299_vm11, %v1171_v18, %v1427_v14  ;;  %v4381_v7 = vsub.f32 %v4215_v36, %v556_v27 }
 0x142   : >> { %v1680_v31 = vpack.c.bf16 %v1555_v37, %v1554_v28  ;;  %v4384_v25 = vsub.f32 %v4218_v2, %v556_v27  ;;  %v1810_v27 = vunpack.c.h.b16 %v4345_v12  ;;  %v694_v37 = vsel %vm630_vm13, %v598_v29, %v662_v11 }
 0x143   : >> { %v999_v34 = vpop.f32.mrf.mxu2  ;;  %v1088_v23 = vpop.f32.mrf.mxu3  ;;  %v1812_v35 = vunpack.c.h.b16 %v4365_v54  ;;  %vm631_vm3 = vcmp.gt.f32.partialorder %v4381_v7, 0.0  ;;  %v663_v29 = vmul.f32 0.01, %v4381_v7  ;;  %v715_v40 = vpack.c.bf16 %v694_v37, %v4376_v8 }
 0x144   : >> { %v1172_v17 = vadd.f32 %v999_v34, %v4368_v13  ;;  %v1173_v18 = vadd.f32 %v1088_v23, %v4371_v0  ;;  %v824_v6 = vpop.f32.mrf.mxu0  ;;  %v913_v24 = vpop.f32.mrf.mxu1  ;;  %v1813_v26 = vunpack.c.l.b16 %v1680_v31  ;;  %v1814_v14 = vunpack.c.h.b16 %v1680_v31 }
 0x145   : >> { %v1174_v19 = vadd.f32 %v824_v6, %v4325_v4  ;;  %v1175_v9 = vadd.f32 %v913_v24, %v4328_v5  ;;  %v1811_v24 = vunpack.c.l.b16 %v4365_v54  ;;  %vm632_vm4 = vcmp.gt.f32.partialorder %v4384_v25, 0.0 }
 0x146   : >> { %vm1300_vm14 = vcmp.gt.f32.partialorder %v1172_v17, 0.0  ;;  %v1428_v30 = vmul.f32 0.01, %v1172_v17  ;;  %vm1301_vm15 = vcmp.gt.f32.partialorder %v1173_v18, 0.0  ;;  %v1429_v34 = vmul.f32 0.01, %v1173_v18 }
 0x147   : >> { %vm1302_vm0 = vcmp.gt.f32.partialorder %v1174_v19, 0.0  ;;  %v1430_v20 = vmul.f32 0.01, %v1174_v19  ;;  %vm1303_vm1 = vcmp.gt.f32.partialorder %v1175_v9, 0.0  ;;  %v1431_v21 = vmul.f32 0.01, %v1175_v9  ;;  %3167 = vmatmul.msk.bf16.gmra.mxu0 %vm761_vm2, %v714_v32  ;;  %3183 = vmatmul.msk.bf16.gmra.mxu1 %vm761_vm2, %v714_v32 }
 0x148   : >> { %v1556_v28 = vsel %vm1300_vm14, %v1172_v17, %v1428_v30  ;;  %v1557_v31 = vsel %vm1301_vm15, %v1173_v18, %v1429_v34  ;;  %3199 = vmatmul.msk.bf16.gmra.mxu2 %vm761_vm2, %v714_v32  ;;  %3215 = vmatmul.msk.bf16.gmra.mxu3 %vm761_vm2, %v714_v32  ;;  %v4394_v6 = vpack.c.b16 %v1813_v26, %v1809_v33  ;;  %v541_v34 = vrot.slane %v5181_v1, 4 }
 0x149   : >> { %v1681_v55 = vpack.c.bf16 %v1557_v31, %v1556_v28  ;;  %v1558_v22 = vsel %vm1302_vm0, %v1174_v19, %v1430_v20  ;;  %v1559_v23 = vsel %vm1303_vm1, %v1175_v9, %v1431_v21  ;;  %v4400_v12 = vpack.c.b16 %v1814_v14, %v1810_v27 }
 0x14a   : >> { %v4398_v38 = vpack.c.bf16 %v1559_v23, %v1558_v22  ;;  %v664_v19 = vmul.f32 0.01, %v4384_v25  ;;  %v557_v23 = vperm.slane %v541_v34, 0  ;;  %v4421_v41 = vsel %vm631_vm3, %v4381_v7, %v663_v29 }
 0x14b   : >> { %v1815_v17 = vunpack.c.l.b16 %v1681_v55  ;;  %v1002_v18 = vpop.f32.mrf.mxu2  ;;  %v1091_v30 = vpop.f32.mrf.mxu3  ;;  %v1816_v32 = vunpack.c.h.b16 %v1681_v55 }
 0x14c   : >> { %v1176_v33 = vadd.f32 %v1002_v18, %v4339_v10  ;;  %v1177_v11 = vadd.f32 %v1091_v30, %v4342_v3  ;;  %v826_v26 = vpop.f32.mrf.mxu0  ;;  %v915_v54 = vpop.f32.mrf.mxu1  ;;  %v4432_v8 = vsub.f32 %v4215_v36, %v557_v23  ;;  %v1818_v37 = vunpack.c.h.b16 %v4398_v38 }
 0x14d   : >> { %v1178_v14 = vadd.f32 %v826_v26, %v4348_v15  ;;  %v1179_v9 = vadd.f32 %v915_v54, %v4351_v16  ;;  %v4411_v20 = vpack.c.b16 %v1815_v17, %v1811_v24  ;;  %v4413_v18 = vpack.c.b16 %v1816_v32, %v1812_v35 }
 0x14e   : >> { %vm1304_vm5 = vcmp.gt.f32.partialorder %v1176_v33, 0.0  ;;  %v1432_v21 = vmul.f32 0.01, %v1176_v33  ;;  %vm1305_vm6 = vcmp.gt.f32.partialorder %v1177_v11, 0.0  ;;  %v1433_v27 = vmul.f32 0.01, %v1177_v11 }
 0x14f   : >> { %vm1306_vm7 = vcmp.gt.f32.partialorder %v1178_v14, 0.0  ;;  %v1434_v28 = vmul.f32 0.01, %v1178_v14  ;;  %vm1307_vm8 = vcmp.gt.f32.partialorder %v1179_v9, 0.0  ;;  %v1435_v31 = vmul.f32 0.01, %v1179_v9 }
 0x150   : >> { %v1560_v55 = vsel %vm1304_vm5, %v1176_v33, %v1432_v21  ;;  %v1561_v22 = vsel %vm1305_vm6, %v1177_v11, %v1433_v27  ;;  %v4426_v33 = vsel %vm632_vm4, %v4384_v25, %v664_v19  ;;  %v1817_v35 = vunpack.c.l.b16 %v4398_v38 }
 0x151   : >> { %v4415_v30 = vpack.c.bf16 %v1561_v22, %v1560_v55  ;;  %v1562_v26 = vsel %vm1306_vm7, %v1178_v14, %v1434_v28  ;;  %v1563_v54 = vsel %vm1307_vm8, %v1179_v9, %v1435_v31  ;;  %v4438_v25 = vsub.f32 %v4218_v2, %v557_v23 }
 0x152   : >> { %v1684_v39 = vpack.c.bf16 %v1563_v54, %v1562_v26  ;;  %vm633_vm13 = vcmp.gt.f32.partialorder %v4432_v8, 0.0 }
 0x153   : >> { %v1004_v24 = vpop.f32.mrf.mxu2  ;;  %v1093_v17 = vpop.f32.mrf.mxu3  ;;  %v1819_v19 = vunpack.c.l.b16 %v4415_v30  ;;  %v1820_v22 = vunpack.c.h.b16 %v4415_v30  ;;  %v666_v43 = vmul.f32 0.01, %v4438_v25  ;;  %v5248_v30 = vld [vmem:[#allocation92_spill] sm:$0xff]  ;;  %vm634_vm3 = vcmp.gt.f32.partialorder %v4438_v25, 0.0 }
 0x154   : >> { %v1180_v32 = vadd.f32 %v1004_v24, %v4368_v13  ;;  %v1181_v11 = vadd.f32 %v1093_v17, %v4371_v0  ;;  %v829_v14 = vpop.f32.mrf.mxu0  ;;  %v918_v9 = vpop.f32.mrf.mxu1  ;;  %v1821_v55 = vunpack.c.l.b16 %v1684_v39  ;;  %v665_v17 = vmul.f32 0.01, %v4432_v8 }
 0x155   : >> { %v1182_v7 = vadd.f32 %v829_v14, %v4325_v4  ;;  %v1183_v29 = vadd.f32 %v918_v9, %v4328_v5  ;;  %v5244_v14 = vld [vmem:[#allocation79_spill] sm:$0xff]  ;;  %v5245_v9 = vld [vmem:[#allocation80_spill] sm:$0xff] }
 0x156   : >> { %vm1308_vm9 = vcmp.gt.f32.partialorder %v1180_v32, 0.0  ;;  %v1436_v34 = vmul.f32 0.01, %v1180_v32  ;;  %vm1309_vm10 = vcmp.gt.f32.partialorder %v1181_v11, 0.0  ;;  %v1437_v21 = vmul.f32 0.01, %v1181_v11 }
 0x157   : >> { %vm1310_vm11 = vcmp.gt.f32.partialorder %v1182_v7, 0.0  ;;  %v1438_v27 = vmul.f32 0.01, %v1182_v7  ;;  %vm1311_vm12 = vcmp.gt.f32.partialorder %v1183_v29, 0.0  ;;  %v1439_v28 = vmul.f32 0.01, %v1183_v29  ;;  %3168 = vmatmul.msk.bf16.gmra.mxu0 %vm761_vm2, %v715_v40  ;;  %3184 = vmatmul.msk.bf16.gmra.mxu1 %vm761_vm2, %v715_v40 }
 0x158   : >> { %v1564_v38 = vsel %vm1308_vm9, %v1180_v32, %v1436_v34  ;;  %v1565_v31 = vsel %vm1309_vm10, %v1181_v11, %v1437_v21  ;;  %3200 = vmatmul.msk.bf16.gmra.mxu2 %vm761_vm2, %v715_v40  ;;  %3216 = vmatmul.msk.bf16.gmra.mxu3 %vm761_vm2, %v715_v40  ;;  %v3293_v32 = vor.u32 %v5245_v9, %v5244_v14  ;;  %v5246_v11 = vld [vmem:[#allocation47_spill] sm:$0xff]  ;;  %v5247_v34 = vld [vmem:[#allocation48_spill] sm:$0xff] }
 0x159   : >> { %v1685_v23 = vpack.c.bf16 %v1565_v31, %v1564_v38  ;;  %v1566_v26 = vsel %vm1310_vm11, %v1182_v7, %v1438_v27  ;;  %v1567_v54 = vsel %vm1311_vm12, %v1183_v29, %v1439_v28  ;;  %v3229_v21 = vor.u32 %v5247_v34, %v5246_v11  ;;  %v5249_v38 = vld [vmem:[#allocation93_spill] sm:$0xff] }
 0x15a   : >> { %v4447_v24 = vpack.c.bf16 %v1567_v54, %v1566_v26  ;;  %v3325_v7 = vor.u32 %v5249_v38, %v5248_v30  ;;  %v4457_v29 = vpack.c.b16 %v1821_v55, %v1817_v35  ;;  %v1822_v27 = vunpack.c.h.b16 %v1684_v39  ;;  %2441 = vmatpush.bf16.msrb.mxu2 %v3293_v32 }
 0x15b   : >> { %v1007_v42 = vpop.f32.mrf.mxu2  ;;  %v1096_v40 = vpop.f32.mrf.mxu3  ;;  %2263 = vmatpush.bf16.msrb.mxu0 %v3229_v21  ;;  %v1823_v14 = vunpack.c.l.b16 %v1685_v23  ;;  %v1824_v9 = vunpack.c.h.b16 %v1685_v23  ;;  %v542_v30 = vrot.slane %v5181_v1, 5 }
 0x15c   : >> { %v1184_v28 = vadd.f32 %v1007_v42, %v4339_v10  ;;  %v1185_v31 = vadd.f32 %v1096_v40, %v4342_v3  ;;  %v831_v26 = vpop.f32.mrf.mxu0  ;;  %v920_v54 = vpop.f32.mrf.mxu1  ;;  %2530 = vmatpush.bf16.msrb.mxu3 %v3325_v7  ;;  %v4464_v35 = vpack.c.b16 %v1822_v27, %v1818_v37  ;;  %v5251_v37 = vld [vmem:[#allocation64_spill] sm:$0xff] }
 0x15d   : >> { %v1186_v11 = vadd.f32 %v831_v26, %v4348_v15  ;;  %v1187_v34 = vadd.f32 %v920_v54, %v4351_v16  ;;  %v558_v23 = vperm.slane %v542_v30, 0  ;;  %v4466_v38 = vpack.c.b16 %v1823_v14, %v1819_v19 }
 0x15e   : >> { %vm1312_vm14 = vcmp.gt.f32.partialorder %v1184_v28, 0.0  ;;  %v1440_v39 = vmul.f32 0.01, %v1184_v28  ;;  %vm1313_vm15 = vcmp.gt.f32.partialorder %v1185_v31, 0.0  ;;  %v1441_v42 = vmul.f32 0.01, %v1185_v31 }
 0x15f   : >> { %vm1314_vm0 = vcmp.gt.f32.partialorder %v1186_v11, 0.0  ;;  %v1442_v55 = vmul.f32 0.01, %v1186_v11  ;;  %vm1315_vm1 = vcmp.gt.f32.partialorder %v1187_v34, 0.0  ;;  %v1443_v32 = vmul.f32 0.01, %v1187_v34 }
 0x160   : >> { %v1568_v21 = vsel %vm1312_vm14, %v1184_v28, %v1440_v39  ;;  %v1569_v40 = vsel %vm1313_vm15, %v1185_v31, %v1441_v42  ;;  %v3261_v27 = vor.u32 %v5251_v37, %v5250_v44  ;;  %v4473_v46 = vpack.c.b16 %v1824_v9, %v1820_v22 }
 0x161   : >> { %v4468_v26 = vpack.c.bf16 %v1569_v40, %v1568_v21  ;;  %v1570_v7 = vsel %vm1314_vm0, %v1186_v11, %v1442_v55  ;;  %v1571_v54 = vsel %vm1315_vm1, %v1187_v34, %v1443_v32  ;;  %v716_v28 = vpack.c.bf16 %v4426_v33, %v4421_v41 }
 0x162   : >> { %v1688_v45 = vpack.c.bf16 %v1571_v54, %v1570_v7  ;;  %2352 = vmatpush.bf16.msrb.mxu1 %v3261_v27  ;;  %v4482_v44 = vsel %vm633_vm13, %v4432_v8, %v665_v17  ;;  %v698_v34 = vsel %vm634_vm3, %v4438_v25, %v666_v43  ;;  %v4488_v41 = vsub.f32 %v4215_v36, %v558_v23 }
 0x163   : >> { %v1009_v47 = vpop.f32.mrf.mxu2  ;;  %v1098_v48 = vpop.f32.mrf.mxu3  ;;  %v1825_v43 = vunpack.c.l.b16 %v4447_v24  ;;  %v604_v32 = vsub.f32 %v4218_v2, %v558_v23  ;;  %v1826_v7 = vunpack.c.h.b16 %v4447_v24 }
 0x164   : >> { %v1188_v19 = vadd.f32 %v1009_v47, %v4368_v13  ;;  %v1189_v31 = vadd.f32 %v1098_v48, %v4371_v0  ;;  %v834_v14 = vpop.f32.mrf.mxu0  ;;  %v923_v11 = vpop.f32.mrf.mxu1  ;;  %v1829_v25 = vunpack.c.l.b16 %v1688_v45  ;;  %v1830_v54 = vunpack.c.h.b16 %v1688_v45 }
 0x165   : >> { %v1190_v22 = vadd.f32 %v834_v14, %v4325_v4  ;;  %v1191_v9 = vadd.f32 %v923_v11, %v4328_v5  ;;  %vm635_vm8 = vcmp.gt.f32.partialorder %v4488_v41, 0.0  ;;  %vm636_vm13 = vcmp.gt.f32.partialorder %v604_v32, 0.0 }
 0x166   : >> { %vm1316_vm4 = vcmp.gt.f32.partialorder %v1188_v19, 0.0  ;;  %v1444_v47 = vmul.f32 0.01, %v1188_v19  ;;  %vm1317_vm5 = vcmp.gt.f32.partialorder %v1189_v31, 0.0  ;;  %v1445_v48 = vmul.f32 0.01, %v1189_v31 }
 0x167   : >> { %vm1318_vm6 = vcmp.gt.f32.partialorder %v1190_v22, 0.0  ;;  %v1446_v33 = vmul.f32 0.01, %v1190_v22  ;;  %vm1319_vm7 = vcmp.gt.f32.partialorder %v1191_v9, 0.0  ;;  %v1447_v30 = vmul.f32 0.01, %v1191_v9  ;;  %3169 = vmatmul.msk.bf16.gmra.mxu0 %vm761_vm2, %v716_v28  ;;  %3185 = vmatmul.msk.bf16.gmra.mxu1 %vm761_vm2, %v716_v28 }
 0x168   : >> { %v1572_v8 = vsel %vm1316_vm4, %v1188_v19, %v1444_v47  ;;  %v1573_v17 = vsel %vm1317_vm5, %v1189_v31, %v1445_v48  ;;  %3201 = vmatmul.msk.bf16.gmra.mxu2 %vm761_vm2, %v716_v28  ;;  %3217 = vmatmul.msk.bf16.gmra.mxu3 %vm761_vm2, %v716_v28  ;;  %v4498_v40 = vpack.c.b16 %v1829_v25, %v1825_v43  ;;  %v1827_v28 = vunpack.c.l.b16 %v4468_v26 }
 0x169   : >> { %v1689_v39 = vpack.c.bf16 %v1573_v17, %v1572_v8  ;;  %v1574_v42 = vsel %vm1318_vm6, %v1190_v22, %v1446_v33  ;;  %v1575_v55 = vsel %vm1319_vm7, %v1191_v9, %v1447_v30  ;;  %v1828_v31 = vunpack.c.h.b16 %v4468_v26 }
 0x16a   : >> { %v4496_v21 = vpack.c.bf16 %v1575_v55, %v1574_v42  ;;  %v4506_v9 = vpack.c.b16 %v1830_v54, %v1826_v7  ;;  %v667_v48 = vmul.f32 0.01, %v4488_v41  ;;  %v668_v42 = vmul.f32 0.01, %v604_v32 }
 0x16b   : >> { %v1012_v37 = vpop.f32.mrf.mxu2  ;;  %v1101_v27 = vpop.f32.mrf.mxu3  ;;  %v1831_v19 = vunpack.c.l.b16 %v1689_v39  ;;  %v1832_v47 = vunpack.c.h.b16 %v1689_v39 }
 0x16c   : >> { %v1192_v14 = vadd.f32 %v1012_v37, %v4339_v10  ;;  %v1193_v23 = vadd.f32 %v1101_v27, %v4342_v3  ;;  %v836_v11 = vpop.f32.mrf.mxu0  ;;  %v925_v22 = vpop.f32.mrf.mxu1  ;;  %v543_v37 = vrot.slane %v5181_v1, 6 }
 0x16d   : >> { %v1194_v45 = vadd.f32 %v836_v11, %v4348_v15  ;;  %v1195_v24 = vadd.f32 %v925_v22, %v4351_v16  ;;  %v4511_v33 = vpack.c.b16 %v1831_v19, %v1827_v28  ;;  %v4513_v39 = vpack.c.b16 %v1832_v47, %v1828_v31 }
 0x16e   : >> { %vm1320_vm9 = vcmp.gt.f32.partialorder %v1192_v14, 0.0  ;;  %v1448_v30 = vmul.f32 0.01, %v1192_v14  ;;  %vm1321_vm10 = vcmp.gt.f32.partialorder %v1193_v23, 0.0  ;;  %v1449_v26 = vmul.f32 0.01, %v1193_v23 }
 0x16f   : >> { %vm1322_vm11 = vcmp.gt.f32.partialorder %v1194_v45, 0.0  ;;  %v1450_v8 = vmul.f32 0.01, %v1194_v45  ;;  %vm1323_vm12 = vcmp.gt.f32.partialorder %v1195_v24, 0.0  ;;  %v1451_v17 = vmul.f32 0.01, %v1195_v24 }
 0x170   : >> { %v1576_v43 = vsel %vm1320_vm9, %v1192_v14, %v1448_v30  ;;  %v1577_v25 = vsel %vm1321_vm10, %v1193_v23, %v1449_v26  ;;  %v717_v11 = vpack.c.bf16 %v698_v34, %v4482_v44  ;;  %v4524_v31 = vsel %vm635_vm8, %v4488_v41, %v667_v48 }
 0x171   : >> { %v4515_v55 = vpack.c.bf16 %v1577_v25, %v1576_v43  ;;  %v1578_v7 = vsel %vm1322_vm11, %v1194_v45, %v1450_v8  ;;  %v1579_v54 = vsel %vm1323_vm12, %v1195_v24, %v1451_v17  ;;  %v4528_v24 = vsel %vm636_vm13, %v604_v32, %v668_v42 }
 0x172   : >> { %v1692_v27 = vpack.c.bf16 %v1579_v54, %v1578_v7  ;;  %v559_v26 = vperm.slane %v543_v37, 0  ;;  %v1833_v32 = vunpack.c.l.b16 %v4496_v21  ;;  %v1834_v54 = vunpack.c.h.b16 %v4496_v21 }
 0x173   : >> { %v1014_v28 = vpop.f32.mrf.mxu2  ;;  %v1103_v19 = vpop.f32.mrf.mxu3  ;;  %v718_v52 = vpack.c.bf16 %v4528_v24, %v4524_v31 }
 0x174   : >> { %v1196_v22 = vadd.f32 %v1014_v28, %v4368_v13  ;;  %v1197_v14 = vadd.f32 %v1103_v19, %v4371_v0  ;;  %v839_v23 = vpop.f32.mrf.mxu0  ;;  %v928_v30 = vpop.f32.mrf.mxu1  ;;  %v1837_v43 = vunpack.c.l.b16 %v1692_v27  ;;  %v4539_v28 = vsub.f32 %v4215_v36, %v559_v26  ;;  %v5252_v19 = vld [vmem:[#allocation77_spill] sm:$0xff] }
 0x175   : >> { %v1198_v47 = vadd.f32 %v839_v23, %v4325_v4  ;;  %v1199_v45 = vadd.f32 %v928_v30, %v4328_v5  ;;  %v5254_v23 = vld [vmem:[#allocation45_spill] sm:$0xff]  ;;  %v5255_v30 = vld [vmem:[#allocation46_spill] sm:$0xff]  ;;  %v4546_v49 = vsub.f32 %v4218_v2, %v559_v26 }
 0x176   : >> { %vm1324_vm14 = vcmp.gt.f32.partialorder %v1196_v22, 0.0  ;;  %v1452_v44 = vmul.f32 0.01, %v1196_v22  ;;  %vm1325_vm15 = vcmp.gt.f32.partialorder %v1197_v14, 0.0  ;;  %v1453_v34 = vmul.f32 0.01, %v1197_v14 }
 0x177   : >> { %vm1326_vm0 = vcmp.gt.f32.partialorder %v1198_v47, 0.0  ;;  %v1454_v8 = vmul.f32 0.01, %v1198_v47  ;;  %vm1327_vm1 = vcmp.gt.f32.partialorder %v1199_v45, 0.0  ;;  %v1455_v17 = vmul.f32 0.01, %v1199_v45  ;;  %3170 = vmatmul.msk.bf16.gmra.mxu0 %vm761_vm2, %v717_v11  ;;  %3186 = vmatmul.msk.bf16.gmra.mxu1 %vm761_vm2, %v717_v11 }
 0x178   : >> { %v1580_v41 = vsel %vm1324_vm14, %v1196_v22, %v1452_v44  ;;  %v1581_v48 = vsel %vm1325_vm15, %v1197_v14, %v1453_v34  ;;  %3202 = vmatmul.msk.bf16.gmra.mxu2 %vm761_vm2, %v717_v11  ;;  %3218 = vmatmul.msk.bf16.gmra.mxu3 %vm761_vm2, %v717_v11  ;;  %v5253_v22 = vld [vmem:[#allocation78_spill] sm:$0xff]  ;;  %v3225_v44 = vor.u32 %v5255_v30, %v5254_v23  ;;  %vm637_vm7 = vcmp.gt.f32.partialorder %v4539_v28, 0.0 }
 0x179   : >> { %v1693_v25 = vpack.c.bf16 %v1581_v48, %v1580_v41  ;;  %v1582_v42 = vsel %vm1326_vm0, %v1198_v47, %v1454_v8  ;;  %v1583_v7 = vsel %vm1327_vm1, %v1199_v45, %v1455_v17  ;;  %v3289_v14 = vor.u32 %v5253_v22, %v5252_v19  ;;  %v5256_v47 = vld [vmem:[#allocation90_spill] sm:$0xff]  ;;  %v5257_v45 = vld [vmem:[#allocation91_spill] sm:$0xff] }
 0x17a   : >> { %v4536_v37 = vpack.c.bf16 %v1583_v7, %v1582_v42  ;;  %v3321_v8 = vor.u32 %v5257_v45, %v5256_v47  ;;  %v4550_v21 = vpack.c.b16 %v1837_v43, %v1833_v32  ;;  %v1838_v17 = vunpack.c.h.b16 %v1692_v27  ;;  %2264 = vmatpush.bf16.msrb.mxu0 %v3225_v44 }
 0x17b   : >> { %v1017_v11 = vpop.f32.mrf.mxu2  ;;  %v1106_v34 = vpop.f32.mrf.mxu3  ;;  %2442 = vmatpush.bf16.msrb.mxu2 %v3289_v14  ;;  %v1835_v7 = vunpack.c.l.b16 %v4515_v55  ;;  %v1839_v19 = vunpack.c.l.b16 %v1693_v25  ;;  %v1840_v32 = vunpack.c.h.b16 %v1693_v25  ;;  %vm638_vm8 = vcmp.gt.f32.partialorder %v4546_v49, 0.0 }
 0x17c   : >> { %v1200_v36 = vadd.f32 %v1017_v11, %v4339_v10  ;;  %v1201_v41 = vadd.f32 %v1106_v34, %v4342_v3  ;;  %v841_v48 = vpop.f32.mrf.mxu0  ;;  %v930_v42 = vpop.f32.mrf.mxu1  ;;  %2531 = vmatpush.bf16.msrb.mxu3 %v3321_v8  ;;  %v4557_v22 = vpack.c.b16 %v1838_v17, %v1834_v54  ;;  %v1836_v34 = vunpack.c.h.b16 %v4515_v55  ;;  %v5258_v54 = vld [vmem:[#allocation61_spill] sm:$0xff]  ;;  %v5259_v17 = vld [vmem:[#allocation62_spill] sm:$0xff] }
 0x17d   : >> { %v1202_v2 = vadd.f32 %v841_v48, %v4348_v15  ;;  %v1203_v26 = vadd.f32 %v930_v42, %v4351_v16  ;;  %v4559_v11 = vpack.c.b16 %v1839_v19, %v1835_v7  ;;  %v3257_v25 = vor.u32 %v5259_v17, %v5258_v54 }
 0x17e   : >> { %vm1328_vm3 = vcmp.gt.f32.partialorder %v1200_v36, 0.0  ;;  %v1456_v27 = vmul.f32 0.01, %v1200_v36  ;;  %vm1329_vm4 = vcmp.gt.f32.partialorder %v1201_v41, 0.0  ;;  %v1457_v43 = vmul.f32 0.01, %v1201_v41 }
 0x17f   : >> { %vm1330_vm5 = vcmp.gt.f32.partialorder %v1202_v2, 0.0  ;;  %v1458_v23 = vmul.f32 0.01, %v1202_v2  ;;  %vm1331_vm6 = vcmp.gt.f32.partialorder %v1203_v26, 0.0  ;;  %v1459_v14 = vmul.f32 0.01, %v1203_v26  ;;  %2353 = vmatpush.bf16.msrb.mxu1 %v3257_v25 }
 0x180   : >> { %v1584_v30 = vsel %vm1328_vm3, %v1200_v36, %v1456_v27  ;;  %v1585_v44 = vsel %vm1329_vm4, %v1201_v41, %v1457_v43  ;;  %v4564_v42 = vpack.c.b16 %v1840_v32, %v1836_v34  ;;  %v1841_v32 = vunpack.c.l.b16 %v4536_v37 }
 0x181   : >> { %v1695_v47 = vpack.c.bf16 %v1585_v44, %v1584_v30  ;;  %v1586_v45 = vsel %vm1330_vm5, %v1202_v2, %v1458_v23  ;;  %v1587_v8 = vsel %vm1331_vm6, %v1203_v26, %v1459_v14  ;;  %v669_v26 = vmul.f32 0.01, %v4539_v28 }
 0x182   : >> { %v1696_v48 = vpack.c.bf16 %v1587_v8, %v1586_v45  ;;  %v544_v23 = vrot.slane %v5181_v1, 7  ;;  %v670_v45 = vmul.f32 0.01, %v4546_v49  ;;  %v1842_v17 = vunpack.c.h.b16 %v4536_v37 }
 0x183   : >> { %v1019_v50 = vpop.f32.mrf.mxu2  ;;  %v1108_v51 = vpop.f32.mrf.mxu3 }
 0x184   : >> { %v1204_v36 = vadd.f32 %v1019_v50, %v4368_v13  ;;  %v1205_v41 = vadd.f32 %v1108_v51, %v4371_v0  ;;  %v844_v55 = vpop.f32.mrf.mxu0  ;;  %v933_v7 = vpop.f32.mrf.mxu1  ;;  %v1845_v14 = vunpack.c.l.b16 %v1696_v48  ;;  %v1846_v25 = vunpack.c.h.b16 %v1696_v48 }
 0x185   : >> { %v1206_v19 = vadd.f32 %v844_v55, %v4325_v4  ;;  %v1207_v2 = vadd.f32 %v933_v7, %v4328_v5  ;;  %v1843_v55 = vunpack.c.l.b16 %v1695_v47 }
 0x186   : >> { %vm1332_vm9 = vcmp.gt.f32.partialorder %v1204_v36, 0.0  ;;  %v1460_v31 = vmul.f32 0.01, %v1204_v36  ;;  %vm1333_vm10 = vcmp.gt.f32.partialorder %v1205_v41, 0.0  ;;  %v1461_v50 = vmul.f32 0.01, %v1205_v41 }
 0x187   : >> { %vm1334_vm11 = vcmp.gt.f32.partialorder %v1206_v19, 0.0  ;;  %v1462_v51 = vmul.f32 0.01, %v1206_v19  ;;  %vm1335_vm12 = vcmp.gt.f32.partialorder %v1207_v2, 0.0  ;;  %v1463_v24 = vmul.f32 0.01, %v1207_v2  ;;  %3171 = vmatmul.msk.bf16.gmra.mxu0 %vm761_vm2, %v718_v52  ;;  %3187 = vmatmul.msk.bf16.gmra.mxu1 %vm761_vm2, %v718_v52 }
 0x188   : >> { %v1588_v27 = vsel %vm1332_vm9, %v1204_v36, %v1460_v31  ;;  %v1589_v43 = vsel %vm1333_vm10, %v1205_v41, %v1461_v50  ;;  %3203 = vmatmul.msk.bf16.gmra.mxu2 %vm761_vm2, %v718_v52  ;;  %3219 = vmatmul.msk.bf16.gmra.mxu3 %vm761_vm2, %v718_v52  ;;  %v4584_v54 = vpack.c.b16 %v1845_v14, %v1841_v32  ;;  %v1844_v52 = vunpack.c.h.b16 %v1695_v47 }
 0x189   : >> { %v1697_v30 = vpack.c.bf16 %v1589_v43, %v1588_v27  ;;  %v1590_v44 = vsel %vm1334_vm11, %v1206_v19, %v1462_v51  ;;  %v1591_v34 = vsel %vm1335_vm12, %v1207_v2, %v1463_v24  ;;  %v560_v24 = vperm.slane %v544_v23, 0 }
 0x18a   : >> { %v4582_v8 = vpack.c.bf16 %v1591_v34, %v1590_v44  ;;  %v4589_v27 = vpack.c.b16 %v1846_v25, %v1842_v17  ;;  %v701_v17 = vsel %vm637_vm7, %v4539_v28, %v669_v26  ;;  %v702_v25 = vsel %vm638_vm8, %v4546_v49, %v670_v45 }
 0x18b   : >> { %v1022_v36 = vpop.f32.mrf.mxu2  ;;  %v1111_v41 = vpop.f32.mrf.mxu3  ;;  %v1847_v7 = vunpack.c.l.b16 %v1697_v30  ;;  %v1848_v31 = vunpack.c.h.b16 %v1697_v30 }
 0x18c   : >> { %v1208_v50 = vadd.f32 %v1022_v36, %v4339_v10  ;;  %v1209_v19 = vadd.f32 %v1111_v41, %v4342_v3  ;;  %v846_v2 = vpop.f32.mrf.mxu0  ;;  %v935_v51 = vpop.f32.mrf.mxu1 }
 0x18d   : >> { %v1210_v32 = vadd.f32 %v846_v2, %v4348_v15  ;;  %v1211_v37 = vadd.f32 %v935_v51, %v4351_v16  ;;  %v4593_v48 = vpack.c.b16 %v1847_v7, %v1843_v55  ;;  %v4595_v43 = vpack.c.b16 %v1848_v31, %v1844_v52  ;;  %v3516_v51 = vld [vmem:[%s4212_s19] sm:$0xff] }
 0x18e   : >> { %vm1336_vm13 = vcmp.gt.f32.partialorder %v1208_v50, 0.0  ;;  %v1464_v47 = vmul.f32 0.01, %v1208_v50  ;;  %vm1337_vm14 = vcmp.gt.f32.partialorder %v1209_v19, 0.0  ;;  %v1465_v14 = vmul.f32 0.01, %v1209_v19 }
 0x18f   : >> { %vm1338_vm15 = vcmp.gt.f32.partialorder %v1210_v32, 0.0  ;;  %v1466_v30 = vmul.f32 0.01, %v1210_v32  ;;  %vm1339_vm0 = vcmp.gt.f32.partialorder %v1211_v37, 0.0  ;;  %v1467_v23 = vmul.f32 0.01, %v1211_v37 }
 0x190   : >> { %v1592_v44 = vsel %vm1336_vm13, %v1208_v50, %v1464_v47  ;;  %v1593_v34 = vsel %vm1337_vm14, %v1209_v19, %v1465_v14  ;;  %v719_v2 = vpack.c.bf16 %v702_v25, %v701_v17  ;;  %v607_v1 = vsub.f32 %v3516_v51, %v560_v24 }
 0x191   : >> { %v1699_v36 = vpack.c.bf16 %v1593_v34, %v1592_v44  ;;  %v1594_v41 = vsel %vm1338_vm15, %v1210_v32, %v1466_v30  ;;  %v1595_v55 = vsel %vm1339_vm0, %v1211_v37, %v1467_v23  ;;  %v608_v50 = vsub.f32 %v3517_v53, %v560_v24 }
 0x192   : >> { %v1700_v7 = vpack.c.bf16 %v1595_v55, %v1594_v41  ;;  %v1849_v14 = vunpack.c.l.b16 %v4582_v8  ;;  %v1850_v37 = vunpack.c.h.b16 %v4582_v8  ;;  %vm639_vm6 = vcmp.gt.f32.partialorder %v607_v1, 0.0 }
 0x193   : >> { %v1024_v52 = vpop.f32.mrf.mxu2  ;;  %v1113_v31 = vpop.f32.mrf.mxu3  ;;  %vm640_vm7 = vcmp.gt.f32.partialorder %v608_v50, 0.0 }
 0x194   : >> { %v1212_v19 = vadd.f32 %v1024_v52, %v4368_v13  ;;  %v1213_v47 = vadd.f32 %v1113_v31, %v4371_v0  ;;  %v849_v28 = vpop.f32.mrf.mxu0  ;;  %v938_v26 = vpop.f32.mrf.mxu1  ;;  %v1853_v49 = vunpack.c.l.b16 %v1700_v7  ;;  %v1854_v30 = vunpack.c.h.b16 %v1700_v7 }
 0x195   : >> { %v1214_v45 = vadd.f32 %v849_v28, %v4325_v4  ;;  %v1215_v32 = vadd.f32 %v938_v26, %v4328_v5  ;;  %v1851_v31 = vunpack.c.l.b16 %v1699_v36 }
 0x196   : >> { %vm1340_vm1 = vcmp.gt.f32.partialorder %v1212_v19, 0.0  ;;  %v1468_v23 = vmul.f32 0.01, %v1212_v19  ;;  %vm1341_vm3 = vcmp.gt.f32.partialorder %v1213_v47, 0.0  ;;  %v1469_v53 = vmul.f32 0.01, %v1213_v47 }
 0x197   : >> { %vm1342_vm4 = vcmp.gt.f32.partialorder %v1214_v45, 0.0  ;;  %v1470_v24 = vmul.f32 0.01, %v1214_v45  ;;  %vm1343_vm5 = vcmp.gt.f32.partialorder %v1215_v32, 0.0  ;;  %v1471_v44 = vmul.f32 0.01, %v1215_v32  ;;  %3172 = vmatmul.msk.bf16.gmra.mxu0 %vm761_vm2, %v719_v2  ;;  %3188 = vmatmul.msk.bf16.gmra.mxu1 %vm761_vm2, %v719_v2 }
 0x198   : >> { %v1596_v34 = vsel %vm1340_vm1, %v1212_v19, %v1468_v23  ;;  %v1597_v17 = vsel %vm1341_vm3, %v1213_v47, %v1469_v53  ;;  %3204 = vmatmul.msk.bf16.gmra.mxu2 %vm761_vm2, %v719_v2  ;;  %3220 = vmatmul.msk.bf16.gmra.mxu3 %vm761_vm2, %v719_v2  ;;  %v4615_v4 = vpack.c.b16 %v1853_v49, %v1849_v14  ;;  %v1852_v19 = vunpack.c.h.b16 %v1699_v36 }
 0x199   : >> { %v1701_v5 = vpack.c.bf16 %v1597_v17, %v1596_v34  ;;  %v1598_v8 = vsel %vm1342_vm4, %v1214_v45, %v1470_v24  ;;  %v1599_v25 = vsel %vm1343_vm5, %v1215_v32, %v1471_v44  ;;  %v4617_v41 = vpack.c.b16 %v1854_v30, %v1850_v37 }
 0x19a   : >> { %v4619_v55 = vpack.c.bf16 %v1599_v25, %v1598_v8  ;;  %v671_v49 = vmul.f32 0.01, %v607_v1  ;;  %v672_v45 = vmul.f32 0.01, %v608_v50 }
 0x19b   : >> { %v1027_v7 = vpop.f32.mrf.mxu2  ;;  %v1116_v52 = vpop.f32.mrf.mxu3  ;;  %v1855_v51 = vunpack.c.l.b16 %v1701_v5  ;;  %v1856_v47 = vunpack.c.h.b16 %v1701_v5 }
 0x19c   : >> { %v1216_v28 = vadd.f32 %v1027_v7, %v4339_v10  ;;  %v1217_v2 = vadd.f32 %v1116_v52, %v4342_v3  ;;  %v851_v26 = vpop.f32.mrf.mxu0  ;;  %v940_v14 = vpop.f32.mrf.mxu1  ;;  %v703_v34 = vsel %vm639_vm6, %v607_v1, %v671_v49  ;;  %v4635_v1 = vld [vmem:[%s4321_s7] sm:$0xff]  ;;  %v1858_v49 = vunpack.c.h.b16 %v4619_v55 }
 0x19d   : >> { %v1218_v32 = vadd.f32 %v851_v26, %v4348_v15  ;;  %v1219_v37 = vadd.f32 %v940_v14, %v4351_v16  ;;  %v4625_v30 = vpack.c.b16 %v1855_v51, %v1851_v31  ;;  %v4627_v23 = vpack.c.b16 %v1856_v47, %v1852_v19  ;;  %v4639_v26 = vld [vmem:[%s4321_s7 + $0x8] sm:$0xff] }
 0x19e   : >> { %vm1344_vm8 = vcmp.gt.f32.partialorder %v1216_v28, 0.0  ;;  %v1472_v53 = vmul.f32 0.01, %v1216_v28  ;;  %vm1345_vm9 = vcmp.gt.f32.partialorder %v1217_v2, 0.0  ;;  %v1473_v36 = vmul.f32 0.01, %v1217_v2 }
 0x19f   : >> { %vm1346_vm10 = vcmp.gt.f32.partialorder %v1218_v32, 0.0  ;;  %v1474_v10 = vmul.f32 0.01, %v1218_v32  ;;  %vm1347_vm11 = vcmp.gt.f32.partialorder %v1219_v37, 0.0  ;;  %v1475_v3 = vmul.f32 0.01, %v1219_v37 }
 0x1a0   : >> { %v1600_v24 = vsel %vm1344_vm8, %v1216_v28, %v1472_v53  ;;  %v1601_v44 = vsel %vm1345_vm9, %v1217_v2, %v1473_v36  ;;  %v704_v15 = vsel %vm640_vm7, %v608_v50, %v672_v45  ;;  %v1857_v28 = vunpack.c.l.b16 %v4619_v55 }
 0x1a1   : >> { %v1703_v16 = vpack.c.bf16 %v1601_v44, %v1600_v24  ;;  %v1602_v17 = vsel %vm1346_vm10, %v1218_v32, %v1474_v10  ;;  %v1603_v5 = vsel %vm1347_vm11, %v1219_v37, %v1475_v3  ;;  %v720_v52 = vpack.c.bf16 %v704_v15, %v703_v34 }
 0x1a2   : >> { %v1704_v8 = vpack.c.bf16 %v1603_v5, %v1602_v17 }
 0x1a3   : >> { %v1029_v25 = vpop.f32.mrf.mxu2  ;;  %v1118_v7 = vpop.f32.mrf.mxu3 }
 0x1a4   : >> { %v1220_v31 = vadd.f32 %v1029_v25, %v4368_v13  ;;  %v1221_v51 = vadd.f32 %v1118_v7, %v4371_v0  ;;  %v854_v19 = vpop.f32.mrf.mxu0  ;;  %v943_v47 = vpop.f32.mrf.mxu1  ;;  %v1861_v2 = vunpack.c.l.b16 %v1704_v8  ;;  %v1862_v45 = vunpack.c.h.b16 %v1704_v8 }
 0x1a5   : >> { %v1222_v50 = vadd.f32 %v4635_v1, %v854_v19  ;;  %v1223_v14 = vadd.f32 %v4639_v26, %v943_v47  ;;  %v1859_v25 = vunpack.c.l.b16 %v1703_v16  ;;  %v4654_v19 = vld [vmem:[%s4321_s7 + $0x10] sm:$0xff]  ;;  %v4658_v47 = vld [vmem:[%s4321_s7 + $0x18] sm:$0xff] }
 0x1a6   : >> { %vm1348_vm12 = vcmp.gt.f32.partialorder %v1220_v31, 0.0  ;;  %v1476_v32 = vmul.f32 0.01, %v1220_v31  ;;  %vm1349_vm13 = vcmp.gt.f32.partialorder %v1221_v51, 0.0  ;;  %v1477_v37 = vmul.f32 0.01, %v1221_v51 }
 0x1a7   : >> { %vm1350_vm14 = vcmp.gt.f32.partialorder %v1222_v50, 0.0  ;;  %v1478_v53 = vmul.f32 0.01, %v1222_v50  ;;  %vm1351_vm15 = vcmp.gt.f32.partialorder %v1223_v14, 0.0  ;;  %v1479_v36 = vmul.f32 0.01, %v1223_v14  ;;  %3173 = vmatmul.msk.bf16.gmra.mxu0 %vm761_vm2, %v720_v52  ;;  %3189 = vmatmul.msk.bf16.gmra.mxu1 %vm761_vm2, %v720_v52 }
 0x1a8   : >> { %v1604_v10 = vsel %vm1348_vm12, %v1220_v31, %v1476_v32  ;;  %v1605_v3 = vsel %vm1349_vm13, %v1221_v51, %v1477_v37  ;;  %3205 = vmatmul.msk.bf16.gmra.mxu2 %vm761_vm2, %v720_v52  ;;  %3221 = vmatmul.msk.bf16.gmra.mxu3 %vm761_vm2, %v720_v52  ;;  %v4647_v55 = vpack.c.b16 %v1861_v2, %v1857_v28  ;;  %v1860_v31 = vunpack.c.h.b16 %v1703_v16 }
 0x1a9   : >> { %v1705_v24 = vpack.c.bf16 %v1605_v3, %v1604_v10  ;;  %v1606_v44 = vsel %vm1350_vm14, %v1222_v50, %v1478_v53  ;;  %v1607_v34 = vsel %vm1351_vm15, %v1223_v14, %v1479_v36  ;;  %v4649_v15 = vpack.c.b16 %v1862_v45, %v1858_v49  ;;  %v4662_v14 = vld [vmem:[%s4321_s7 + $0x20] sm:$0xff]  ;;  %v4666_v45 = vld [vmem:[%s4321_s7 + $0x28] sm:$0xff] }
 0x1aa   : >> { %v4651_v17 = vpack.c.bf16 %v1607_v34, %v1606_v44 }
 0x1ab   : >> { %v1032_v5 = vpop.f32.mrf.mxu2  ;;  %v1121_v8 = vpop.f32.mrf.mxu3  ;;  %v1863_v7 = vunpack.c.l.b16 %v1705_v24  ;;  %v1864_v51 = vunpack.c.h.b16 %v1705_v24 }
 0x1ac   : >> { %v1224_v52 = vadd.f32 %v4654_v19, %v1032_v5  ;;  %v1225_v28 = vadd.f32 %v4658_v47, %v1121_v8  ;;  %v856_v2 = vpop.f32.mrf.mxu0  ;;  %v945_v50 = vpop.f32.mrf.mxu1  ;;  %v1865_v57 = vunpack.c.l.b16 %v4651_v17 }
 0x1ad   : >> { %v1226_v49 = vadd.f32 %v4662_v14, %v856_v2  ;;  %v1227_v32 = vadd.f32 %v4666_v45, %v945_v50  ;;  %v4669_v16 = vpack.c.b16 %v1863_v7, %v1859_v25  ;;  %v4671_v37 = vpack.c.b16 %v1864_v51, %v1860_v31 }
 0x1ae   : >> { %vm1352_vm2 = vcmp.gt.f32.partialorder %v1224_v52, 0.0  ;;  %v1480_v53 = vmul.f32 0.01, %v1224_v52  ;;  %vm1353_vm0 = vcmp.gt.f32.partialorder %v1225_v28, 0.0  ;;  %v1481_v36 = vmul.f32 0.01, %v1225_v28 }
 0x1af   : >> { %vm1354_vm1 = vcmp.gt.f32.partialorder %v1226_v49, 0.0  ;;  %v1482_v10 = vmul.f32 0.01, %v1226_v49  ;;  %vm1355_vm3 = vcmp.gt.f32.partialorder %v1227_v32, 0.0  ;;  %v1483_v3 = vmul.f32 0.01, %v1227_v32 }
 0x1b0   : >> { %v1608_v24 = vsel %vm1352_vm2, %v1224_v52, %v1480_v53  ;;  %v1609_v44 = vsel %vm1353_vm0, %v1225_v28, %v1481_v36  ;;  %v1866_v28 = vunpack.c.h.b16 %v4651_v17 }
 0x1b1   : >> { %v1707_v34 = vpack.c.bf16 %v1609_v44, %v1608_v24  ;;  %v1610_v5 = vsel %vm1354_vm1, %v1226_v49, %v1482_v10  ;;  %v1611_v8 = vsel %vm1355_vm3, %v1227_v32, %v1483_v3 }
 0x1b2   : >> { %v1708_v2 = vpack.c.bf16 %v1611_v8, %v1610_v5 }
 0x1b3   : >> { %v1034_v56 = vpop.f32.mrf.mxu2  ;;  %v1123_v50 = vpop.f32.mrf.mxu3 }
 0x1b4   : >> { %v1228_v25 = vadd.f32 %v1034_v56, %v4368_v13  ;;  %v1229_v7 = vadd.f32 %v1123_v50, %v4371_v0  ;;  %v859_v31 = vpop.f32.mrf.mxu0  ;;  %v948_v51 = vpop.f32.mrf.mxu1  ;;  %v1869_v58 = vunpack.c.l.b16 %v1708_v2  ;;  %v1870_v49 = vunpack.c.h.b16 %v1708_v2 }
 0x1b5   : >> { %v1230_v59 = vadd.f32 %v4635_v1, %v859_v31  ;;  %v1231_v52 = vadd.f32 %v4639_v26, %v948_v51  ;;  %v1867_v50 = vunpack.c.l.b16 %v1707_v34  ;;  %v1868_v31 = vunpack.c.h.b16 %v1707_v34 }
 0x1b6   : >> { %vm1356_vm4 = vcmp.gt.f32.partialorder %v1228_v25, 0.0  ;;  %v1484_v32 = vmul.f32 0.01, %v1228_v25  ;;  %vm1357_vm5 = vcmp.gt.f32.partialorder %v1229_v7, 0.0  ;;  %v1485_v53 = vmul.f32 0.01, %v1229_v7 }
 0x1b7   : >> { %vm1358_vm6 = vcmp.gt.f32.partialorder %v1230_v59, 0.0  ;;  %v1486_v56 = vmul.f32 0.01, %v1230_v59  ;;  %vm1359_vm7 = vcmp.gt.f32.partialorder %v1231_v52, 0.0  ;;  %v1487_v13 = vmul.f32 0.01, %v1231_v52  ;;  %2265 = vmatmul.bf16.vlgmr.msrb.gmra.mxu0 %v4394_v6  ;;  %2354 = vmatmul.bf16.vlgmr.msrb.gmra.mxu1 %v4400_v12 }
 0x1b8   : >> { %v1612_v0 = vsel %vm1356_vm4, %v1228_v25, %v1484_v32  ;;  %v1613_v36 = vsel %vm1357_vm5, %v1229_v7, %v1485_v53  ;;  %2443 = vmatmul.bf16.vlgmr.msrb.gmra.mxu2 %v4411_v20  ;;  %2532 = vmatmul.bf16.vlgmr.msrb.gmra.mxu3 %v4413_v18  ;;  %v4683_v17 = vpack.c.b16 %v1869_v58, %v1865_v57 }
 0x1b9   : >> { %v1709_v10 = vpack.c.bf16 %v1613_v36, %v1612_v0  ;;  %v1614_v3 = vsel %vm1358_vm6, %v1230_v59, %v1486_v56  ;;  %v1615_v24 = vsel %vm1359_vm7, %v1231_v52, %v1487_v13  ;;  %v4685_v44 = vpack.c.b16 %v1870_v49, %v1866_v28 }
 0x1ba   : >> { %v1710_v5 = vpack.c.bf16 %v1615_v24, %v1614_v3  ;;  %v4696_v24 = vld [vmem:[%s4321_s7 + $0x30] sm:$0xff] }
 0x1bb   : >> { %v1037_v8 = vpop.f32.mrf.mxu2  ;;  %v1126_v2 = vpop.f32.mrf.mxu3  ;;  %v1871_v6 = vunpack.c.l.b16 %v1709_v10  ;;  %v1872_v12 = vunpack.c.h.b16 %v1709_v10 }
 0x1bc   : >> { %v1232_v25 = vadd.f32 %v4654_v19, %v1037_v8  ;;  %v1233_v20 = vadd.f32 %v4658_v47, %v1126_v2  ;;  %v861_v7 = vpop.f32.mrf.mxu0  ;;  %v950_v18 = vpop.f32.mrf.mxu1  ;;  %v4700_v2 = vld [vmem:[%s4321_s7 + $0x38] sm:$0xff] }
 0x1bd   : >> { %v1234_v57 = vadd.f32 %v4662_v14, %v861_v7  ;;  %v1235_v58 = vadd.f32 %v4666_v45, %v950_v18  ;;  %v4691_v59 = vpack.c.b16 %v1871_v6, %v1867_v50  ;;  %v4693_v51 = vpack.c.b16 %v1872_v12, %v1868_v31 }
 0x1be   : >> { %vm1360_vm8 = vcmp.gt.f32.partialorder %v1232_v25, 0.0  ;;  %v1488_v52 = vmul.f32 0.01, %v1232_v25  ;;  %vm1361_vm9 = vcmp.gt.f32.partialorder %v1233_v20, 0.0  ;;  %v1489_v34 = vmul.f32 0.01, %v1233_v20 }
 0x1bf   : >> { %vm1362_vm10 = vcmp.gt.f32.partialorder %v1234_v57, 0.0  ;;  %v1490_v28 = vmul.f32 0.01, %v1234_v57  ;;  %vm1363_vm11 = vcmp.gt.f32.partialorder %v1235_v58, 0.0  ;;  %v1491_v49 = vmul.f32 0.01, %v1235_v58 }
 0x1c0   : >> { %v1616_v32 = vsel %vm1360_vm8, %v1232_v25, %v1488_v52  ;;  %v1617_v53 = vsel %vm1361_vm9, %v1233_v20, %v1489_v34  ;;  %v1873_v12 = vunpack.c.l.b16 %v1710_v5  ;;  %v1874_v18 = vunpack.c.h.b16 %v1710_v5 }
 0x1c1   : >> { %v1711_v56 = vpack.c.bf16 %v1617_v53, %v1616_v32  ;;  %v1618_v13 = vsel %vm1362_vm10, %v1234_v57, %v1490_v28  ;;  %v1619_v0 = vsel %vm1363_vm11, %v1235_v58, %v1491_v49 }
 0x1c2   : >> { %v1712_v36 = vpack.c.bf16 %v1619_v0, %v1618_v13 }
 0x1c3   : >> { %v1039_v10 = vpop.f32.mrf.mxu2  ;;  %v1128_v3 = vpop.f32.mrf.mxu3  ;;  %v1876_v60 = vunpack.c.h.b16 %v1711_v56 }
 0x1c4   : >> { %v1236_v8 = vadd.f32 %v4696_v24, %v1039_v10  ;;  %v1237_v50 = vadd.f32 %v4700_v2, %v1128_v3  ;;  %v864_v6 = vpop.f32.mrf.mxu0  ;;  %v953_v31 = vpop.f32.mrf.mxu1  ;;  %v1877_v7 = vunpack.c.l.b16 %v1712_v36  ;;  %v1878_v57 = vunpack.c.h.b16 %v1712_v36 }
 0x1c5   : >> { %v1238_v25 = vadd.f32 %v4635_v1, %v864_v6  ;;  %v1239_v20 = vadd.f32 %v4639_v26, %v953_v31  ;;  %v1875_v31 = vunpack.c.l.b16 %v1711_v56 }
 0x1c6   : >> { %vm1364_vm12 = vcmp.gt.f32.partialorder %v1236_v8, 0.0  ;;  %v1492_v58 = vmul.f32 0.01, %v1236_v8  ;;  %vm1365_vm13 = vcmp.gt.f32.partialorder %v1237_v50, 0.0  ;;  %v1493_v52 = vmul.f32 0.01, %v1237_v50 }
 0x1c7   : >> { %vm1366_vm14 = vcmp.gt.f32.partialorder %v1238_v25, 0.0  ;;  %v1494_v34 = vmul.f32 0.01, %v1238_v25  ;;  %vm1367_vm15 = vcmp.gt.f32.partialorder %v1239_v20, 0.0  ;;  %v1495_v28 = vmul.f32 0.01, %v1239_v20  ;;  %2270 = vmatmul.bf16.gmra.mxu0 %v4457_v29  ;;  %2359 = vmatmul.bf16.gmra.mxu1 %v4464_v35 }
 0x1c8   : >> { %v1620_v49 = vsel %vm1364_vm12, %v1236_v8, %v1492_v58  ;;  %v1621_v32 = vsel %vm1365_vm13, %v1237_v50, %v1493_v52  ;;  %2448 = vmatmul.bf16.gmra.mxu2 %v4466_v38  ;;  %2537 = vmatmul.bf16.gmra.mxu3 %v4473_v46  ;;  %v4709_v5 = vpack.c.b16 %v1877_v7, %v1873_v12 }
 0x1c9   : >> { %v1713_v53 = vpack.c.bf16 %v1621_v32, %v1620_v49  ;;  %v1622_v13 = vsel %vm1366_vm14, %v1238_v25, %v1494_v34  ;;  %v1623_v0 = vsel %vm1367_vm15, %v1239_v20, %v1495_v28  ;;  %v4711_v36 = vpack.c.b16 %v1878_v57, %v1874_v18 }
 0x1ca   : >> { %v1714_v10 = vpack.c.bf16 %v1623_v0, %v1622_v13 }
 0x1cb   : >> { %v1042_v3 = vpop.f32.mrf.mxu2  ;;  %v1131_v6 = vpop.f32.mrf.mxu3  ;;  %v1879_v29 = vunpack.c.l.b16 %v1713_v53  ;;  %v1880_v35 = vunpack.c.h.b16 %v1713_v53 }
 0x1cc   : >> { %v1240_v8 = vadd.f32 %v4654_v19, %v1042_v3  ;;  %v1241_v38 = vadd.f32 %v4658_v47, %v1131_v6  ;;  %v866_v50 = vpop.f32.mrf.mxu0  ;;  %v955_v46 = vpop.f32.mrf.mxu1 }
 0x1cd   : >> { %v1242_v12 = vadd.f32 %v4662_v14, %v866_v50  ;;  %v1243_v7 = vadd.f32 %v4666_v45, %v955_v46  ;;  %v4717_v25 = vpack.c.b16 %v1879_v29, %v1875_v31  ;;  %v4719_v20 = vpack.c.b16 %v1880_v35, %v1876_v60 }
 0x1ce   : >> { %vm1368_vm2 = vcmp.gt.f32.partialorder %v1240_v8, 0.0  ;;  %v1496_v18 = vmul.f32 0.01, %v1240_v8  ;;  %vm1369_vm0 = vcmp.gt.f32.partialorder %v1241_v38, 0.0  ;;  %v1497_v57 = vmul.f32 0.01, %v1241_v38 }
 0x1cf   : >> { %vm1370_vm1 = vcmp.gt.f32.partialorder %v1242_v12, 0.0  ;;  %v1498_v56 = vmul.f32 0.01, %v1242_v12  ;;  %vm1371_vm3 = vcmp.gt.f32.partialorder %v1243_v7, 0.0  ;;  %v1499_v58 = vmul.f32 0.01, %v1243_v7 }
 0x1d0   : >> { %v1624_v52 = vsel %vm1368_vm2, %v1240_v8, %v1496_v18  ;;  %v1625_v34 = vsel %vm1369_vm0, %v1241_v38, %v1497_v57  ;;  %v1881_v29 = vunpack.c.l.b16 %v1714_v10  ;;  %v1882_v8 = vunpack.c.h.b16 %v1714_v10 }
 0x1d1   : >> { %v1715_v28 = vpack.c.bf16 %v1625_v34, %v1624_v52  ;;  %v1626_v49 = vsel %vm1370_vm1, %v1242_v12, %v1498_v56  ;;  %v1627_v32 = vsel %vm1371_vm3, %v1243_v7, %v1499_v58 }
 0x1d2   : >> { %v1716_v53 = vpack.c.bf16 %v1627_v32, %v1626_v49 }
 0x1d3   : >> { %v1044_v13 = vpop.f32.mrf.mxu2  ;;  %v1133_v0 = vpop.f32.mrf.mxu3 }
 0x1d4   : >> { %v1244_v3 = vadd.f32 %v4696_v24, %v1044_v13  ;;  %v1245_v60 = vadd.f32 %v4700_v2, %v1133_v0  ;;  %v869_v6 = vpop.f32.mrf.mxu0  ;;  %v958_v31 = vpop.f32.mrf.mxu1  ;;  %v1885_v35 = vunpack.c.l.b16 %v1716_v53  ;;  %v1886_v38 = vunpack.c.h.b16 %v1716_v53 }
 0x1d5   : >> { %v1246_v50 = vadd.f32 %v4635_v1, %v869_v6  ;;  %v1247_v46 = vadd.f32 %v4639_v26, %v958_v31  ;;  %v1883_v6 = vunpack.c.l.b16 %v1715_v28  ;;  %v1884_v31 = vunpack.c.h.b16 %v1715_v28 }
 0x1d6   : >> { %vm1372_vm4 = vcmp.gt.f32.partialorder %v1244_v3, 0.0  ;;  %v1500_v12 = vmul.f32 0.01, %v1244_v3  ;;  %vm1373_vm5 = vcmp.gt.f32.partialorder %v1245_v60, 0.0  ;;  %v1501_v7 = vmul.f32 0.01, %v1245_v60 }
 0x1d7   : >> { %vm1374_vm6 = vcmp.gt.f32.partialorder %v1246_v50, 0.0  ;;  %v1502_v18 = vmul.f32 0.01, %v1246_v50  ;;  %vm1375_vm7 = vcmp.gt.f32.partialorder %v1247_v46, 0.0  ;;  %v1503_v57 = vmul.f32 0.01, %v1247_v46  ;;  %2275 = vmatmul.bf16.gmra.mxu0 %v4498_v40  ;;  %2364 = vmatmul.bf16.gmra.mxu1 %v4506_v9 }
 0x1d8   : >> { %v1628_v56 = vsel %vm1372_vm4, %v1244_v3, %v1500_v12  ;;  %v1629_v58 = vsel %vm1373_vm5, %v1245_v60, %v1501_v7  ;;  %2453 = vmatmul.bf16.gmra.mxu2 %v4511_v33  ;;  %2542 = vmatmul.bf16.gmra.mxu3 %v4513_v39  ;;  %v4729_v10 = vpack.c.b16 %v1885_v35, %v1881_v29 }
 0x1d9   : >> { %v1717_v52 = vpack.c.bf16 %v1629_v58, %v1628_v56  ;;  %v1630_v34 = vsel %vm1374_vm6, %v1246_v50, %v1502_v18  ;;  %v1631_v49 = vsel %vm1375_vm7, %v1247_v46, %v1503_v57  ;;  %v4731_v32 = vpack.c.b16 %v1886_v38, %v1882_v8 }
 0x1da   : >> { %v1718_v53 = vpack.c.bf16 %v1631_v49, %v1630_v34 }
 0x1db   : >> { %v1047_v13 = vpop.f32.mrf.mxu2  ;;  %v1136_v0 = vpop.f32.mrf.mxu3  ;;  %v1887_v40 = vunpack.c.l.b16 %v1717_v52  ;;  %v1888_v9 = vunpack.c.h.b16 %v1717_v52 }
 0x1dc   : >> { %v1248_v3 = vadd.f32 %v4654_v19, %v1047_v13  ;;  %v1249_v33 = vadd.f32 %v4658_v47, %v1136_v0  ;;  %v871_v60 = vpop.f32.mrf.mxu0  ;;  %v960_v39 = vpop.f32.mrf.mxu1 }
 0x1dd   : >> { %v1250_v29 = vadd.f32 %v4662_v14, %v871_v60  ;;  %v1251_v35 = vadd.f32 %v4666_v45, %v960_v39  ;;  %v4737_v50 = vpack.c.b16 %v1887_v40, %v1883_v6  ;;  %v4739_v46 = vpack.c.b16 %v1888_v9, %v1884_v31 }
 0x1de   : >> { %vm1376_vm8 = vcmp.gt.f32.partialorder %v1248_v3, 0.0  ;;  %v1504_v8 = vmul.f32 0.01, %v1248_v3  ;;  %vm1377_vm9 = vcmp.gt.f32.partialorder %v1249_v33, 0.0  ;;  %v1505_v38 = vmul.f32 0.01, %v1249_v33 }
 0x1df   : >> { %vm1378_vm10 = vcmp.gt.f32.partialorder %v1250_v29, 0.0  ;;  %v1506_v28 = vmul.f32 0.01, %v1250_v29  ;;  %vm1379_vm11 = vcmp.gt.f32.partialorder %v1251_v35, 0.0  ;;  %v1507_v12 = vmul.f32 0.01, %v1251_v35 }
 0x1e0   : >> { %v1632_v7 = vsel %vm1376_vm8, %v1248_v3, %v1504_v8  ;;  %v1633_v18 = vsel %vm1377_vm9, %v1249_v33, %v1505_v38  ;;  %v1889_v31 = vunpack.c.l.b16 %v1718_v53  ;;  %v1890_v3 = vunpack.c.h.b16 %v1718_v53 }
 0x1e1   : >> { %v1719_v57 = vpack.c.bf16 %v1633_v18, %v1632_v7  ;;  %v1634_v56 = vsel %vm1378_vm10, %v1250_v29, %v1506_v28  ;;  %v1635_v58 = vsel %vm1379_vm11, %v1251_v35, %v1507_v12 }
 0x1e2   : >> { %v1720_v52 = vpack.c.bf16 %v1635_v58, %v1634_v56 }
 0x1e3   : >> { %v1049_v34 = vpop.f32.mrf.mxu2  ;;  %v1138_v49 = vpop.f32.mrf.mxu3 }
 0x1e4   : >> { %v1252_v13 = vadd.f32 %v4696_v24, %v1049_v34  ;;  %v1253_v0 = vadd.f32 %v4700_v2, %v1138_v49  ;;  %v874_v6 = vpop.f32.mrf.mxu0  ;;  %v963_v40 = vpop.f32.mrf.mxu1  ;;  %v1893_v9 = vunpack.c.l.b16 %v1720_v52  ;;  %v1894_v33 = vunpack.c.h.b16 %v1720_v52 }
 0x1e5   : >> { %v1254_v60 = vadd.f32 %v4635_v1, %v874_v6  ;;  %v1255_v39 = vadd.f32 %v4639_v26, %v963_v40  ;;  %v1891_v6 = vunpack.c.l.b16 %v1719_v57  ;;  %v1892_v40 = vunpack.c.h.b16 %v1719_v57 }
 0x1e6   : >> { %vm1380_vm12 = vcmp.gt.f32.partialorder %v1252_v13, 0.0  ;;  %v1508_v29 = vmul.f32 0.01, %v1252_v13  ;;  %vm1381_vm13 = vcmp.gt.f32.partialorder %v1253_v0, 0.0  ;;  %v1509_v35 = vmul.f32 0.01, %v1253_v0 }
 0x1e7   : >> { %vm1382_vm14 = vcmp.gt.f32.partialorder %v1254_v60, 0.0  ;;  %v1510_v8 = vmul.f32 0.01, %v1254_v60  ;;  %vm1383_vm15 = vcmp.gt.f32.partialorder %v1255_v39, 0.0  ;;  %v1511_v38 = vmul.f32 0.01, %v1255_v39  ;;  %2280 = vmatmul.bf16.gmra.mxu0 %v4550_v21  ;;  %2369 = vmatmul.bf16.gmra.mxu1 %v4557_v22 }
 0x1e8   : >> { %v1636_v28 = vsel %vm1380_vm12, %v1252_v13, %v1508_v29  ;;  %v1637_v12 = vsel %vm1381_vm13, %v1253_v0, %v1509_v35  ;;  %2458 = vmatmul.bf16.gmra.mxu2 %v4559_v11  ;;  %2547 = vmatmul.bf16.gmra.mxu3 %v4564_v42  ;;  %v4749_v53 = vpack.c.b16 %v1893_v9, %v1889_v31 }
 0x1e9   : >> { %v1721_v7 = vpack.c.bf16 %v1637_v12, %v1636_v28  ;;  %v1638_v18 = vsel %vm1382_vm14, %v1254_v60, %v1510_v8  ;;  %v1639_v56 = vsel %vm1383_vm15, %v1255_v39, %v1511_v38  ;;  %v4751_v58 = vpack.c.b16 %v1894_v33, %v1890_v3 }
 0x1ea   : >> { %v1722_v52 = vpack.c.bf16 %v1639_v56, %v1638_v18 }
 0x1eb   : >> { %v1052_v34 = vpop.f32.mrf.mxu2  ;;  %v1141_v49 = vpop.f32.mrf.mxu3  ;;  %v1895_v21 = vunpack.c.l.b16 %v1721_v7  ;;  %v1896_v22 = vunpack.c.h.b16 %v1721_v7 }
 0x1ec   : >> { %v1256_v13 = vadd.f32 %v4654_v19, %v1052_v34  ;;  %v1257_v11 = vadd.f32 %v4658_v47, %v1141_v49  ;;  %v876_v0 = vpop.f32.mrf.mxu0  ;;  %v965_v42 = vpop.f32.mrf.mxu1 }
 0x1ed   : >> { %v1258_v31 = vadd.f32 %v4662_v14, %v876_v0  ;;  %v1259_v9 = vadd.f32 %v4666_v45, %v965_v42  ;;  %v4757_v60 = vpack.c.b16 %v1895_v21, %v1891_v6  ;;  %v4759_v39 = vpack.c.b16 %v1896_v22, %v1892_v40 }
 0x1ee   : >> { %vm1384_vm2 = vcmp.gt.f32.partialorder %v1256_v13, 0.0  ;;  %v1512_v3 = vmul.f32 0.01, %v1256_v13  ;;  %vm1385_vm0 = vcmp.gt.f32.partialorder %v1257_v11, 0.0  ;;  %v1513_v33 = vmul.f32 0.01, %v1257_v11 }
 0x1ef   : >> { %vm1386_vm1 = vcmp.gt.f32.partialorder %v1258_v31, 0.0  ;;  %v1514_v57 = vmul.f32 0.01, %v1258_v31  ;;  %vm1387_vm3 = vcmp.gt.f32.partialorder %v1259_v9, 0.0  ;;  %v1515_v29 = vmul.f32 0.01, %v1259_v9 }
 0x1f0   : >> { %v1640_v35 = vsel %vm1384_vm2, %v1256_v13, %v1512_v3  ;;  %v1641_v8 = vsel %vm1385_vm0, %v1257_v11, %v1513_v33  ;;  %v1897_v40 = vunpack.c.l.b16 %v1722_v52  ;;  %v1898_v13 = vunpack.c.h.b16 %v1722_v52 }
 0x1f1   : >> { %v1723_v38 = vpack.c.bf16 %v1641_v8, %v1640_v35  ;;  %v1642_v28 = vsel %vm1386_vm1, %v1258_v31, %v1514_v57  ;;  %v1643_v12 = vsel %vm1387_vm3, %v1259_v9, %v1515_v29 }
 0x1f2   : >> { %v1724_v7 = vpack.c.bf16 %v1643_v12, %v1642_v28 }
 0x1f3   : >> { %v1054_v18 = vpop.f32.mrf.mxu2  ;;  %v1143_v56 = vpop.f32.mrf.mxu3 }
 0x1f4   : >> { %v1260_v34 = vadd.f32 %v4696_v24, %v1054_v18  ;;  %v1261_v49 = vadd.f32 %v4700_v2, %v1143_v56  ;;  %v879_v6 = vpop.f32.mrf.mxu0  ;;  %v968_v21 = vpop.f32.mrf.mxu1  ;;  %v1901_v22 = vunpack.c.l.b16 %v1724_v7  ;;  %v1902_v11 = vunpack.c.h.b16 %v1724_v7 }
 0x1f5   : >> { %v1262_v0 = vadd.f32 %v4635_v1, %v879_v6  ;;  %v1263_v42 = vadd.f32 %v4639_v26, %v968_v21  ;;  %v1899_v6 = vunpack.c.l.b16 %v1723_v38  ;;  %v1900_v21 = vunpack.c.h.b16 %v1723_v38 }
 0x1f6   : >> { %vm1388_vm4 = vcmp.gt.f32.partialorder %v1260_v34, 0.0  ;;  %v1516_v31 = vmul.f32 0.01, %v1260_v34  ;;  %vm1389_vm5 = vcmp.gt.f32.partialorder %v1261_v49, 0.0  ;;  %v1517_v9 = vmul.f32 0.01, %v1261_v49 }
 0x1f7   : >> { %vm1390_vm6 = vcmp.gt.f32.partialorder %v1262_v0, 0.0  ;;  %v1518_v3 = vmul.f32 0.01, %v1262_v0  ;;  %vm1391_vm7 = vcmp.gt.f32.partialorder %v1263_v42, 0.0  ;;  %v1519_v33 = vmul.f32 0.01, %v1263_v42  ;;  %2285 = vmatmul.bf16.gmra.mxu0 %v4584_v54  ;;  %2374 = vmatmul.bf16.gmra.mxu1 %v4589_v27 }
 0x1f8   : >> { %v1644_v57 = vsel %vm1388_vm4, %v1260_v34, %v1516_v31  ;;  %v1645_v29 = vsel %vm1389_vm5, %v1261_v49, %v1517_v9  ;;  %2463 = vmatmul.bf16.gmra.mxu2 %v4593_v48  ;;  %2552 = vmatmul.bf16.gmra.mxu3 %v4595_v43  ;;  %v4769_v52 = vpack.c.b16 %v1901_v22, %v1897_v40 }
 0x1f9   : >> { %v1725_v35 = vpack.c.bf16 %v1645_v29, %v1644_v57  ;;  %v1646_v8 = vsel %vm1390_vm6, %v1262_v0, %v1518_v3  ;;  %v1647_v28 = vsel %vm1391_vm7, %v1263_v42, %v1519_v33  ;;  %v4771_v12 = vpack.c.b16 %v1902_v11, %v1898_v13 }
 0x1fa   : >> { %v1726_v7 = vpack.c.bf16 %v1647_v28, %v1646_v8 }
 0x1fb   : >> { %v1057_v18 = vpop.f32.mrf.mxu2  ;;  %v1146_v56 = vpop.f32.mrf.mxu3  ;;  %v1903_v54 = vunpack.c.l.b16 %v1725_v35  ;;  %v1904_v27 = vunpack.c.h.b16 %v1725_v35 }
 0x1fc   : >> { %v1264_v34 = vadd.f32 %v4654_v19, %v1057_v18  ;;  %v1265_v48 = vadd.f32 %v4658_v47, %v1146_v56  ;;  %v881_v49 = vpop.f32.mrf.mxu0  ;;  %v970_v43 = vpop.f32.mrf.mxu1 }
 0x1fd   : >> { %v1266_v40 = vadd.f32 %v4662_v14, %v881_v49  ;;  %v1267_v22 = vadd.f32 %v4666_v45, %v970_v43  ;;  %v4777_v0 = vpack.c.b16 %v1903_v54, %v1899_v6  ;;  %v4779_v42 = vpack.c.b16 %v1904_v27, %v1900_v21 }
 0x1fe   : >> { %vm1392_vm8 = vcmp.gt.f32.partialorder %v1264_v34, 0.0  ;;  %v1520_v13 = vmul.f32 0.01, %v1264_v34  ;;  %vm1393_vm9 = vcmp.gt.f32.partialorder %v1265_v48, 0.0  ;;  %v1521_v11 = vmul.f32 0.01, %v1265_v48 }
 0x1ff   : >> { %vm1394_vm10 = vcmp.gt.f32.partialorder %v1266_v40, 0.0  ;;  %v1522_v38 = vmul.f32 0.01, %v1266_v40  ;;  %vm1395_vm11 = vcmp.gt.f32.partialorder %v1267_v22, 0.0  ;;  %v1523_v31 = vmul.f32 0.01, %v1267_v22 }
 0x200   : >> { %v1648_v9 = vsel %vm1392_vm8, %v1264_v34, %v1520_v13  ;;  %v1649_v3 = vsel %vm1393_vm9, %v1265_v48, %v1521_v11  ;;  %v1905_v21 = vunpack.c.l.b16 %v1726_v7  ;;  %v1906_v34 = vunpack.c.h.b16 %v1726_v7 }
 0x201   : >> { %v1727_v33 = vpack.c.bf16 %v1649_v3, %v1648_v9  ;;  %v1650_v57 = vsel %vm1394_vm10, %v1266_v40, %v1522_v38  ;;  %v1651_v29 = vsel %vm1395_vm11, %v1267_v22, %v1523_v31 }
 0x202   : >> { %v1728_v35 = vpack.c.bf16 %v1651_v29, %v1650_v57 }
 0x203   : >> { %v1059_v8 = vpop.f32.mrf.mxu2  ;;  %v1148_v28 = vpop.f32.mrf.mxu3 }
 0x204   : >> { %v1268_v18 = vadd.f32 %v4696_v24, %v1059_v8  ;;  %v1269_v56 = vadd.f32 %v4700_v2, %v1148_v28  ;;  %v884_v6 = vpop.f32.mrf.mxu0  ;;  %v973_v54 = vpop.f32.mrf.mxu1  ;;  %v1909_v27 = vunpack.c.l.b16 %v1728_v35  ;;  %v1910_v48 = vunpack.c.h.b16 %v1728_v35 }
 0x205   : >> { %v1270_v49 = vadd.f32 %v4635_v1, %v884_v6  ;;  %v1271_v43 = vadd.f32 %v4639_v26, %v973_v54  ;;  %v1907_v6 = vunpack.c.l.b16 %v1727_v33  ;;  %v1908_v54 = vunpack.c.h.b16 %v1727_v33 }
 0x206   : >> { %vm1396_vm12 = vcmp.gt.f32.partialorder %v1268_v18, 0.0  ;;  %v1524_v40 = vmul.f32 0.01, %v1268_v18  ;;  %vm1397_vm13 = vcmp.gt.f32.partialorder %v1269_v56, 0.0  ;;  %v1525_v22 = vmul.f32 0.01, %v1269_v56 }
 0x207   : >> { %vm1398_vm14 = vcmp.gt.f32.partialorder %v1270_v49, 0.0  ;;  %v1526_v13 = vmul.f32 0.01, %v1270_v49  ;;  %vm1399_vm15 = vcmp.gt.f32.partialorder %v1271_v43, 0.0  ;;  %v1527_v11 = vmul.f32 0.01, %v1271_v43  ;;  %2290 = vmatmul.bf16.gmra.mxu0 %v4615_v4  ;;  %2379 = vmatmul.bf16.gmra.mxu1 %v4617_v41 }
 0x208   : >> { %v1652_v38 = vsel %vm1396_vm12, %v1268_v18, %v1524_v40  ;;  %v1653_v31 = vsel %vm1397_vm13, %v1269_v56, %v1525_v22  ;;  %2468 = vmatmul.bf16.gmra.mxu2 %v4625_v30  ;;  %2557 = vmatmul.bf16.gmra.mxu3 %v4627_v23  ;;  %v4789_v7 = vpack.c.b16 %v1909_v27, %v1905_v21 }
 0x209   : >> { %v1729_v9 = vpack.c.bf16 %v1653_v31, %v1652_v38  ;;  %v1654_v3 = vsel %vm1398_vm14, %v1270_v49, %v1526_v13  ;;  %v1655_v57 = vsel %vm1399_vm15, %v1271_v43, %v1527_v11  ;;  %v4791_v29 = vpack.c.b16 %v1910_v48, %v1906_v34 }
 0x20a   : >> { %v1730_v35 = vpack.c.bf16 %v1655_v57, %v1654_v3 }
 0x20b   : >> { %v1062_v8 = vpop.f32.mrf.mxu2  ;;  %v1151_v28 = vpop.f32.mrf.mxu3  ;;  %v1911_v4 = vunpack.c.l.b16 %v1729_v9  ;;  %v1912_v41 = vunpack.c.h.b16 %v1729_v9 }
 0x20c   : >> { %v1272_v18 = vadd.f32 %v4654_v19, %v1062_v8  ;;  %v1273_v30 = vadd.f32 %v4658_v47, %v1151_v28  ;;  %v886_v56 = vpop.f32.mrf.mxu0  ;;  %v975_v23 = vpop.f32.mrf.mxu1 }
 0x20d   : >> { %v1274_v21 = vadd.f32 %v4662_v14, %v886_v56  ;;  %v1275_v27 = vadd.f32 %v4666_v45, %v975_v23  ;;  %v4797_v49 = vpack.c.b16 %v1911_v4, %v1907_v6  ;;  %v4799_v43 = vpack.c.b16 %v1912_v41, %v1908_v54 }
 0x20e   : >> { %vm1400_vm2 = vcmp.gt.f32.partialorder %v1272_v18, 0.0  ;;  %v1528_v34 = vmul.f32 0.01, %v1272_v18  ;;  %vm1401_vm0 = vcmp.gt.f32.partialorder %v1273_v30, 0.0  ;;  %v1529_v48 = vmul.f32 0.01, %v1273_v30 }
 0x20f   : >> { %vm1402_vm1 = vcmp.gt.f32.partialorder %v1274_v21, 0.0  ;;  %v1530_v33 = vmul.f32 0.01, %v1274_v21  ;;  %vm1403_vm3 = vcmp.gt.f32.partialorder %v1275_v27, 0.0  ;;  %v1531_v40 = vmul.f32 0.01, %v1275_v27 }
 0x210   : >> { %v1656_v22 = vsel %vm1400_vm2, %v1272_v18, %v1528_v34  ;;  %v1657_v13 = vsel %vm1401_vm0, %v1273_v30, %v1529_v48  ;;  %v1913_v23 = vunpack.c.l.b16 %v1730_v35 }
 0x211   : >> { %v1731_v11 = vpack.c.bf16 %v1657_v13, %v1656_v22  ;;  %v1658_v38 = vsel %vm1402_vm1, %v1274_v21, %v1530_v33  ;;  %v1659_v31 = vsel %vm1403_vm3, %v1275_v27, %v1531_v40  ;;  %v1914_v22 = vunpack.c.h.b16 %v1730_v35 }
 0x212   : >> { %v1732_v9 = vpack.c.bf16 %v1659_v31, %v1658_v38 }
 0x213   : >> { %v1064_v3 = vpop.f32.mrf.mxu2  ;;  %v1153_v57 = vpop.f32.mrf.mxu3 }
 0x214   : >> { %v1276_v8 = vadd.f32 %v4696_v24, %v1064_v3  ;;  %v1277_v28 = vadd.f32 %v4700_v2, %v1153_v57  ;;  %v889_v6 = vpop.f32.mrf.mxu0  ;;  %v978_v4 = vpop.f32.mrf.mxu1  ;;  %v1917_v54 = vunpack.c.l.b16 %v1732_v9  ;;  %v1918_v18 = vunpack.c.h.b16 %v1732_v9 }
 0x215   : >> { %v1278_v41 = vadd.f32 %v4635_v1, %v889_v6  ;;  %v1279_v56 = vadd.f32 %v4639_v26, %v978_v4 }
 0x216   : >> { %vm1404_vm4 = vcmp.gt.f32.partialorder %v1276_v8, 0.0  ;;  %v1532_v30 = vmul.f32 0.01, %v1276_v8  ;;  %vm1405_vm5 = vcmp.gt.f32.partialorder %v1277_v28, 0.0  ;;  %v1533_v21 = vmul.f32 0.01, %v1277_v28 }
 0x217   : >> { %vm1406_vm6 = vcmp.gt.f32.partialorder %v1278_v41, 0.0  ;;  %v1534_v27 = vmul.f32 0.01, %v1278_v41  ;;  %vm1407_vm7 = vcmp.gt.f32.partialorder %v1279_v56, 0.0  ;;  %v1535_v34 = vmul.f32 0.01, %v1279_v56  ;;  %2295 = vmatmul.bf16.gmra.mxu0 %v4647_v55  ;;  %2384 = vmatmul.bf16.gmra.mxu1 %v4649_v15 }
 0x218   : >> { %v1660_v48 = vsel %vm1404_vm4, %v1276_v8, %v1532_v30  ;;  %v1661_v33 = vsel %vm1405_vm5, %v1277_v28, %v1533_v21  ;;  %2473 = vmatmul.bf16.gmra.mxu2 %v4669_v16  ;;  %2562 = vmatmul.bf16.gmra.mxu3 %v4671_v37  ;;  %v4809_v40 = vpack.c.b16 %v1917_v54, %v1913_v23  ;;  %v1915_v55 = vunpack.c.l.b16 %v1731_v11 }
 0x219   : >> { %v1733_v13 = vpack.c.bf16 %v1661_v33, %v1660_v48  ;;  %v1662_v38 = vsel %vm1406_vm6, %v1278_v41, %v1534_v27  ;;  %v1663_v31 = vsel %vm1407_vm7, %v1279_v56, %v1535_v34  ;;  %v4811_v3 = vpack.c.b16 %v1918_v18, %v1914_v22 }
 0x21a   : >> { %v1734_v9 = vpack.c.bf16 %v1663_v31, %v1662_v38  ;;  %v1916_v15 = vunpack.c.h.b16 %v1731_v11 }
 0x21b   : >> { %v1067_v57 = vpop.f32.mrf.mxu2  ;;  %v1156_v6 = vpop.f32.mrf.mxu3  ;;  %v1919_v4 = vunpack.c.l.b16 %v1733_v13  ;;  %v1920_v8 = vunpack.c.h.b16 %v1733_v13 }
 0x21c   : >> { %v1280_v28 = vadd.f32 %v4654_v19, %v1067_v57  ;;  %v1281_v16 = vadd.f32 %v4658_v47, %v1156_v6  ;;  %v891_v37 = vpop.f32.mrf.mxu0  ;;  %v980_v54 = vpop.f32.mrf.mxu1 }
 0x21d   : >> { %v1282_v35 = vadd.f32 %v4662_v14, %v891_v37  ;;  %v1283_v41 = vadd.f32 %v4666_v45, %v980_v54  ;;  %v4817_v56 = vpack.c.b16 %v1919_v4, %v1915_v55  ;;  %v4819_v23 = vpack.c.b16 %v1920_v8, %v1916_v15 }
 0x21e   : >> { %vm1408_vm8 = vcmp.gt.f32.partialorder %v1280_v28, 0.0  ;;  %v1536_v18 = vmul.f32 0.01, %v1280_v28  ;;  %vm1409_vm9 = vcmp.gt.f32.partialorder %v1281_v16, 0.0  ;;  %v1537_v30 = vmul.f32 0.01, %v1281_v16 }
 0x21f   : >> { %vm1410_vm10 = vcmp.gt.f32.partialorder %v1282_v35, 0.0  ;;  %v1538_v11 = vmul.f32 0.01, %v1282_v35  ;;  %vm1411_vm11 = vcmp.gt.f32.partialorder %v1283_v41, 0.0  ;;  %v1539_v21 = vmul.f32 0.01, %v1283_v41 }
 0x220   : >> { %v1664_v27 = vsel %vm1408_vm8, %v1280_v28, %v1536_v18  ;;  %v1665_v34 = vsel %vm1409_vm9, %v1281_v16, %v1537_v30  ;;  %v1921_v15 = vunpack.c.l.b16 %v1734_v9 }
 0x221   : >> { %v1735_v48 = vpack.c.bf16 %v1665_v34, %v1664_v27  ;;  %v1666_v33 = vsel %vm1410_vm10, %v1282_v35, %v1538_v11  ;;  %v1667_v22 = vsel %vm1411_vm11, %v1283_v41, %v1539_v21 }
 0x222   : >> { %v1736_v13 = vpack.c.bf16 %v1667_v22, %v1666_v33 }
 0x223   : >> { %v1069_v38 = vpop.f32.mrf.mxu2  ;;  %v1158_v31 = vpop.f32.mrf.mxu3 }
 0x224   : >> { %v1284_v57 = vadd.f32 %v4696_v24, %v1069_v38  ;;  %v1285_v6 = vadd.f32 %v4700_v2, %v1158_v31  ;;  %v894_v55 = vpop.f32.mrf.mxu0  ;;  %v983_v4 = vpop.f32.mrf.mxu1  ;;  %v1925_v54 = vunpack.c.l.b16 %v1736_v13  ;;  %v1926_v28 = vunpack.c.h.b16 %v1736_v13 }
 0x225   : >> { %v1286_v8 = vadd.f32 %v4635_v1, %v894_v55  ;;  %v1287_v37 = vadd.f32 %v4639_v26, %v983_v4  ;;  %v1922_v1 = vunpack.c.h.b16 %v1734_v9 }
 0x226   : >> { %vm1412_vm12 = vcmp.gt.f32.partialorder %v1284_v57, 0.0  ;;  %v1540_v16 = vmul.f32 0.01, %v1284_v57  ;;  %vm1413_vm13 = vcmp.gt.f32.partialorder %v1285_v6, 0.0  ;;  %v1541_v35 = vmul.f32 0.01, %v1285_v6 }
 0x227   : >> { %vm1414_vm14 = vcmp.gt.f32.partialorder %v1286_v8, 0.0  ;;  %v1542_v41 = vmul.f32 0.01, %v1286_v8  ;;  %vm1415_vm15 = vcmp.gt.f32.partialorder %v1287_v37, 0.0  ;;  %v1543_v18 = vmul.f32 0.01, %v1287_v37  ;;  %2300 = vmatmul.bf16.gmra.mxu0 %v4683_v17  ;;  %2389 = vmatmul.bf16.gmra.mxu1 %v4685_v44 }
 0x228   : >> { %v1668_v30 = vsel %vm1412_vm12, %v1284_v57, %v1540_v16  ;;  %v1669_v11 = vsel %vm1413_vm13, %v1285_v6, %v1541_v35  ;;  %2478 = vmatmul.bf16.gmra.mxu2 %v4691_v59  ;;  %2567 = vmatmul.bf16.gmra.mxu3 %v4693_v51  ;;  %v4829_v34 = vpack.c.b16 %v1925_v54, %v1921_v15  ;;  %v1923_v17 = vunpack.c.l.b16 %v1735_v48 }
 0x229   : >> { %v1737_v26 = vpack.c.bf16 %v1669_v11, %v1668_v30  ;;  %v1670_v21 = vsel %vm1414_vm14, %v1286_v8, %v1542_v41  ;;  %v1671_v27 = vsel %vm1415_vm15, %v1287_v37, %v1543_v18  ;;  %v4831_v22 = vpack.c.b16 %v1926_v28, %v1922_v1 }
 0x22a   : >> { %v1738_v33 = vpack.c.bf16 %v1671_v27, %v1670_v21  ;;  %v1924_v44 = vunpack.c.h.b16 %v1735_v48  ;;  %vm2884_vm13 = vcmask 1041409  }
 0x22b   : >> { %v1072_v13 = vpop.f32.mrf.mxu2  ;;  %v1161_v38 = vpop.f32.mrf.mxu3  ;;  %v1927_v31 = vunpack.c.l.b16 %v1737_v26  ;;  %v1928_v57 = vunpack.c.h.b16 %v1737_v26 }
 0x22c   : >> { %v1288_v6 = vadd.f32 %v4654_v19, %v1072_v13  ;;  %v1289_v59 = vadd.f32 %v4658_v47, %v1161_v38  ;;  %v896_v51 = vpop.f32.mrf.mxu0  ;;  %v985_v9 = vpop.f32.mrf.mxu1 }
 0x22d   : >> { %v1290_v55 = vadd.f32 %v4662_v14, %v896_v51  ;;  %v1291_v4 = vadd.f32 %v4666_v45, %v985_v9  ;;  %v4837_v15 = vpack.c.b16 %v1927_v31, %v1923_v17  ;;  %v4839_v8 = vpack.c.b16 %v1928_v57, %v1924_v44  ;;  %v5260_v14 = vld [vmem:[#allocation106_spill] sm:$0xff] }
 0x22e   : >> { %vm1416_vm2 = vcmp.gt.f32.partialorder %v1288_v6, 0.0  ;;  %v1544_v37 = vmul.f32 0.01, %v1288_v6  ;;  %vm1417_vm0 = vcmp.gt.f32.partialorder %v1289_v59, 0.0  ;;  %v1545_v54 = vmul.f32 0.01, %v1289_v59 }
 0x22f   : >> { %vm1418_vm1 = vcmp.gt.f32.partialorder %v1290_v55, 0.0  ;;  %v1546_v48 = vmul.f32 0.01, %v1290_v55  ;;  %vm1419_vm3 = vcmp.gt.f32.partialorder %v1291_v4, 0.0  ;;  %v1547_v19 = vmul.f32 0.01, %v1291_v4 }
 0x230   : >> { %v1672_v28 = vsel %vm1416_vm2, %v1288_v6, %v1544_v37  ;;  %v1673_v47 = vsel %vm1417_vm0, %v1289_v59, %v1545_v54  ;;  %v4842_v18 = vperm.slane %v5260_v14, 0  ;;  %v1929_v31 = vunpack.c.l.b16 %v1738_v33 }
 0x231   : >> { %v1739_v16 = vpack.c.bf16 %v1673_v47, %v1672_v28  ;;  %v1674_v35 = vsel %vm1418_vm1, %v1290_v55, %v1546_v48  ;;  %v1675_v41 = vsel %vm1419_vm3, %v1291_v4, %v1547_v19  ;;  %v1930_v44 = vunpack.c.h.b16 %v1738_v33 }
 0x232   : >> { %v1740_v45 = vpack.c.bf16 %v1675_v41, %v1674_v35  ;;  %v2709_v55 = vlaneseq  ;;  %vm2886_vm2 = vcmask 1042434   ;;  %vm2888_vm1 = vcmask 1043459  }
 0x233   : >> { %v1074_v30 = vpop.f32.mrf.mxu2  ;;  %v1163_v11 = vpop.f32.mrf.mxu3  ;;  %v1931_v54 = vunpack.c.l.b16 %v1739_v16 }
 0x234   : >> { %v1292_v1 = vadd.f32 %v4696_v24, %v1074_v30  ;;  %v1293_v26 = vadd.f32 %v4700_v2, %v1163_v11  ;;  %v2266_v21 = vpop.f32.mrf.mxu0  ;;  %v2355_v27 = vpop.f32.mrf.mxu1  ;;  %v1933_v13 = vunpack.c.l.b16 %v1740_v45  ;;  %v1934_v38 = vunpack.c.h.b16 %v1740_v45 }
 0x235   : >> { %v2267_v17 = vadd.f32 %v2266_v21, %v4842_v18  ;;  %v2710_v14 = vshrl.u32 %v2709_v55, 7  ;;  %v2712_v30 = vstv %s4202_s20 }
 0x236   : >> { %vm1420_vm4 = vcmp.gt.f32.partialorder %v1292_v1, 0.0  ;;  %v1548_v57 = vmul.f32 0.01, %v1292_v1  ;;  %vm1421_vm5 = vcmp.gt.f32.partialorder %v1293_v26, 0.0  ;;  %v1549_v6 = vmul.f32 0.01, %v1293_v26 }
 0x237   : >> { %v2356_v59 = vadd.f32 %v2355_v27, %v2267_v17  ;;  %2305 = vmatmul.bf16.gmra.mxu0 %v4709_v5  ;;  %2394 = vmatmul.bf16.gmra.mxu1 %v4711_v36  ;;  %v4849_v24 = vpack.c.b16 %v1933_v13, %v1929_v31  ;;  %v4851_v2 = vpack.c.b16 %v1934_v38, %v1930_v44  ;;  %v1932_v5 = vunpack.c.h.b16 %v1739_v16 }
 0x238   : >> { %v1676_v51 = vsel %vm1420_vm4, %v1292_v1, %v1548_v57  ;;  %v1677_v9 = vsel %vm1421_vm5, %v1293_v26, %v1549_v6  ;;  %2483 = vmatmul.bf16.gmra.mxu2 %v4717_v25  ;;  %2572 = vmatmul.bf16.gmra.mxu3 %v4719_v20  ;;  %v2711_v11 = vadd.s32 8, %v2710_v14  ;;  %v2713_v1 = vadd.s32 %v2712_v30, %v2710_v14 }
 0x239   : >> { %v1741_v33 = vpack.c.bf16 %v1677_v9, %v1676_v51  ;;  %v2715_v27 = vstv %s4000_s16 }
 0x23a   : >> { %v2714_v38 = vadd.s32 %v2712_v30, %v2711_v11  ;;  %vm4863_vm7 = vcmp.lt.s32.totalorder %v2713_v1, %v2715_v27 }
 0x23b   : >> { %v2444_v4 = vpop.f32.mrf.mxu2  ;;  %v2533_v37 = vpop.f32.mrf.mxu3  ;;  %v1935_v48 = vunpack.c.l.b16 %v1741_v33  ;;  %v1936_v19 = vunpack.c.h.b16 %v1741_v33 }
 0x23c   : >> { %v2445_v36 = vadd.f32 %v2444_v4, %v2356_v59  ;;  %v2268_v28 = vpop.f32.mrf.mxu0  ;;  %v2357_v47 = vpop.f32.mrf.mxu1  ;;  %vm4869_vm9 = vcmp.lt.s32.totalorder %v2714_v38, %v2715_v27 }
 0x23d   : >> { %v2269_v35 = vadd.f32 %v2268_v28, %v4842_v18  ;;  %v4856_v41 = vpack.c.b16 %v1935_v48, %v1931_v54  ;;  %v4858_v25 = vpack.c.b16 %v1936_v19, %v1932_v5 }
 0x23e   : >> { %v2534_v20 = vadd.f32 %v2533_v37, %v2445_v36 }
 0x23f   : >> { %v2358_v45 = vadd.f32 %v2357_v47, %v2269_v35 }
 0x240   : >> { %v2645_v16 = vmul.f32 0.01, %v2534_v20  ;;  %vm2613_vm6 = vcmp.gt.f32.partialorder %v2534_v20, 0.0 }
 0x242   : >> { %v2677_v51 = vsel %vm2613_vm6, %v2534_v20, %v2645_v16 }
 0x243   : >> { %v2446_v26 = vpop.f32.mrf.mxu2  ;;  %v2535_v21 = vpop.f32.mrf.mxu3  ;;  %v2722_v4 = vsel %vm4863_vm7, %v2677_v51, -inf }
 0x244   : >> { %v2447_v13 = vadd.f32 %v2446_v26, %v2358_v45  ;;  %v2271_v17 = vpop.f32.mrf.mxu0  ;;  %v2360_v31 = vpop.f32.mrf.mxu1 }
 0x245   : >> { %v2272_v44 = vadd.f32 %v2271_v17, %v4842_v18 }
 0x246   : >> { %v2536_v57 = vadd.f32 %v2535_v21, %v2447_v13 }
 0x247   : >> { %v2361_v59 = vadd.f32 %v2360_v31, %v2272_v44  ;;  %2310 = vmatmul.bf16.gmra.mxu0 %v4729_v10  ;;  %2399 = vmatmul.bf16.gmra.mxu1 %v4731_v32 }
 0x248   : >> { %vm2614_vm8 = vcmp.gt.f32.partialorder %v2536_v57, 0.0  ;;  %v2646_v9 = vmul.f32 0.01, %v2536_v57  ;;  %2488 = vmatmul.bf16.gmra.mxu2 %v4737_v50  ;;  %2577 = vmatmul.bf16.gmra.mxu3 %v4739_v46 }
 0x24a   : >> { %v2678_v55 = vsel %vm2614_vm8, %v2536_v57, %v2646_v9 }
 0x24b   : >> { %v2723_v10 = vsel %vm4869_vm9, %v2678_v55, -inf  ;;  %v2449_v37 = vpop.f32.mrf.mxu2  ;;  %v2538_v32 = vpop.f32.mrf.mxu3 }
 0x24c   : >> { %v2756_v54 = vmax.f32 %v2722_v4, %v2723_v10  ;;  %v2450_v48 = vadd.f32 %v2449_v37, %v2361_v59  ;;  %v2273_v5 = vpop.f32.mrf.mxu0  ;;  %v2362_v19 = vpop.f32.mrf.mxu1 }
 0x24d   : >> { %v2274_v36 = vadd.f32 %v2273_v5, %v4842_v18 }
 0x24e   : >> { %v2539_v28 = vadd.f32 %v2538_v32, %v2450_v48  ;;  %v2757_v50 = vrot.slane %v2756_v54, 4 }
 0x24f   : >> { %v2363_v47 = vadd.f32 %v2362_v19, %v2274_v36 }
 0x250   : >> { %v2647_v20 = vmul.f32 0.01, %v2539_v28  ;;  %vm2615_vm10 = vcmp.gt.f32.partialorder %v2539_v28, 0.0  ;;  %v2758_v26 = vmax.f32 %v2756_v54, %v2757_v50 }
 0x252   : >> { %v2679_v16 = vsel %vm2615_vm10, %v2539_v28, %v2647_v20  ;;  %v2759_v38 = vrot.slane %v2758_v26, 2 }
 0x253   : >> { %v2451_v35 = vpop.f32.mrf.mxu2  ;;  %v2540_v46 = vpop.f32.mrf.mxu3  ;;  %v2724_v17 = vsel %vm4863_vm7, %v2679_v16, -inf }
 0x254   : >> { %v2452_v14 = vadd.f32 %v2451_v35, %v2363_v47  ;;  %v2276_v45 = vpop.f32.mrf.mxu0  ;;  %v2365_v30 = vpop.f32.mrf.mxu1  ;;  %v2760_v4 = vmax.f32 %v2758_v26, %v2759_v38 }
 0x255   : >> { %v2277_v11 = vadd.f32 %v2276_v45, %v4842_v18 }
 0x256   : >> { %v2541_v1 = vadd.f32 %v2540_v46, %v2452_v14  ;;  %v2761_v32 = vrot.slane %v2760_v4, 1 }
 0x257   : >> { %v2366_v21 = vadd.f32 %v2365_v30, %v2277_v11  ;;  %2315 = vmatmul.bf16.gmra.mxu0 %v4749_v53  ;;  %2404 = vmatmul.bf16.gmra.mxu1 %v4751_v58 }
 0x258   : >> { %vm2616_vm11 = vcmp.gt.f32.partialorder %v2541_v1, 0.0  ;;  %v2648_v27 = vmul.f32 0.01, %v2541_v1  ;;  %2493 = vmatmul.bf16.gmra.mxu2 %v4757_v60  ;;  %2582 = vmatmul.bf16.gmra.mxu3 %v4759_v39  ;;  %v2762_v20 = vmax.f32 %v2760_v4, %v2761_v32 }
 0x25a   : >> { %v2680_v13 = vsel %vm2616_vm11, %v2541_v1, %v2648_v27 }
 0x25b   : >> { %v2725_v31 = vsel %vm4869_vm9, %v2680_v13, -inf  ;;  %v2454_v44 = vpop.f32.mrf.mxu2  ;;  %v2543_v57 = vpop.f32.mrf.mxu3 }
 0x25c   : >> { %v2763_v53 = vmax.f32 %v2724_v17, %v2725_v31  ;;  %v2455_v59 = vadd.f32 %v2454_v44, %v2366_v21  ;;  %v2278_v58 = vpop.f32.mrf.mxu0  ;;  %v2367_v51 = vpop.f32.mrf.mxu1 }
 0x25d   : >> { %v2279_v9 = vadd.f32 %v2278_v58, %v4842_v18 }
 0x25e   : >> { %v2764_v55 = vrot.slane %v2763_v53, 4  ;;  %v2544_v60 = vadd.f32 %v2543_v57, %v2455_v59 }
 0x25f   : >> { %v2368_v39 = vadd.f32 %v2367_v51, %v2279_v9 }
 0x260   : >> { %v2765_v10 = vmax.f32 %v2763_v53, %v2764_v55  ;;  %v2649_v19 = vmul.f32 0.01, %v2544_v60  ;;  %vm2617_vm12 = vcmp.gt.f32.partialorder %v2544_v60, 0.0 }
 0x262   : >> { %v2766_v37 = vrot.slane %v2765_v10, 2  ;;  %v2681_v30 = vsel %vm2617_vm12, %v2544_v60, %v2649_v19 }
 0x263   : >> { %v2456_v54 = vpop.f32.mrf.mxu2  ;;  %v2545_v48 = vpop.f32.mrf.mxu3  ;;  %v2726_v21 = vsel %vm4863_vm7, %v2681_v30, -inf }
 0x264   : >> { %v2767_v5 = vmax.f32 %v2765_v10, %v2766_v37  ;;  %v2457_v36 = vadd.f32 %v2456_v54, %v2368_v39  ;;  %v2281_v28 = vpop.f32.mrf.mxu0  ;;  %v2370_v47 = vpop.f32.mrf.mxu1 }
 0x265   : >> { %v2282_v50 = vadd.f32 %v2281_v28, %v4842_v18 }
 0x266   : >> { %v2768_v35 = vrot.slane %v2767_v5, 1  ;;  %v2546_v46 = vadd.f32 %v2545_v48, %v2457_v36 }
 0x267   : >> { %v2371_v14 = vadd.f32 %v2370_v47, %v2282_v50  ;;  %2320 = vmatmul.bf16.gmra.mxu0 %v4769_v52  ;;  %2409 = vmatmul.bf16.gmra.mxu1 %v4771_v12 }
 0x268   : >> { %v2769_v45 = vmax.f32 %v2767_v5, %v2768_v35  ;;  %vm2618_vm14 = vcmp.gt.f32.partialorder %v2546_v46, 0.0  ;;  %v2650_v11 = vmul.f32 0.01, %v2546_v46  ;;  %2498 = vmatmul.bf16.gmra.mxu2 %v4777_v0  ;;  %2587 = vmatmul.bf16.gmra.mxu3 %v4779_v42 }
 0x26a   : >> { %v2885_v1 = vsel %vm2884_vm13, %v2769_v45, %v2762_v20  ;;  %v2682_v26 = vsel %vm2618_vm14, %v2546_v46, %v2650_v11  ;;  %vm2890_vm14 = vcmask 1044484  }
 0x26b   : >> { %v2727_v16 = vsel %vm4869_vm9, %v2682_v26, -inf  ;;  %v2459_v52 = vpop.f32.mrf.mxu2  ;;  %v2548_v27 = vpop.f32.mrf.mxu3 }
 0x26c   : >> { %v2770_v12 = vmax.f32 %v2726_v21, %v2727_v16  ;;  %v2460_v13 = vadd.f32 %v2459_v52, %v2371_v14  ;;  %v2283_v38 = vpop.f32.mrf.mxu0  ;;  %v2372_v17 = vpop.f32.mrf.mxu1 }
 0x26d   : >> { %v2284_v0 = vadd.f32 %v2283_v38, %v4842_v18 }
 0x26e   : >> { %v2771_v31 = vrot.slane %v2770_v12, 4  ;;  %v2549_v44 = vadd.f32 %v2548_v27, %v2460_v13 }
 0x26f   : >> { %v2373_v53 = vadd.f32 %v2372_v17, %v2284_v0 }
 0x270   : >> { %v2772_v42 = vmax.f32 %v2770_v12, %v2771_v31  ;;  %v2651_v9 = vmul.f32 0.01, %v2549_v44  ;;  %vm2619_vm15 = vcmp.gt.f32.partialorder %v2549_v44, 0.0 }
 0x272   : >> { %v2773_v57 = vrot.slane %v2772_v42, 2  ;;  %v2683_v32 = vsel %vm2619_vm15, %v2549_v44, %v2651_v9  ;;  %vm2892_vm15 = vcmask 1045509  }
 0x273   : >> { %v2461_v59 = vpop.f32.mrf.mxu2  ;;  %v2550_v58 = vpop.f32.mrf.mxu3  ;;  %v2728_v19 = vsel %vm4863_vm7, %v2683_v32, -inf }
 0x274   : >> { %v2774_v51 = vmax.f32 %v2772_v42, %v2773_v57  ;;  %v2462_v55 = vadd.f32 %v2461_v59, %v2373_v53  ;;  %v2286_v60 = vpop.f32.mrf.mxu0  ;;  %v2375_v4 = vpop.f32.mrf.mxu1 }
 0x276   : >> { %v2775_v39 = vrot.slane %v2774_v51, 1  ;;  %v2551_v10 = vadd.f32 %v2550_v58, %v2462_v55 }
 0x277   : >> { %2325 = vmatmul.bf16.gmra.mxu0 %v4789_v7  ;;  %2414 = vmatmul.bf16.gmra.mxu1 %v4791_v29 }
 0x278   : >> { %v2776_v37 = vmax.f32 %v2774_v51, %v2775_v39  ;;  %vm2620_vm0 = vcmp.gt.f32.partialorder %v2551_v10, 0.0  ;;  %v2652_v54 = vmul.f32 0.01, %v2551_v10  ;;  %2503 = vmatmul.bf16.gmra.mxu2 %v4797_v49  ;;  %2592 = vmatmul.bf16.gmra.mxu3 %v4799_v43 }
 0x27a   : >> { %v2887_v48 = vsel %vm2886_vm2, %v2776_v37, %v2885_v1  ;;  %v2684_v5 = vsel %vm2620_vm0, %v2551_v10, %v2652_v54 }
 0x27b   : >> { %v2729_v36 = vsel %vm4869_vm9, %v2684_v5, -inf  ;;  %v2464_v7 = vpop.f32.mrf.mxu2  ;;  %v2553_v28 = vpop.f32.mrf.mxu3 }
 0x27c   : >> { %v2777_v29 = vmax.f32 %v2728_v19, %v2729_v36  ;;  %v2288_v47 = vpop.f32.mrf.mxu0  ;;  %v2377_v50 = vpop.f32.mrf.mxu1 }
 0x27d   : >> { %v2289_v12 = vadd.f32 %v2288_v47, %v4842_v18 }
 0x27e   : >> { %v2778_v35 = vrot.slane %v2777_v29, 4 }
 0x280   : >> { %v2779_v46 = vmax.f32 %v2777_v29, %v2778_v35 }
 0x282   : >> { %v2780_v20 = vrot.slane %v2779_v46, 2 }
 0x283   : >> { %v2466_v49 = vpop.f32.mrf.mxu2  ;;  %v2555_v14 = vpop.f32.mrf.mxu3 }
 0x284   : >> { %v2781_v43 = vmax.f32 %v2779_v46, %v2780_v20  ;;  %v2291_v45 = vpop.f32.mrf.mxu0  ;;  %v2380_v30 = vpop.f32.mrf.mxu1 }
 0x286   : >> { %v2782_v11 = vrot.slane %v2781_v43, 1 }
 0x287   : >> { %2330 = vmatmul.bf16.gmra.mxu0 %v4809_v40  ;;  %2419 = vmatmul.bf16.gmra.mxu1 %v4811_v3  ;;  %v2287_v3 = vadd.f32 %v2286_v60, %v4842_v18 }
 0x288   : >> { %v2783_v1 = vmax.f32 %v2781_v43, %v2782_v11  ;;  %2508 = vmatmul.bf16.gmra.mxu2 %v4817_v56  ;;  %2597 = vmatmul.bf16.gmra.mxu3 %v4819_v23  ;;  %v2292_v56 = vadd.f32 %v2291_v45, %v4842_v18  ;;  %v2378_v23 = vadd.f32 %v2377_v50, %v2289_v12 }
 0x289   : >> { %v2376_v42 = vadd.f32 %v2375_v4, %v2287_v3 }
 0x28a   : >> { %v4915_v26 = vsel %vm2888_vm1, %v2783_v1, %v2887_v48  ;;  %v2467_v57 = vadd.f32 %v2466_v49, %v2378_v23  ;;  %v2381_v53 = vadd.f32 %v2380_v30, %v2292_v56 }
 0x28b   : >> { %v2469_v21 = vpop.f32.mrf.mxu2  ;;  %v2558_v16 = vpop.f32.mrf.mxu3  ;;  %v2465_v58 = vadd.f32 %v2464_v7, %v2376_v42 }
 0x28c   : >> { %v2293_v52 = vpop.f32.mrf.mxu0  ;;  %v2382_v27 = vpop.f32.mrf.mxu1  ;;  %v2470_v51 = vadd.f32 %v2469_v21, %v2381_v53  ;;  %v2556_v39 = vadd.f32 %v2555_v14, %v2467_v57 }
 0x28d   : >> { %v2294_v13 = vadd.f32 %v2293_v52, %v4842_v18  ;;  %v2554_v54 = vadd.f32 %v2553_v28, %v2465_v58 }
 0x28e   : >> { %v2559_v4 = vadd.f32 %v2558_v16, %v2470_v51  ;;  %v2654_v48 = vmul.f32 0.01, %v2556_v39  ;;  %vm2622_vm3 = vcmp.gt.f32.partialorder %v2556_v39, 0.0 }
 0x28f   : >> { %v2383_v44 = vadd.f32 %v2382_v27, %v2294_v13  ;;  %v2653_v5 = vmul.f32 0.01, %v2554_v54  ;;  %vm2621_vm5 = vcmp.gt.f32.partialorder %v2554_v54, 0.0 }
 0x290   : >> { %v2655_v36 = vmul.f32 0.01, %v2559_v4  ;;  %v2686_v47 = vsel %vm2622_vm3, %v2556_v39, %v2654_v48  ;;  %vm2623_vm6 = vcmp.gt.f32.partialorder %v2559_v4, 0.0  ;;  %vm2894_vm3 = vcmask 1046534  }
 0x291   : >> { %v2685_v49 = vsel %vm2621_vm5, %v2554_v54, %v2653_v5  ;;  %v2731_v45 = vsel %vm4869_vm9, %v2686_v47, -inf }
 0x292   : >> { %v2687_v30 = vsel %vm2623_vm6, %v2559_v4, %v2655_v36  ;;  %v2730_v21 = vsel %vm4863_vm7, %v2685_v49, -inf }
 0x293   : >> { %v2471_v38 = vpop.f32.mrf.mxu2  ;;  %v2560_v40 = vpop.f32.mrf.mxu3  ;;  %v2784_v52 = vmax.f32 %v2730_v21, %v2731_v45  ;;  %v2732_v27 = vsel %vm4863_vm7, %v2687_v30, -inf }
 0x294   : >> { %v2296_v17 = vpop.f32.mrf.mxu0  ;;  %v2385_v31 = vpop.f32.mrf.mxu1  ;;  %v2472_v59 = vadd.f32 %v2471_v38, %v2383_v44 }
 0x295   : >> { %v2297_v0 = vadd.f32 %v2296_v17, %v4842_v18  ;;  %v2785_v56 = vrot.slane %v2784_v52, 4 }
 0x296   : >> { %v2561_v32 = vadd.f32 %v2560_v40, %v2472_v59 }
 0x297   : >> { %2335 = vmatmul.bf16.gmra.mxu0 %v4829_v34  ;;  %2424 = vmatmul.bf16.gmra.mxu1 %v4831_v22  ;;  %v2386_v9 = vadd.f32 %v2385_v31, %v2297_v0  ;;  %v2786_v57 = vmax.f32 %v2784_v52, %v2785_v56 }
 0x298   : >> { %2513 = vmatmul.bf16.gmra.mxu2 %v4837_v15  ;;  %2602 = vmatmul.bf16.gmra.mxu3 %v4839_v8  ;;  %v2656_v15 = vmul.f32 0.01, %v2561_v32  ;;  %vm2624_vm4 = vcmp.gt.f32.partialorder %v2561_v32, 0.0 }
 0x29a   : >> { %v2688_v28 = vsel %vm2624_vm4, %v2561_v32, %v2656_v15  ;;  %v2787_v32 = vrot.slane %v2786_v57, 2  ;;  %vm2896_vm4 = vcmask 1047559  }
 0x29b   : >> { %v2474_v55 = vpop.f32.mrf.mxu2  ;;  %v2563_v60 = vpop.f32.mrf.mxu3  ;;  %v2733_v11 = vsel %vm4869_vm9, %v2688_v28, -inf }
 0x29c   : >> { %v2298_v10 = vpop.f32.mrf.mxu0  ;;  %v2387_v37 = vpop.f32.mrf.mxu1  ;;  %v2475_v34 = vadd.f32 %v2474_v55, %v2386_v9 }
 0x29d   : >> { %v2299_v22 = vadd.f32 %v2298_v10, %v4842_v18 }
 0x29e   : >> { %v2564_v8 = vadd.f32 %v2563_v60, %v2475_v34 }
 0x29f   : >> { %v2388_v19 = vadd.f32 %v2387_v37, %v2299_v22 }
 0x2a0   : >> { %v2657_v20 = vmul.f32 0.01, %v2564_v8  ;;  %vm2625_vm8 = vcmp.gt.f32.partialorder %v2564_v8, 0.0 }
 0x2a2   : >> { %v2689_v16 = vsel %vm2625_vm8, %v2564_v8, %v2657_v20  ;;  %v2788_v8 = vmax.f32 %v2786_v57, %v2787_v32 }
 0x2a3   : >> { %v2476_v7 = vpop.f32.mrf.mxu2  ;;  %v2565_v29 = vpop.f32.mrf.mxu3 }
 0x2a4   : >> { %v2477_v50 = vadd.f32 %v2476_v7, %v2388_v19  ;;  %v2301_v35 = vpop.f32.mrf.mxu0  ;;  %v2390_v46 = vpop.f32.mrf.mxu1 }
 0x2a5   : >> { %v2302_v43 = vadd.f32 %v2301_v35, %v4842_v18 }
 0x2a6   : >> { %v2566_v14 = vadd.f32 %v2565_v29, %v2477_v50 }
 0x2a7   : >> { %2340 = vmatmul.bf16.gmra.mxu0 %v4849_v24  ;;  %2429 = vmatmul.bf16.gmra.mxu1 %v4851_v2  ;;  %v2391_v12 = vadd.f32 %v2390_v46, %v2302_v43  ;;  %v2791_v2 = vmax.f32 %v2732_v27, %v2733_v11 }
 0x2a8   : >> { %vm2626_vm10 = vcmp.gt.f32.partialorder %v2566_v14, 0.0  ;;  %v2658_v1 = vmul.f32 0.01, %v2566_v14  ;;  %2518 = vmatmul.bf16.gmra.mxu2 %v4856_v41  ;;  %2607 = vmatmul.bf16.gmra.mxu3 %v4858_v25  ;;  %v2734_v41 = vsel %vm4863_vm7, %v2689_v16, -inf }
 0x2a9   : >> { %v2792_v44 = vrot.slane %v2791_v2, 4 }
 0x2aa   : >> { %v2690_v24 = vsel %vm2626_vm10, %v2566_v14, %v2658_v1  ;;  %v2789_v14 = vrot.slane %v2788_v8, 1 }
 0x2ab   : >> { %v2735_v13 = vsel %vm4869_vm9, %v2690_v24, -inf  ;;  %v2479_v38 = vpop.f32.mrf.mxu2  ;;  %v2568_v40 = vpop.f32.mrf.mxu3  ;;  %v2793_v59 = vmax.f32 %v2791_v2, %v2792_v44 }
 0x2ac   : >> { %v2480_v25 = vadd.f32 %v2479_v38, %v2391_v12  ;;  %v2303_v3 = vpop.f32.mrf.mxu0  ;;  %v2392_v17 = vpop.f32.mrf.mxu1  ;;  %v2798_v31 = vmax.f32 %v2734_v41, %v2735_v13  ;;  %v2790_v16 = vmax.f32 %v2788_v8, %v2789_v14 }
 0x2ad   : >> { %v2304_v23 = vadd.f32 %v2303_v3, %v4842_v18  ;;  %v2794_v54 = vrot.slane %v2793_v59, 2 }
 0x2ae   : >> { %v2569_v0 = vadd.f32 %v2568_v40, %v2480_v25  ;;  %v2799_v42 = vrot.slane %v2798_v31, 4 }
 0x2af   : >> { %v2393_v53 = vadd.f32 %v2392_v17, %v2304_v23  ;;  %v2795_v19 = vmax.f32 %v2793_v59, %v2794_v54  ;;  %v2891_v17 = vsel %vm2890_vm14, %v2790_v16, %v4915_v26 }
 0x2b0   : >> { %v2659_v9 = vmul.f32 0.01, %v2569_v0  ;;  %v2800_v10 = vmax.f32 %v2798_v31, %v2799_v42  ;;  %vm2627_vm11 = vcmp.gt.f32.partialorder %v2569_v0, 0.0 }
 0x2b1   : >> { %v2796_v30 = vrot.slane %v2795_v19, 1 }
 0x2b2   : >> { %v2691_v4 = vsel %vm2627_vm11, %v2569_v0, %v2659_v9  ;;  %v2801_v15 = vrot.slane %v2800_v10, 2  ;;  %v2754_v0 = vld [vmem:[#allocation2] sm:$0xff] }
 0x2b3   : >> { %v2481_v58 = vpop.f32.mrf.mxu2  ;;  %v2570_v51 = vpop.f32.mrf.mxu3  ;;  %v2736_v36 = vsel %vm4863_vm7, %v2691_v4, -inf  ;;  %v2797_v27 = vmax.f32 %v2795_v19, %v2796_v30 }
 0x2b4   : >> { %v2482_v55 = vadd.f32 %v2481_v58, %v2393_v53  ;;  %v2306_v60 = vpop.f32.mrf.mxu0  ;;  %v2395_v39 = vpop.f32.mrf.mxu1  ;;  %v2802_v20 = vmax.f32 %v2800_v10, %v2801_v15 }
 0x2b5   : >> { %v2307_v37 = vadd.f32 %v2306_v60, %v4842_v18  ;;  %v2893_v23 = vsel %vm2892_vm15, %v2797_v27, %v2891_v17 }
 0x2b6   : >> { %v2571_v34 = vadd.f32 %v2570_v51, %v2482_v55  ;;  %v2803_v21 = vrot.slane %v2802_v20, 1 }
 0x2b7   : >> { %v2396_v22 = vadd.f32 %v2395_v39, %v2307_v37 }
 0x2b8   : >> { %vm2628_vm12 = vcmp.gt.f32.partialorder %v2571_v34, 0.0  ;;  %v2660_v48 = vmul.f32 0.01, %v2571_v34  ;;  %v2804_v25 = vmax.f32 %v2802_v20, %v2803_v21 }
 0x2ba   : >> { %v2692_v5 = vsel %vm2628_vm12, %v2571_v34, %v2660_v48  ;;  %v2895_v59 = vsel %vm2894_vm3, %v2804_v25, %v2893_v23 }
 0x2bb   : >> { %v2737_v7 = vsel %vm4869_vm9, %v2692_v5, -inf  ;;  %v2484_v29 = vpop.f32.mrf.mxu2  ;;  %v2573_v47 = vpop.f32.mrf.mxu3 }
 0x2bc   : >> { %v2805_v50 = vmax.f32 %v2736_v36, %v2737_v7  ;;  %v2485_v35 = vadd.f32 %v2484_v29, %v2396_v22  ;;  %v2308_v46 = vpop.f32.mrf.mxu0  ;;  %v2397_v28 = vpop.f32.mrf.mxu1 }
 0x2bd   : >> { %v2309_v49 = vadd.f32 %v2308_v46, %v4842_v18 }
 0x2be   : >> { %v2806_v43 = vrot.slane %v2805_v50, 4  ;;  %v2574_v45 = vadd.f32 %v2573_v47, %v2485_v35 }
 0x2bf   : >> { %v2398_v11 = vadd.f32 %v2397_v28, %v2309_v49 }
 0x2c0   : >> { %v2807_v1 = vmax.f32 %v2805_v50, %v2806_v43  ;;  %v2661_v13 = vmul.f32 0.01, %v2574_v45  ;;  %vm2629_vm0 = vcmp.gt.f32.partialorder %v2574_v45, 0.0 }
 0x2c2   : >> { %v2808_v52 = vrot.slane %v2807_v1, 2  ;;  %v2693_v57 = vsel %vm2629_vm0, %v2574_v45, %v2661_v13 }
 0x2c3   : >> { %v2486_v24 = vpop.f32.mrf.mxu2  ;;  %v2575_v12 = vpop.f32.mrf.mxu3  ;;  %v2738_v26 = vsel %vm4863_vm7, %v2693_v57, -inf }
 0x2c4   : >> { %v2809_v2 = vmax.f32 %v2807_v1, %v2808_v52  ;;  %v2487_v38 = vadd.f32 %v2486_v24, %v2398_v11  ;;  %v2311_v40 = vpop.f32.mrf.mxu0  ;;  %v2400_v41 = vpop.f32.mrf.mxu1 }
 0x2c5   : >> { %v2312_v3 = vadd.f32 %v2311_v40, %v4842_v18 }
 0x2c6   : >> { %v2810_v31 = vrot.slane %v2809_v2, 1  ;;  %v2576_v56 = vadd.f32 %v2575_v12, %v2487_v38 }
 0x2c7   : >> { %v2401_v44 = vadd.f32 %v2400_v41, %v2312_v3 }
 0x2c8   : >> { %v2811_v42 = vmax.f32 %v2809_v2, %v2810_v31  ;;  %vm2630_vm5 = vcmp.gt.f32.partialorder %v2576_v56, 0.0  ;;  %v2662_v53 = vmul.f32 0.01, %v2576_v56 }
 0x2ca   : >> { %v2897_v58 = vsel %vm2896_vm4, %v2811_v42, %v2895_v59  ;;  %v2694_v51 = vsel %vm2630_vm5, %v2576_v56, %v2662_v53 }
 0x2cb   : >> { %v2907_v9 = vmax.f32 %v2754_v0, %v2897_v58  ;;  %v2739_v55 = vsel %vm4869_vm9, %v2694_v51, -inf  ;;  %v2489_v60 = vpop.f32.mrf.mxu2  ;;  %v2578_v39 = vpop.f32.mrf.mxu3 }
 0x2cc   : >> { %v2812_v10 = vmax.f32 %v2738_v26, %v2739_v55  ;;  %v2490_v37 = vadd.f32 %v2489_v60, %v2401_v44  ;;  %v2313_v32 = vpop.f32.mrf.mxu0  ;;  %v2402_v34 = vpop.f32.mrf.mxu1 }
 0x2cd   : >> { %2909 = vst [vmem:[#allocation2] sm:$0xff] %v2907_v9  ;;  %v2314_v54 = vadd.f32 %v2313_v32, %v4842_v18 }
 0x2ce   : >> { %v2579_v22 = vadd.f32 %v2578_v39, %v2490_v37  ;;  %v2813_v48 = vrot.slane %v2812_v10, 4 }
 0x2cf   : >> { %v2403_v4 = vadd.f32 %v2402_v34, %v2314_v54 }
 0x2d0   : >> { %v2663_v5 = vmul.f32 0.01, %v2579_v22  ;;  %vm2631_vm6 = vcmp.gt.f32.partialorder %v2579_v22, 0.0  ;;  %v2814_v50 = vmax.f32 %v2812_v10, %v2813_v48 }
 0x2d2   : >> { %v2695_v46 = vsel %vm2631_vm6, %v2579_v22, %v2663_v5  ;;  %v2815_v49 = vrot.slane %v2814_v50, 2 }
 0x2d3   : >> { %v2491_v15 = vpop.f32.mrf.mxu2  ;;  %v2580_v8 = vpop.f32.mrf.mxu3  ;;  %v2740_v14 = vsel %vm4863_vm7, %v2695_v46, -inf }
 0x2d4   : >> { %v2492_v19 = vadd.f32 %v2491_v15, %v2403_v4  ;;  %v2316_v36 = vpop.f32.mrf.mxu0  ;;  %v2405_v7 = vpop.f32.mrf.mxu1  ;;  %v2816_v12 = vmax.f32 %v2814_v50, %v2815_v49 }
 0x2d5   : >> { %v2317_v29 = vadd.f32 %v2316_v36, %v4842_v18 }
 0x2d6   : >> { %v2581_v47 = vadd.f32 %v2580_v8, %v2492_v19  ;;  %v2817_v40 = vrot.slane %v2816_v12, 1 }
 0x2d7   : >> { %v2406_v35 = vadd.f32 %v2405_v7, %v2317_v29 }
 0x2d8   : >> { %vm2632_vm8 = vcmp.gt.f32.partialorder %v2581_v47, 0.0  ;;  %v2664_v28 = vmul.f32 0.01, %v2581_v47  ;;  %v2818_v57 = vmax.f32 %v2816_v12, %v2817_v40 }
 0x2da   : >> { %v2696_v20 = vsel %vm2632_vm8, %v2581_v47, %v2664_v28 }
 0x2db   : >> { %v2741_v43 = vsel %vm4869_vm9, %v2696_v20, -inf  ;;  %v2494_v45 = vpop.f32.mrf.mxu2  ;;  %v2583_v30 = vpop.f32.mrf.mxu3 }
 0x2dc   : >> { %v2819_v11 = vmax.f32 %v2740_v14, %v2741_v43  ;;  %v2495_v1 = vadd.f32 %v2494_v45, %v2406_v35  ;;  %v2318_v21 = vpop.f32.mrf.mxu0  ;;  %v2407_v16 = vpop.f32.mrf.mxu1 }
 0x2dd   : >> { %v2319_v52 = vadd.f32 %v2318_v21, %v4842_v18 }
 0x2de   : >> { %v2820_v27 = vrot.slane %v2819_v11, 4  ;;  %v2584_v24 = vadd.f32 %v2583_v30, %v2495_v1 }
 0x2df   : >> { %v2408_v2 = vadd.f32 %v2407_v16, %v2319_v52 }
 0x2e0   : >> { %v2821_v13 = vmax.f32 %v2819_v11, %v2820_v27  ;;  %v2665_v17 = vmul.f32 0.01, %v2584_v24  ;;  %vm2633_vm10 = vcmp.gt.f32.partialorder %v2584_v24, 0.0 }
 0x2e2   : >> { %v2822_v38 = vrot.slane %v2821_v13, 2  ;;  %v2697_v58 = vsel %vm2633_vm10, %v2584_v24, %v2665_v17 }
 0x2e3   : >> { %v2496_v41 = vpop.f32.mrf.mxu2  ;;  %v2585_v25 = vpop.f32.mrf.mxu3  ;;  %v2742_v55 = vsel %vm4863_vm7, %v2697_v58, -inf }
 0x2e4   : >> { %v2823_v3 = vmax.f32 %v2821_v13, %v2822_v38  ;;  %v2497_v31 = vadd.f32 %v2496_v41, %v2408_v2  ;;  %v2321_v56 = vpop.f32.mrf.mxu0  ;;  %v2410_v23 = vpop.f32.mrf.mxu1 }
 0x2e5   : >> { %v2322_v44 = vadd.f32 %v2321_v56, %v4842_v18 }
 0x2e6   : >> { %v2824_v0 = vrot.slane %v2823_v3, 1  ;;  %v2586_v42 = vadd.f32 %v2585_v25, %v2497_v31 }
 0x2e7   : >> { %v2411_v53 = vadd.f32 %v2410_v23, %v2322_v44 }
 0x2e8   : >> { %v2825_v59 = vmax.f32 %v2823_v3, %v2824_v0  ;;  %vm2634_vm11 = vcmp.gt.f32.partialorder %v2586_v42, 0.0  ;;  %v2666_v51 = vmul.f32 0.01, %v2586_v42 }
 0x2ea   : >> { %v2898_v9 = vsel %vm2884_vm13, %v2825_v59, %v2818_v57  ;;  %v2698_v26 = vsel %vm2634_vm11, %v2586_v42, %v2666_v51 }
 0x2eb   : >> { %v2743_v60 = vsel %vm4869_vm9, %v2698_v26, -inf  ;;  %v2499_v39 = vpop.f32.mrf.mxu2  ;;  %v2588_v10 = vpop.f32.mrf.mxu3 }
 0x2ec   : >> { %v2826_v37 = vmax.f32 %v2742_v55, %v2743_v60  ;;  %v2500_v32 = vadd.f32 %v2499_v39, %v2411_v53  ;;  %v2323_v34 = vpop.f32.mrf.mxu0  ;;  %v2412_v54 = vpop.f32.mrf.mxu1 }
 0x2ed   : >> { %v2324_v48 = vadd.f32 %v2323_v34, %v4842_v18 }
 0x2ee   : >> { %v2827_v22 = vrot.slane %v2826_v37, 4  ;;  %v2589_v4 = vadd.f32 %v2588_v10, %v2500_v32 }
 0x2ef   : >> { %v2413_v5 = vadd.f32 %v2412_v54, %v2324_v48 }
 0x2f0   : >> { %v2828_v15 = vmax.f32 %v2826_v37, %v2827_v22  ;;  %v2667_v29 = vmul.f32 0.01, %v2589_v4  ;;  %vm2635_vm13 = vcmp.gt.f32.partialorder %v2589_v4, 0.0 }
 0x2f2   : >> { %v2829_v8 = vrot.slane %v2828_v15, 2  ;;  %v2699_v49 = vsel %vm2635_vm13, %v2589_v4, %v2667_v29 }
 0x2f3   : >> { %v2501_v19 = vpop.f32.mrf.mxu2  ;;  %v2590_v36 = vpop.f32.mrf.mxu3  ;;  %v2744_v30 = vsel %vm4863_vm7, %v2699_v49, -inf }
 0x2f4   : >> { %v2830_v7 = vmax.f32 %v2828_v15, %v2829_v8  ;;  %v2502_v47 = vadd.f32 %v2501_v19, %v2413_v5  ;;  %v2326_v50 = vpop.f32.mrf.mxu0  ;;  %v2415_v35 = vpop.f32.mrf.mxu1 }
 0x2f6   : >> { %v2831_v46 = vrot.slane %v2830_v7, 1  ;;  %v2591_v28 = vadd.f32 %v2590_v36, %v2502_v47 }
 0x2f8   : >> { %v2832_v20 = vmax.f32 %v2830_v7, %v2831_v46  ;;  %vm2636_vm12 = vcmp.gt.f32.partialorder %v2591_v28, 0.0  ;;  %v2668_v14 = vmul.f32 0.01, %v2591_v28 }
 0x2fa   : >> { %v2899_v43 = vsel %vm2886_vm2, %v2832_v20, %v2898_v9  ;;  %v2700_v45 = vsel %vm2636_vm12, %v2591_v28, %v2668_v14  ;;  %v2327_v9 = vadd.f32 %v2326_v50, %v4842_v18 }
 0x2fb   : >> { %v2745_v11 = vsel %vm4869_vm9, %v2700_v45, -inf  ;;  %v2504_v1 = vpop.f32.mrf.mxu2  ;;  %v2593_v21 = vpop.f32.mrf.mxu3 }
 0x2fc   : >> { %v2833_v16 = vmax.f32 %v2744_v30, %v2745_v11  ;;  %v2328_v52 = vpop.f32.mrf.mxu0  ;;  %v2417_v27 = vpop.f32.mrf.mxu1  ;;  %v2416_v10 = vadd.f32 %v2415_v35, %v2327_v9 }
 0x2fd   : >> { %v2329_v42 = vadd.f32 %v2328_v52, %v4842_v18 }
 0x2fe   : >> { %v2834_v24 = vrot.slane %v2833_v16, 4  ;;  %v2505_v54 = vadd.f32 %v2504_v1, %v2416_v10 }
 0x2ff   : >> { %v2418_v55 = vadd.f32 %v2417_v27, %v2329_v42 }
 0x300   : >> { %v2835_v12 = vmax.f32 %v2833_v16, %v2834_v24  ;;  %v2594_v47 = vadd.f32 %v2593_v21, %v2505_v54 }
 0x302   : >> { %v2836_v2 = vrot.slane %v2835_v12, 2  ;;  %v2669_v49 = vmul.f32 0.01, %v2594_v47  ;;  %vm2637_vm0 = vcmp.gt.f32.partialorder %v2594_v47, 0.0 }
 0x303   : >> { %v2506_v13 = vpop.f32.mrf.mxu2  ;;  %v2595_v38 = vpop.f32.mrf.mxu3 }
 0x304   : >> { %v2837_v40 = vmax.f32 %v2835_v12, %v2836_v2  ;;  %v2331_v41 = vpop.f32.mrf.mxu0  ;;  %v2420_v25 = vpop.f32.mrf.mxu1  ;;  %v2507_v37 = vadd.f32 %v2506_v13, %v2418_v55  ;;  %v2701_v24 = vsel %vm2637_vm0, %v2594_v47, %v2669_v49 }
 0x305   : >> { %v2332_v26 = vadd.f32 %v2331_v41, %v4842_v18 }
 0x306   : >> { %v2838_v3 = vrot.slane %v2837_v40, 1  ;;  %v2596_v5 = vadd.f32 %v2595_v38, %v2507_v37 }
 0x307   : >> { %v2421_v32 = vadd.f32 %v2420_v25, %v2332_v26  ;;  %v2746_v25 = vsel %vm4863_vm7, %v2701_v24, -inf  ;;  %v2755_v24 = vld [vmem:[#allocation2 + $0x8] sm:$0xff] }
 0x308   : >> { %v2839_v17 = vmax.f32 %v2837_v40, %v2838_v3  ;;  %v2670_v46 = vmul.f32 0.01, %v2596_v5  ;;  %vm2638_vm2 = vcmp.gt.f32.partialorder %v2596_v5, 0.0 }
 0x30a   : >> { %v4981_v31 = vsel %vm2888_vm1, %v2839_v17, %v2899_v43  ;;  %v2702_v1 = vsel %vm2638_vm2, %v2596_v5, %v2670_v46 }
 0x30b   : >> { %v2509_v56 = vpop.f32.mrf.mxu2  ;;  %v2598_v23 = vpop.f32.mrf.mxu3  ;;  %v2747_v2 = vsel %vm4869_vm9, %v2702_v1, -inf }
 0x30c   : >> { %v2333_v44 = vpop.f32.mrf.mxu0  ;;  %v2422_v0 = vpop.f32.mrf.mxu1  ;;  %v2510_v15 = vadd.f32 %v2509_v56, %v2421_v32  ;;  %v2840_v56 = vmax.f32 %v2746_v25, %v2747_v2 }
 0x30d   : >> { %v2334_v59 = vadd.f32 %v2333_v44, %v4842_v18 }
 0x30e   : >> { %v2599_v50 = vadd.f32 %v2598_v23, %v2510_v15  ;;  %v2841_v26 = vrot.slane %v2840_v56, 4 }
 0x30f   : >> { %v2423_v39 = vadd.f32 %v2422_v0, %v2334_v59 }
 0x310   : >> { %v2671_v45 = vmul.f32 0.01, %v2599_v50  ;;  %vm2639_vm5 = vcmp.gt.f32.partialorder %v2599_v50, 0.0  ;;  %v2842_v32 = vmax.f32 %v2840_v56, %v2841_v26 }
 0x312   : >> { %v2703_v13 = vsel %vm2639_vm5, %v2599_v50, %v2671_v45  ;;  %v2843_v5 = vrot.slane %v2842_v32, 2 }
 0x313   : >> { %v2511_v57 = vpop.f32.mrf.mxu2  ;;  %v2600_v53 = vpop.f32.mrf.mxu3  ;;  %v2748_v23 = vsel %vm4863_vm7, %v2703_v13, -inf }
 0x314   : >> { %v2336_v58 = vpop.f32.mrf.mxu0  ;;  %v2425_v51 = vpop.f32.mrf.mxu1  ;;  %v2512_v34 = vadd.f32 %v2511_v57, %v2423_v39  ;;  %v2844_v47 = vmax.f32 %v2842_v32, %v2843_v5 }
 0x315   : >> { %v2337_v60 = vadd.f32 %v2336_v58, %v4842_v18 }
 0x316   : >> { %v2601_v7 = vadd.f32 %v2600_v53, %v2512_v34 }
 0x317   : >> { %v2426_v22 = vadd.f32 %v2425_v51, %v2337_v60 }
 0x318   : >> { %v2672_v35 = vmul.f32 0.01, %v2601_v7  ;;  %vm2640_vm1 = vcmp.gt.f32.partialorder %v2601_v7, 0.0 }
 0x31a   : >> { %v2704_v52 = vsel %vm2640_vm1, %v2601_v7, %v2672_v35 }
 0x31b   : >> { %v2514_v4 = vpop.f32.mrf.mxu2  ;;  %v2603_v48 = vpop.f32.mrf.mxu3  ;;  %v2749_v40 = vsel %vm4869_vm9, %v2704_v52, -inf }
 0x31c   : >> { %v2338_v8 = vpop.f32.mrf.mxu0  ;;  %v2515_v19 = vadd.f32 %v2514_v4, %v2426_v22  ;;  %v2427_v36 = vpop.f32.mrf.mxu1  ;;  %v2847_v57 = vmax.f32 %v2748_v23, %v2749_v40 }
 0x31d   : >> { %v2339_v29 = vadd.f32 %v2338_v8, %v4842_v18 }
 0x31e   : >> { %v2604_v28 = vadd.f32 %v2603_v48, %v2515_v19  ;;  %v2848_v55 = vrot.slane %v2847_v57, 4 }
 0x31f   : >> { %v2428_v20 = vadd.f32 %v2427_v36, %v2339_v29 }
 0x320   : >> { %v2673_v16 = vmul.f32 0.01, %v2604_v28  ;;  %vm2641_vm6 = vcmp.gt.f32.partialorder %v2604_v28, 0.0  ;;  %v2849_v54 = vmax.f32 %v2847_v57, %v2848_v55 }
 0x322   : >> { %v2705_v41 = vsel %vm2641_vm6, %v2604_v28, %v2673_v16  ;;  %v2850_v19 = vrot.slane %v2849_v54, 2 }
 0x323   : >> { %v2516_v14 = vpop.f32.mrf.mxu2  ;;  %v2605_v43 = vpop.f32.mrf.mxu3  ;;  %v2750_v53 = vsel %vm4863_vm7, %v2705_v41, -inf }
 0x324   : >> { %v2517_v30 = vadd.f32 %v2516_v14, %v2428_v20  ;;  %v2341_v11 = vpop.f32.mrf.mxu0  ;;  %v2430_v12 = vpop.f32.mrf.mxu1  ;;  %v2851_v28 = vmax.f32 %v2849_v54, %v2850_v19  ;;  %v2845_v14 = vrot.slane %v2844_v47, 1 }
 0x325   : >> { %v2342_v27 = vadd.f32 %v2341_v11, %v4842_v18 }
 0x326   : >> { %v2606_v21 = vadd.f32 %v2605_v43, %v2517_v30  ;;  %v2852_v43 = vrot.slane %v2851_v28, 1  ;;  %v2846_v1 = vmax.f32 %v2844_v47, %v2845_v14 }
 0x327   : >> { %v2431_v17 = vadd.f32 %v2430_v12, %v2342_v27 }
 0x328   : >> { %vm2642_vm8 = vcmp.gt.f32.partialorder %v2606_v21, 0.0  ;;  %v2674_v38 = vmul.f32 0.01, %v2606_v21  ;;  %v2853_v16 = vmax.f32 %v2851_v28, %v2852_v43  ;;  %v2901_v6 = vsel %vm2890_vm14, %v2846_v1, %v4981_v31 }
 0x32a   : >> { %v2706_v3 = vsel %vm2642_vm8, %v2606_v21, %v2674_v38  ;;  %v2902_v33 = vsel %vm2892_vm15, %v2853_v16, %v2901_v6 }
 0x32b   : >> { %v2751_v44 = vsel %vm4869_vm9, %v2706_v3, -inf  ;;  %v2519_v0 = vpop.f32.mrf.mxu2  ;;  %v2608_v42 = vpop.f32.mrf.mxu3 }
 0x32c   : >> { %v2520_v59 = vadd.f32 %v2519_v0, %v2431_v17  ;;  %v2343_v58 = vpop.f32.mrf.mxu0  ;;  %v2854_v51 = vmax.f32 %v2750_v53, %v2751_v44  ;;  %v2432_v10 = vpop.f32.mrf.mxu1 }
 0x32d   : >> { %v2344_v9 = vadd.f32 %v2343_v58, %v4842_v18 }
 0x32e   : >> { %v2609_v60 = vadd.f32 %v2608_v42, %v2520_v59  ;;  %v2855_v39 = vrot.slane %v2854_v51, 4 }
 0x32f   : >> { %v2433_v37 = vadd.f32 %v2432_v10, %v2344_v9 }
 0x330   : >> { %v2675_v22 = vmul.f32 0.01, %v2609_v60  ;;  %v2856_v48 = vmax.f32 %v2854_v51, %v2855_v39  ;;  %vm2643_vm10 = vcmp.gt.f32.partialorder %v2609_v60, 0.0 }
 0x332   : >> { %v2707_v36 = vsel %vm2643_vm10, %v2609_v60, %v2675_v22  ;;  %v2857_v7 = vrot.slane %v2856_v48, 2 }
 0x333   : >> { %v2521_v34 = vpop.f32.mrf.mxu2  ;;  %v2610_v15 = vpop.f32.mrf.mxu3  ;;  %v2752_v50 = vsel %vm4863_vm7, %v2707_v36, -inf }
 0x334   : >> { %v2522_v4 = vadd.f32 %v2521_v34, %v2433_v37  ;;  %v2858_v20 = vmax.f32 %v2856_v48, %v2857_v7 }
 0x336   : >> { %v2611_v8 = vadd.f32 %v2610_v15, %v2522_v4  ;;  %v2859_v30 = vrot.slane %v2858_v20, 1 }
 0x338   : >> { %vm2644_vm11 = vcmp.gt.f32.partialorder %v2611_v8, 0.0  ;;  %v2676_v18 = vmul.f32 0.01, %v2611_v8  ;;  %v2860_v21 = vmax.f32 %v2858_v20, %v2859_v30 }
 0x33a   : >> { %v2708_v29 = vsel %vm2644_vm11, %v2611_v8, %v2676_v18  ;;  %v2903_v2 = vsel %vm2894_vm3, %v2860_v21, %v2902_v33 }
 0x33b   : >> { %v2753_v46 = vsel %vm4869_vm9, %v2708_v29, -inf }
 0x33c   : >> { %v2861_v35 = vmax.f32 %v2752_v50, %v2753_v46 }
 0x33e   : >> { %v2862_v49 = vrot.slane %v2861_v35, 4 }
 0x340   : >> { %v2863_v45 = vmax.f32 %v2861_v35, %v2862_v49 }
 0x342   : >> { %v2864_v11 = vrot.slane %v2863_v45, 2 }
 0x344   : >> { %v2865_v52 = vmax.f32 %v2863_v45, %v2864_v11 }
 0x346   : >> { %v2866_v27 = vrot.slane %v2865_v52, 1 }
 0x348   : >> { %v2867_v12 = vmax.f32 %v2865_v52, %v2866_v27 }
 0x349   : > { %511 = sbr.rel (!%p508_p8) target bundleno = 168 (0xa8), region = 138 }
 0x34a   : >> { %v2904_v13 = vsel %vm2896_vm4, %v2867_v12, %v2903_v2 }
 0x34b   : >> { %v2908_v38 = vmax.f32 %v2755_v24, %v2904_v13 }
 0x34d   : >> { %2910 = vst [vmem:[#allocation2 + $0x8] sm:$0xff] %v2908_v38 }
 0x34e PF:  {}
 0x353   : > { %v2911_v40 = vld [vmem:[#allocation2] sm:$0xff] }
 0x354   : > { %v2912_v31 = vld [vmem:[#allocation2 + $0x8] sm:$0xff]  ;;  %2913 = vst [vmem:[%s4003_s24] sm:$0xff] %v2911_v40 }
 0x355   : > { %2914 = vst [vmem:[%s4003_s24 + $0x8] sm:$0xff] %v2912_v31 }
 0x356 PF: > { %p3351_p10 = scmp.gt.s32.totalorder %s4000_s16, 0 }
 0x358   : > { %2918 = sbr.rel (%p3351_p10) target bundleno = 864 (0x360), region = 79 }
 0x35d   : > { %v3802_v41 = vmov 0.0  }
 0x35e   : > { %2919 = vst [vmem:[%s4003_s24] sm:$0xff] %v3802_v41 }
 0x35f   : > { %2920 = vst [vmem:[%s4003_s24 + $0x8] sm:$0xff] %v3802_v41 }
 0x360 PF: > { %s3401_s6 = sshll.u32 %s3776_s0, 4  ;;  %s5266_s13 = sld [smem:[#allocation111_spill]] }
 0x361   : > { %s2936_s11 = sshll.u32 %s4003_s24, 4  ;;  %s2922_s15 = scalar_lea.sflag [#allocation7], %s3975_s27  ;;  %s2937_s11 = int_to_ptr.vmem [resolvable:$true] %s2936_s11 }
 0x366   : > { %s2935_s17 = scalar_lea.hbm %s5266_s13, %s3401_s6  ;;  %s3708_s0 = scalar_lea.hbm %s5266_s13, 32 }
 0x367   : > { %s2938_s14 = sshll.u32 %s2935_s17, 4  ;;  %s2939_s14 = int_to_ptr.hbm [resolvable:$true] %s2938_s14 }
 0x368   : > { %s3702_s16 = sshra.s32 %s2939_s14, 4  ;;  %s3703_s16 = int_to_ptr.hbm [resolvable:$true] %s3702_s16 }
 0x369   : > { %s3704_s12 = scalar_lea.hbm %s3703_s16, 16  ;;  %p3709_p0 = scmp.lt.s32.totalorder %s3703_s16, %s5266_s13 }
 0x36a   : > { %p3705_p11 = scmp.ne.s32.totalorder %s3703_s16, %s3704_s12  ;;  %p3710_p3 = scmp.lt.s32.totalorder %s3708_s0, %s3704_s12 }
 0x36c   : > { %p3706_p12 = pnand %p3705_p11, %p3925_p5  ;;  %p3711_p7 = por %p3710_p3, %p3709_p0 }
 0x36e   : > { %p3707_p13 = pneg %p3706_p12 }
 0x370   : > { %p3712_p9 = pnand %p3711_p7, %p3707_p13 }
 0x372   : > { %3715 = shalt.err (!%p3712_p9)
}
 0x373   : > { %s3803_s27 = smov 128   ;;  %s3804_s24 = smov 8  }
 0x374   : > { %3416 = dma.vmem_to_hbm [thread:$0]  (%p3925_p5), %s2937_s11, 256, %s2939_s14, %s2922_s15, %s3803_s27, %s3803_s27, %s3804_s24  }
 0x375 PF: > { %s5267_s23 = sld [smem:[#allocation20_spill]] }
 0x376   : > { %s5269_s9 = sld [smem:[#allocation22_spill]] }
 0x37b   : > { %s2953_s21 = sand.u32 1, %s5267_s23  }
 0x37c   : > { %p5270_p2 = scmp.ge.s32.totalorder %s5269_s9, 2  ;;  %s2954_s20 = scalar_lea.sflag [#allocation7], %s2953_s21 }
 0x37e   : > { %p3436_p1 = pnand %p5270_p2, %p3893_p6 }
 0x380   : > { %p3437_p4 = pneg %p3436_p1 }
 0x382   : > { %3759 = dma.done.wait (%p3437_p4), %s2954_s20, 256  }
 0x383   : > { %3761 = vsyncadd (%p3437_p4), %s2954_s20, 4294967040  ;;  %s35_s9 = sadd.s32 1, %s5269_s9   ;;  %s5271_s19 = sld [smem:[#allocation21_spill]] }
 0x384   : > { %p32_p8 = scmp.ge.s32.totalorder %s35_s9, 4   ;;  %s5272_s30 = sld [smem:[#allocation26_spill]] }
 0x385   : > { %s5273_s22 = sld [smem:[#allocation24_spill]]  ;;  %s5274_s28 = smov %s3768_s29 }
 0x386   : > { %s5276_s0 = smov %s3780_s8 }
 0x387   :  { %34 = sbr.rel (!%p32_p8) target bundleno = 19 (0x13), region = 149 }
 0x389   : > { %s5275_s29 = smov %s5271_s19 }
 0x38b   : > { %s5277_s8 = smov %s5273_s22 }
 0x38c   :  { %2960 = vsyncpa [#allocation6], 1 }
 0x38d   :  { %2962 = vsyncpa [#allocation6 + $0x1], 1 }
 0x38e   :  { %2963 = vsyncpa [#allocation9], 1 }
 0x38f   :  { %2965 = vsyncpa [#allocation9 + $0x1], 1 }
 0x390   :  { %2966 = vsyncpa [#allocation12], 1 }
 0x391   :  { %2967 = vsyncpa [#allocation7], 1 }
 0x392   :  { %2969 = vsyncpa [#allocation7 + $0x1], 1 }

</bundles_post_ra>
